<compile_context>
chip_gen: v7x
topology: tpu7x:2x2x1
jax: 0.10.0
libtpu: 0.0.40
codegen_flags: <defaults>
</compile_context>

<pallas_src>
import functools

import jax
import jax.numpy as jnp
from jax import lax
from jax.experimental import pallas as pl
from jax.experimental.pallas import tpu as pltpu

VMEM_SPEC = pl.BlockSpec(memory_space=pltpu.MemorySpace.VMEM)
LN_EPS = 1e-6
MATMUL_DTYPE = jnp.bfloat16   # MXU operand dtype on v5e / v6e / v7x (f32 accumulation)


# ------------------------------- fully fused kernel --------------------------------

def _encoder_kernel(x_ref, self_mask_ref, mem_ref, cross_mask_ref, label_ref,
                    label_emb_ref, ln_att_g_ref, ln_att_b_ref,
                    w_qkv_ref, b_qkv_ref, w_out_ref, b_out_ref,
                    ln2_g_ref, ln2_b_ref, w_ff1_ref, b_ff1_ref, w_ff2_ref, b_ff2_ref,
                    o_ref, *, num_heads, num_layers, cross_at, eps):
    """Whole LabelWiseCrossTransformerEncoder forward in one kernel.

    Stacked-weight row layout (leading axis only is indexed, always with static ints):
      attention tables (A = num_layers + 2 rows):
        rows [0, num_layers)      : self-attention of layer i
        row  num_layers           : self-attention of the label-wise layer
        row  num_layers + 1       : cross-attention of layer `cross_at`
      ffn / ln2 tables (L = num_layers + 1 rows):
        rows [0, num_layers)      : layer i
        row  num_layers           : label-wise layer
    """
    B, S, H = x_ref.shape
    Sc = mem_ref.shape[1]
    nh = num_heads
    dh = H // nh
    scale = float(dh) ** -0.5
    max_label = label_emb_ref.shape[0]
    wdt = w_qkv_ref.dtype                       # bf16 MXU operand dtype

    x = x_ref[...].reshape(B * S, H)            # layout-preserving collapse
    mem = mem_ref[...].reshape(B * Sc, H)

    # Hoisted additive masks: 0 where valid, -1e9 where padding (broadcast over heads and
    # queries inside each score add).
    add_self = (self_mask_ref[...] - 1.0) * 1e9     # (B, 1, S)
    add_cross = (cross_mask_ref[...] - 1.0) * 1e9   # (B, 1, Sc)

    def layer_norm(v, g, b):
        mu = jnp.mean(v, axis=-1, keepdims=True)
        c = v - mu
        var = jnp.mean(c * c, axis=-1, keepdims=True)
        return c * lax.rsqrt(var + eps) * g + b

    def attention(q_src, kv_src, add_mask, a, q_len, kv_len, fused_qkv):
        """Multi-head attention with head-fused projections.

        w_qkv columns: [0:H)=Q, [H:2H)=K, [2H:3H)=V; each block is head-major (Dh per head).
        """
        w = w_qkv_ref[a]                        # (H, 3H)  bf16
        bqkv = b_qkv_ref[a]                     # (1, 3H)  f32
        if fused_qkv:                           # self-attention: one (H,3H) projection
            qkv = jnp.dot(q_src.astype(wdt), w,
                          preferred_element_type=jnp.float32) + bqkv
            q, k, v = qkv[:, :H], qkv[:, H:2 * H], qkv[:, 2 * H:]
        else:                                   # cross-attention: Q from q_src, KV from memory
            q = jnp.dot(q_src.astype(wdt), w[:, :H],
                        preferred_element_type=jnp.float32) + bqkv[:, :H]
            kv = jnp.dot(kv_src.astype(wdt), w[:, H:],
                         preferred_element_type=jnp.float32) + bqkv[:, H:]
            k, v = kv[:, :H], kv[:, H:]

        ctx_heads = []
        for h in range(nh):                     # static unroll; score/softmax per head
            sl = slice(h * dh, (h + 1) * dh)
            qh = q[:, sl].reshape(B, q_len, dh)
            kh = k[:, sl].reshape(B, kv_len, dh)
            vh = v[:, sl].reshape(B, kv_len, dh)
            s = jnp.einsum('bqd,bkd->bqk', qh, kh,
                           preferred_element_type=jnp.float32) * scale + add_mask
            m = jnp.max(s, axis=-1, keepdims=True)
            p = jnp.exp(s - m)
            p = p / jnp.sum(p, axis=-1, keepdims=True)       # exact division
            ctx = jnp.einsum('bqk,bkd->bqd', p, vh, preferred_element_type=jnp.float32)
            ctx_heads.append(ctx.reshape(B * q_len, dh))
        ctx = jnp.concatenate(ctx_heads, axis=-1)            # (B*q_len, H)  == concat(heads)
        return jnp.dot(ctx.astype(wdt), w_out_ref[a],
                       preferred_element_type=jnp.float32) + b_out_ref[a]

    def ffn(v, l):
        h1 = jnp.dot(v.astype(wdt), w_ff1_ref[l],
                     preferred_element_type=jnp.float32) + b_ff1_ref[l]
        h1 = jnp.maximum(h1, 0.0)
        return jnp.dot(h1.astype(wdt), w_ff2_ref[l],
                       preferred_element_type=jnp.float32) + b_ff2_ref[l]

    IDX_LW = num_layers          # label-wise layer row (attention + ffn/ln tables)
    IDX_CROSS = num_layers + 1   # cross-attention row (attention tables only)

    # ---- standard layers (cross inputs fed at layer index `cross_at`) ----
    for i in range(num_layers):
        xn = layer_norm(x, ln_att_g_ref[i], ln_att_b_ref[i])
        h = attention(xn, xn, add_self, i, S, S, fused_qkv=True) + x
        if i == cross_at:
            hn = layer_norm(h, ln_att_g_ref[IDX_CROSS], ln_att_b_ref[IDX_CROSS])
            h = attention(hn, mem, add_cross, IDX_CROSS, S, Sc, fused_qkv=False) + h
        hn = layer_norm(h, ln2_g_ref[i], ln2_b_ref[i])
        x = jnp.maximum(ffn(hn, i) + h, 0.0)    # FFN residual + encoder's outer F.relu

    # ---- label-wise layer: in-kernel label-embedding lookup (select-accumulate) ----
    lbl = label_ref[...]                                     # (B, 1) int32
    emb = label_emb_ref[...]                                 # (max_label, H)
    label_vec = jnp.zeros((B, H), jnp.float32)
    for c in range(max_label):                               # static, max_label is tiny
        sel = (lbl == c).astype(jnp.float32)                 # (B, 1)
        label_vec = label_vec + sel * emb[c:c + 1, :]        # (B,1)*(1,H) -> (B,H)
    x = (x.reshape(B, S, H) + label_vec.reshape(B, 1, H)).reshape(B * S, H)

    xn = layer_norm(x, ln_att_g_ref[IDX_LW], ln_att_b_ref[IDX_LW])
    h = attention(xn, xn, add_self, IDX_LW, S, S, fused_qkv=True) + x
    hn = layer_norm(h, ln2_g_ref[IDX_LW], ln2_b_ref[IDX_LW])
    x = jnp.maximum(ffn(hn, IDX_LW) + h, 0.0)

    # ---- final LayerNorm(hidden, eps=1e-6, elementwise_affine=False) ----
    mu = jnp.mean(x, axis=-1, keepdims=True)
    c = x - mu
    var = jnp.mean(c * c, axis=-1, keepdims=True)
    o_ref[...] = (c * lax.rsqrt(var + eps)).reshape(B, S, H)


# ------------------------------- pallas_call wrapper -------------------------------

def labelwise_cross_transformer_encoder(params, embed_src, label, self_mask,
                                        cross_embed, cross_mask, *, num_heads, cross_at=1):
    """Mirrors LabelWiseCrossTransformerEncoder.forward as a single fused Pallas call."""
    B, S, H = embed_src.shape
    num_layers = params['w_ff1'].shape[0] - 1
    label2 = label.astype(jnp.int32).reshape(B, 1)

    args = [embed_src, self_mask, cross_embed, cross_mask, label2,
            params['label_emb'], params['ln_att_g'], params['ln_att_b'],
            params['w_qkv'], params['b_qkv'], params['w_out'], params['b_out'],
            params['ln2_g'], params['ln2_b'],
            params['w_ff1'], params['b_ff1'], params['w_ff2'], params['b_ff2']]

    kernel = functools.partial(_encoder_kernel, num_heads=num_heads,
                               num_layers=num_layers, cross_at=cross_at, eps=LN_EPS)
    return pl.pallas_call(
        kernel,
        out_shape=jax.ShapeDtypeStruct((B, S, H), jnp.float32),
        in_specs=[VMEM_SPEC] * len(args),
        out_specs=VMEM_SPEC,
    )(*args)


# --------------------------------- parameter init ----------------------------------

def init_params(key, hidden, ff, num_layers, num_heads, max_label,
                w_dtype=MATMUL_DTYPE, scale=0.02):
    """Stacked (per-kind) parameter tables; see _encoder_kernel docstring for row layout."""
    A = num_layers + 2          # self-attn per layer + label-wise self-attn + one cross-attn
    L = num_layers + 1          # ffn / second LN per layer + label-wise layer
    ks = jax.random.split(key, 5)
    return {
        'w_qkv': (jax.random.normal(ks[0], (A, hidden, 3 * hidden), jnp.float32)
                  * scale).astype(w_dtype),
        'b_qkv': jnp.zeros((A, 1, 3 * hidden), jnp.float32),
        'w_out': (jax.random.normal(ks[1], (A, hidden, hidden), jnp.float32)
                  * scale).astype(w_dtype),
        'b_out': jnp.zeros((A, 1, hidden), jnp.float32),
        'ln_att_g': jnp.ones((A, 1, hidden), jnp.float32),
        'ln_att_b': jnp.zeros((A, 1, hidden), jnp.float32),
        'ln2_g': jnp.ones((L, 1, hidden), jnp.float32),
        'ln2_b': jnp.zeros((L, 1, hidden), jnp.float32),
        'w_ff1': (jax.random.normal(ks[2], (L, hidden, ff), jnp.float32)
                  * scale).astype(w_dtype),
        'b_ff1': jnp.zeros((L, 1, ff), jnp.float32),
        'w_ff2': (jax.random.normal(ks[3], (L, ff, hidden), jnp.float32)
                  * scale).astype(w_dtype),
        'b_ff2': jnp.zeros((L, 1, hidden), jnp.float32),
        'label_emb': jax.random.normal(ks[4], (max_label, hidden), jnp.float32) * scale,
    }


# --------------------------------------- main ---------------------------------------

if __name__ == "__main__":
    hidden, ff_size, num_layers, num_heads, max_label = 32, 64, 3, 4, 4
    B, S, Sc = 2, 8, 8    # seq lengths multiples of 8 so in-kernel (B,S,H)<->(B*S,H)
                          # reshapes stay layout-preserving

    key = jax.random.PRNGKey(0)
    pk, dk = jax.random.split(key)
    params = init_params(pk, hidden, ff_size, num_layers, num_heads, max_label)

    ks = jax.random.split(dk, 3)
    embed_src = jax.random.normal(ks[0], (B, S, hidden), jnp.float32)
    cross_embed = jax.random.normal(ks[1], (B, Sc, hidden), jnp.float32)
    label = jax.random.randint(ks[2], (B,), 0, max_label)
    self_mask = jnp.ones((B, 1, S), jnp.float32).at[1, 0, S - 2:].set(0.0)   # pad last 2 of b=1
    cross_mask = jnp.ones((B, 1, Sc), jnp.float32).at[0, 0, Sc - 1:].set(0.0)

    fwd = jax.jit(functools.partial(labelwise_cross_transformer_encoder,
                                    num_heads=num_heads))
    out = fwd(params, embed_src, label, self_mask, cross_embed, cross_mask)
    jax.block_until_ready(out)

    assert out.shape == (B, S, hidden)
    assert bool(jnp.all(jnp.isfinite(out)))
    print("KERNEL_OK")
</pallas_src>

<mosaic_0001>
module attributes {stable_mosaic.version = 11 : i64} {
  func.func @_encoder_kernel(%arg0: memref<2x8x32xf32, #tpu.memory_space<vmem>>, %arg1: memref<2x1x8xf32, #tpu.memory_space<vmem>>, %arg2: memref<2x8x32xf32, #tpu.memory_space<vmem>>, %arg3: memref<2x1x8xf32, #tpu.memory_space<vmem>>, %arg4: memref<2x1xi32, #tpu.memory_space<vmem>>, %arg5: memref<4x32xf32, #tpu.memory_space<vmem>>, %arg6: memref<5x1x32xf32, #tpu.memory_space<vmem>>, %arg7: memref<5x1x32xf32, #tpu.memory_space<vmem>>, %arg8: memref<5x32x96xbf16, #tpu.memory_space<vmem>>, %arg9: memref<5x1x96xf32, #tpu.memory_space<vmem>>, %arg10: memref<5x32x32xbf16, #tpu.memory_space<vmem>>, %arg11: memref<5x1x32xf32, #tpu.memory_space<vmem>>, %arg12: memref<4x1x32xf32, #tpu.memory_space<vmem>>, %arg13: memref<4x1x32xf32, #tpu.memory_space<vmem>>, %arg14: memref<4x32x64xbf16, #tpu.memory_space<vmem>>, %arg15: memref<4x1x64xf32, #tpu.memory_space<vmem>>, %arg16: memref<4x64x32xbf16, #tpu.memory_space<vmem>>, %arg17: memref<4x1x32xf32, #tpu.memory_space<vmem>>, %arg18: memref<2x8x32xf32, #tpu.memory_space<vmem>>) attributes {dimension_semantics = [], scalar_prefetch = 0 : i64, scratch_operands = 0 : i64, tpu.core_type = #tpu.core_type<tc>} {
    %c0 = arith.constant 0 : index
    %c0_0 = arith.constant 0 : index
    %c0_1 = arith.constant 0 : index
    %0 = vector.load %arg0[%c0, %c0_0, %c0_1] : memref<2x8x32xf32, #tpu.memory_space<vmem>>, vector<2x8x32xf32>
    %1 = vector.shape_cast %0 : vector<2x8x32xf32> to vector<16x32xf32>
    %c0_2 = arith.constant 0 : index
    %c0_3 = arith.constant 0 : index
    %c0_4 = arith.constant 0 : index
    %2 = vector.load %arg2[%c0_2, %c0_3, %c0_4] : memref<2x8x32xf32, #tpu.memory_space<vmem>>, vector<2x8x32xf32>
    %3 = vector.shape_cast %2 : vector<2x8x32xf32> to vector<16x32xf32>
    %c0_5 = arith.constant 0 : index
    %c0_6 = arith.constant 0 : index
    %c0_7 = arith.constant 0 : index
    %4 = vector.load %arg1[%c0_5, %c0_6, %c0_7] : memref<2x1x8xf32, #tpu.memory_space<vmem>>, vector<2x1x8xf32>
    %cst = arith.constant 1.000000e+00 : f32
    %5 = vector.broadcast %cst : f32 to vector<2x1x8xf32>
    %6 = arith.subf %4, %5 : vector<2x1x8xf32>
    %cst_8 = arith.constant 1.000000e+09 : f32
    %7 = vector.broadcast %cst_8 : f32 to vector<2x1x8xf32>
    %8 = arith.mulf %6, %7 : vector<2x1x8xf32>
    %c0_9 = arith.constant 0 : index
    %c0_10 = arith.constant 0 : index
    %c0_11 = arith.constant 0 : index
    %9 = vector.load %arg3[%c0_9, %c0_10, %c0_11] : memref<2x1x8xf32, #tpu.memory_space<vmem>>, vector<2x1x8xf32>
    %cst_12 = arith.constant 1.000000e+00 : f32
    %10 = vector.broadcast %cst_12 : f32 to vector<2x1x8xf32>
    %11 = arith.subf %9, %10 : vector<2x1x8xf32>
    %cst_13 = arith.constant 1.000000e+09 : f32
    %12 = vector.broadcast %cst_13 : f32 to vector<2x1x8xf32>
    %13 = arith.mulf %11, %12 : vector<2x1x8xf32>
    %c0_14 = arith.constant 0 : index
    %c0_15 = arith.constant 0 : index
    %c0_16 = arith.constant 0 : index
    %14 = vector.load %arg6[%c0_14, %c0_15, %c0_16] : memref<5x1x32xf32, #tpu.memory_space<vmem>>, vector<1x1x32xf32>
    %15 = vector.shape_cast %14 : vector<1x1x32xf32> to vector<1x32xf32>
    %c0_17 = arith.constant 0 : index
    %c0_18 = arith.constant 0 : index
    %c0_19 = arith.constant 0 : index
    %16 = vector.load %arg7[%c0_17, %c0_18, %c0_19] : memref<5x1x32xf32, #tpu.memory_space<vmem>>, vector<1x1x32xf32>
    %17 = vector.shape_cast %16 : vector<1x1x32xf32> to vector<1x32xf32>
    %cst_20 = arith.constant dense<0.000000e+00> : vector<16xf32>
    %18 = vector.multi_reduction <add>, %1, %cst_20 [1] : vector<16x32xf32> to vector<16xf32>
    %19 = vector.shape_cast %18 : vector<16xf32> to vector<16x1xf32>
    %cst_21 = arith.constant 3.200000e+01 : f32
    %20 = vector.broadcast %cst_21 : f32 to vector<16x1xf32>
    %21 = arith.divf %19, %20 : vector<16x1xf32>
    %22 = vector.broadcast %21 : vector<16x1xf32> to vector<16x32xf32>
    %23 = arith.subf %1, %22 : vector<16x32xf32>
    %24 = arith.mulf %23, %23 : vector<16x32xf32>
    %cst_22 = arith.constant dense<0.000000e+00> : vector<16xf32>
    %25 = vector.multi_reduction <add>, %24, %cst_22 [1] : vector<16x32xf32> to vector<16xf32>
    %26 = vector.shape_cast %25 : vector<16xf32> to vector<16x1xf32>
    %cst_23 = arith.constant 3.200000e+01 : f32
    %27 = vector.broadcast %cst_23 : f32 to vector<16x1xf32>
    %28 = arith.divf %26, %27 : vector<16x1xf32>
    %cst_24 = arith.constant 9.99999997E-7 : f32
    %29 = vector.broadcast %cst_24 : f32 to vector<16x1xf32>
    %30 = arith.addf %28, %29 : vector<16x1xf32>
    %31 = math.rsqrt %30 : vector<16x1xf32>
    %32 = vector.broadcast %31 : vector<16x1xf32> to vector<16x32xf32>
    %33 = arith.mulf %23, %32 : vector<16x32xf32>
    %34 = vector.broadcast %15 : vector<1x32xf32> to vector<16x32xf32>
    %35 = arith.mulf %33, %34 : vector<16x32xf32>
    %36 = vector.broadcast %17 : vector<1x32xf32> to vector<16x32xf32>
    %37 = arith.addf %35, %36 : vector<16x32xf32>
    %c0_25 = arith.constant 0 : index
    %c0_26 = arith.constant 0 : index
    %c0_27 = arith.constant 0 : index
    %38 = vector.load %arg8[%c0_25, %c0_26, %c0_27] : memref<5x32x96xbf16, #tpu.memory_space<vmem>>, vector<1x32x96xbf16>
    %39 = vector.shape_cast %38 : vector<1x32x96xbf16> to vector<32x96xbf16>
    %c0_28 = arith.constant 0 : index
    %c0_29 = arith.constant 0 : index
    %c0_30 = arith.constant 0 : index
    %40 = vector.load %arg9[%c0_28, %c0_29, %c0_30] : memref<5x1x96xf32, #tpu.memory_space<vmem>>, vector<1x1x96xf32>
    %41 = vector.shape_cast %40 : vector<1x1x96xf32> to vector<1x96xf32>
    %42 = arith.truncf %37 : vector<16x32xf32> to vector<16x32xbf16>
    %cst_31 = arith.constant dense<0.000000e+00> : vector<16x96xf32>
    %43 = tpu.matmul %42, %39, %cst_31 {dimension_numbers = #tpu.dot_dimension_numbers<[1], [0], [0], [1], [0, 0, 1, 1], [], []>} : vector<16x32xbf16>, vector<32x96xbf16>, vector<16x96xf32> -> vector<16x96xf32>
    %44 = vector.broadcast %41 : vector<1x96xf32> to vector<16x96xf32>
    %45 = arith.addf %43, %44 : vector<16x96xf32>
    %46 = vector.extract_strided_slice %45 {offsets = [0, 0], sizes = [16, 32], strides = [1, 1]} : vector<16x96xf32> to vector<16x32xf32>
    %47 = vector.extract_strided_slice %45 {offsets = [0, 32], sizes = [16, 32], strides = [1, 1]} : vector<16x96xf32> to vector<16x32xf32>
    %48 = vector.extract_strided_slice %45 {offsets = [0, 64], sizes = [16, 32], strides = [1, 1]} : vector<16x96xf32> to vector<16x32xf32>
    %49 = vector.extract_strided_slice %46 {offsets = [0, 0], sizes = [16, 8], strides = [1, 1]} : vector<16x32xf32> to vector<16x8xf32>
    %50 = vector.shape_cast %49 : vector<16x8xf32> to vector<2x8x8xf32>
    %51 = vector.extract_strided_slice %47 {offsets = [0, 0], sizes = [16, 8], strides = [1, 1]} : vector<16x32xf32> to vector<16x8xf32>
    %52 = vector.shape_cast %51 : vector<16x8xf32> to vector<2x8x8xf32>
    %53 = vector.extract_strided_slice %48 {offsets = [0, 0], sizes = [16, 8], strides = [1, 1]} : vector<16x32xf32> to vector<16x8xf32>
    %54 = vector.shape_cast %53 : vector<16x8xf32> to vector<2x8x8xf32>
    "tpu.trace_start"() <{level = 10 : i32, message = "bqd,bkd->bqk"}> : () -> ()
    %cst_32 = arith.constant dense<0.000000e+00> : vector<2x8x8xf32>
    %55 = tpu.matmul %50, %52, %cst_32 {dimension_numbers = #tpu.dot_dimension_numbers<[2], [2], [1], [1], [0, 0, 0, 1, 1, 1], [0], [0]>} : vector<2x8x8xf32>, vector<2x8x8xf32>, vector<2x8x8xf32> -> vector<2x8x8xf32>
    "tpu.trace_stop"() : () -> ()
    %cst_33 = arith.constant 0.353553385 : f32
    %56 = vector.broadcast %cst_33 : f32 to vector<2x8x8xf32>
    %57 = arith.mulf %55, %56 : vector<2x8x8xf32>
    %58 = vector.broadcast %8 : vector<2x1x8xf32> to vector<2x8x8xf32>
    %59 = arith.addf %57, %58 : vector<2x8x8xf32>
    %cst_34 = arith.constant dense<0xFF800000> : vector<2x8xf32>
    %60 = vector.multi_reduction <maximumf>, %59, %cst_34 [2] : vector<2x8x8xf32> to vector<2x8xf32>
    %61 = vector.shape_cast %60 : vector<2x8xf32> to vector<2x8x1xf32>
    %62 = vector.broadcast %61 : vector<2x8x1xf32> to vector<2x8x8xf32>
    %63 = arith.subf %59, %62 : vector<2x8x8xf32>
    %64 = math.exp %63 : vector<2x8x8xf32>
    %cst_35 = arith.constant dense<0.000000e+00> : vector<2x8xf32>
    %65 = vector.multi_reduction <add>, %64, %cst_35 [2] : vector<2x8x8xf32> to vector<2x8xf32>
    %66 = vector.shape_cast %65 : vector<2x8xf32> to vector<2x8x1xf32>
    %67 = vector.broadcast %66 : vector<2x8x1xf32> to vector<2x8x8xf32>
    %68 = arith.divf %64, %67 : vector<2x8x8xf32>
    "tpu.trace_start"() <{level = 10 : i32, message = "bqk,bkd->bqd"}> : () -> ()
    %cst_36 = arith.constant dense<0.000000e+00> : vector<2x8x8xf32>
    %69 = tpu.matmul %68, %54, %cst_36 {dimension_numbers = #tpu.dot_dimension_numbers<[2], [1], [1], [2], [0, 0, 0, 1, 1, 2], [0], [0]>} : vector<2x8x8xf32>, vector<2x8x8xf32>, vector<2x8x8xf32> -> vector<2x8x8xf32>
    "tpu.trace_stop"() : () -> ()
    %70 = vector.shape_cast %69 : vector<2x8x8xf32> to vector<16x8xf32>
    %71 = vector.extract_strided_slice %46 {offsets = [0, 8], sizes = [16, 8], strides = [1, 1]} : vector<16x32xf32> to vector<16x8xf32>
    %72 = vector.shape_cast %71 : vector<16x8xf32> to vector<2x8x8xf32>
    %73 = vector.extract_strided_slice %47 {offsets = [0, 8], sizes = [16, 8], strides = [1, 1]} : vector<16x32xf32> to vector<16x8xf32>
    %74 = vector.shape_cast %73 : vector<16x8xf32> to vector<2x8x8xf32>
    %75 = vector.extract_strided_slice %48 {offsets = [0, 8], sizes = [16, 8], strides = [1, 1]} : vector<16x32xf32> to vector<16x8xf32>
    %76 = vector.shape_cast %75 : vector<16x8xf32> to vector<2x8x8xf32>
    "tpu.trace_start"() <{level = 10 : i32, message = "bqd,bkd->bqk"}> : () -> ()
    %cst_37 = arith.constant dense<0.000000e+00> : vector<2x8x8xf32>
    %77 = tpu.matmul %72, %74, %cst_37 {dimension_numbers = #tpu.dot_dimension_numbers<[2], [2], [1], [1], [0, 0, 0, 1, 1, 1], [0], [0]>} : vector<2x8x8xf32>, vector<2x8x8xf32>, vector<2x8x8xf32> -> vector<2x8x8xf32>
    "tpu.trace_stop"() : () -> ()
    %cst_38 = arith.constant 0.353553385 : f32
    %78 = vector.broadcast %cst_38 : f32 to vector<2x8x8xf32>
    %79 = arith.mulf %77, %78 : vector<2x8x8xf32>
    %80 = vector.broadcast %8 : vector<2x1x8xf32> to vector<2x8x8xf32>
    %81 = arith.addf %79, %80 : vector<2x8x8xf32>
    %cst_39 = arith.constant dense<0xFF800000> : vector<2x8xf32>
    %82 = vector.multi_reduction <maximumf>, %81, %cst_39 [2] : vector<2x8x8xf32> to vector<2x8xf32>
    %83 = vector.shape_cast %82 : vector<2x8xf32> to vector<2x8x1xf32>
    %84 = vector.broadcast %83 : vector<2x8x1xf32> to vector<2x8x8xf32>
    %85 = arith.subf %81, %84 : vector<2x8x8xf32>
    %86 = math.exp %85 : vector<2x8x8xf32>
    %cst_40 = arith.constant dense<0.000000e+00> : vector<2x8xf32>
    %87 = vector.multi_reduction <add>, %86, %cst_40 [2] : vector<2x8x8xf32> to vector<2x8xf32>
    %88 = vector.shape_cast %87 : vector<2x8xf32> to vector<2x8x1xf32>
    %89 = vector.broadcast %88 : vector<2x8x1xf32> to vector<2x8x8xf32>
    %90 = arith.divf %86, %89 : vector<2x8x8xf32>
    "tpu.trace_start"() <{level = 10 : i32, message = "bqk,bkd->bqd"}> : () -> ()
    %cst_41 = arith.constant dense<0.000000e+00> : vector<2x8x8xf32>
    %91 = tpu.matmul %90, %76, %cst_41 {dimension_numbers = #tpu.dot_dimension_numbers<[2], [1], [1], [2], [0, 0, 0, 1, 1, 2], [0], [0]>} : vector<2x8x8xf32>, vector<2x8x8xf32>, vector<2x8x8xf32> -> vector<2x8x8xf32>
    "tpu.trace_stop"() : () -> ()
    %92 = vector.shape_cast %91 : vector<2x8x8xf32> to vector<16x8xf32>
    %93 = vector.extract_strided_slice %46 {offsets = [0, 16], sizes = [16, 8], strides = [1, 1]} : vector<16x32xf32> to vector<16x8xf32>
    %94 = vector.shape_cast %93 : vector<16x8xf32> to vector<2x8x8xf32>
    %95 = vector.extract_strided_slice %47 {offsets = [0, 16], sizes = [16, 8], strides = [1, 1]} : vector<16x32xf32> to vector<16x8xf32>
    %96 = vector.shape_cast %95 : vector<16x8xf32> to vector<2x8x8xf32>
    %97 = vector.extract_strided_slice %48 {offsets = [0, 16], sizes = [16, 8], strides = [1, 1]} : vector<16x32xf32> to vector<16x8xf32>
    %98 = vector.shape_cast %97 : vector<16x8xf32> to vector<2x8x8xf32>
    "tpu.trace_start"() <{level = 10 : i32, message = "bqd,bkd->bqk"}> : () -> ()
    %cst_42 = arith.constant dense<0.000000e+00> : vector<2x8x8xf32>
    %99 = tpu.matmul %94, %96, %cst_42 {dimension_numbers = #tpu.dot_dimension_numbers<[2], [2], [1], [1], [0, 0, 0, 1, 1, 1], [0], [0]>} : vector<2x8x8xf32>, vector<2x8x8xf32>, vector<2x8x8xf32> -> vector<2x8x8xf32>
    "tpu.trace_stop"() : () -> ()
    %cst_43 = arith.constant 0.353553385 : f32
    %100 = vector.broadcast %cst_43 : f32 to vector<2x8x8xf32>
    %101 = arith.mulf %99, %100 : vector<2x8x8xf32>
    %102 = vector.broadcast %8 : vector<2x1x8xf32> to vector<2x8x8xf32>
    %103 = arith.addf %101, %102 : vector<2x8x8xf32>
    %cst_44 = arith.constant dense<0xFF800000> : vector<2x8xf32>
    %104 = vector.multi_reduction <maximumf>, %103, %cst_44 [2] : vector<2x8x8xf32> to vector<2x8xf32>
    %105 = vector.shape_cast %104 : vector<2x8xf32> to vector<2x8x1xf32>
    %106 = vector.broadcast %105 : vector<2x8x1xf32> to vector<2x8x8xf32>
    %107 = arith.subf %103, %106 : vector<2x8x8xf32>
    %108 = math.exp %107 : vector<2x8x8xf32>
    %cst_45 = arith.constant dense<0.000000e+00> : vector<2x8xf32>
    %109 = vector.multi_reduction <add>, %108, %cst_45 [2] : vector<2x8x8xf32> to vector<2x8xf32>
    %110 = vector.shape_cast %109 : vector<2x8xf32> to vector<2x8x1xf32>
    %111 = vector.broadcast %110 : vector<2x8x1xf32> to vector<2x8x8xf32>
    %112 = arith.divf %108, %111 : vector<2x8x8xf32>
    "tpu.trace_start"() <{level = 10 : i32, message = "bqk,bkd->bqd"}> : () -> ()
    %cst_46 = arith.constant dense<0.000000e+00> : vector<2x8x8xf32>
    %113 = tpu.matmul %112, %98, %cst_46 {dimension_numbers = #tpu.dot_dimension_numbers<[2], [1], [1], [2], [0, 0, 0, 1, 1, 2], [0], [0]>} : vector<2x8x8xf32>, vector<2x8x8xf32>, vector<2x8x8xf32> -> vector<2x8x8xf32>
    "tpu.trace_stop"() : () -> ()
    %114 = vector.shape_cast %113 : vector<2x8x8xf32> to vector<16x8xf32>
    %115 = vector.extract_strided_slice %46 {offsets = [0, 24], sizes = [16, 8], strides = [1, 1]} : vector<16x32xf32> to vector<16x8xf32>
    %116 = vector.shape_cast %115 : vector<16x8xf32> to vector<2x8x8xf32>
    %117 = vector.extract_strided_slice %47 {offsets = [0, 24], sizes = [16, 8], strides = [1, 1]} : vector<16x32xf32> to vector<16x8xf32>
    %118 = vector.shape_cast %117 : vector<16x8xf32> to vector<2x8x8xf32>
    %119 = vector.extract_strided_slice %48 {offsets = [0, 24], sizes = [16, 8], strides = [1, 1]} : vector<16x32xf32> to vector<16x8xf32>
    %120 = vector.shape_cast %119 : vector<16x8xf32> to vector<2x8x8xf32>
    "tpu.trace_start"() <{level = 10 : i32, message = "bqd,bkd->bqk"}> : () -> ()
    %cst_47 = arith.constant dense<0.000000e+00> : vector<2x8x8xf32>
    %121 = tpu.matmul %116, %118, %cst_47 {dimension_numbers = #tpu.dot_dimension_numbers<[2], [2], [1], [1], [0, 0, 0, 1, 1, 1], [0], [0]>} : vector<2x8x8xf32>, vector<2x8x8xf32>, vector<2x8x8xf32> -> vector<2x8x8xf32>
    "tpu.trace_stop"() : () -> ()
    %cst_48 = arith.constant 0.353553385 : f32
    %122 = vector.broadcast %cst_48 : f32 to vector<2x8x8xf32>
    %123 = arith.mulf %121, %122 : vector<2x8x8xf32>
    %124 = vector.broadcast %8 : vector<2x1x8xf32> to vector<2x8x8xf32>
    %125 = arith.addf %123, %124 : vector<2x8x8xf32>
    %cst_49 = arith.constant dense<0xFF800000> : vector<2x8xf32>
    %126 = vector.multi_reduction <maximumf>, %125, %cst_49 [2] : vector<2x8x8xf32> to vector<2x8xf32>
    %127 = vector.shape_cast %126 : vector<2x8xf32> to vector<2x8x1xf32>
    %128 = vector.broadcast %127 : vector<2x8x1xf32> to vector<2x8x8xf32>
    %129 = arith.subf %125, %128 : vector<2x8x8xf32>
    %130 = math.exp %129 : vector<2x8x8xf32>
    %cst_50 = arith.constant dense<0.000000e+00> : vector<2x8xf32>
    %131 = vector.multi_reduction <add>, %130, %cst_50 [2] : vector<2x8x8xf32> to vector<2x8xf32>
    %132 = vector.shape_cast %131 : vector<2x8xf32> to vector<2x8x1xf32>
    %133 = vector.broadcast %132 : vector<2x8x1xf32> to vector<2x8x8xf32>
    %134 = arith.divf %130, %133 : vector<2x8x8xf32>
    "tpu.trace_start"() <{level = 10 : i32, message = "bqk,bkd->bqd"}> : () -> ()
    %cst_51 = arith.constant dense<0.000000e+00> : vector<2x8x8xf32>
    %135 = tpu.matmul %134, %120, %cst_51 {dimension_numbers = #tpu.dot_dimension_numbers<[2], [1], [1], [2], [0, 0, 0, 1, 1, 2], [0], [0]>} : vector<2x8x8xf32>, vector<2x8x8xf32>, vector<2x8x8xf32> -> vector<2x8x8xf32>
    "tpu.trace_stop"() : () -> ()
    %136 = vector.shape_cast %135 : vector<2x8x8xf32> to vector<16x8xf32>
    %137 = tpu.concatenate %70, %92, %114, %136 in 1 : vector<16x8xf32>, vector<16x8xf32>, vector<16x8xf32>, vector<16x8xf32> -> vector<16x32xf32>
    %138 = arith.truncf %137 : vector<16x32xf32> to vector<16x32xbf16>
    %c0_52 = arith.constant 0 : index
    %c0_53 = arith.constant 0 : index
    %c0_54 = arith.constant 0 : index
    %139 = vector.load %arg10[%c0_52, %c0_53, %c0_54] : memref<5x32x32xbf16, #tpu.memory_space<vmem>>, vector<1x32x32xbf16>
    %140 = vector.shape_cast %139 : vector<1x32x32xbf16> to vector<32x32xbf16>
    %cst_55 = arith.constant dense<0.000000e+00> : vector<16x32xf32>
    %141 = tpu.matmul %138, %140, %cst_55 {dimension_numbers = #tpu.dot_dimension_numbers<[1], [0], [0], [1], [0, 0, 1, 1], [], []>} : vector<16x32xbf16>, vector<32x32xbf16>, vector<16x32xf32> -> vector<16x32xf32>
    %c0_56 = arith.constant 0 : index
    %c0_57 = arith.constant 0 : index
    %c0_58 = arith.constant 0 : index
    %142 = vector.load %arg11[%c0_56, %c0_57, %c0_58] : memref<5x1x32xf32, #tpu.memory_space<vmem>>, vector<1x1x32xf32>
    %143 = vector.shape_cast %142 : vector<1x1x32xf32> to vector<1x32xf32>
    %144 = vector.broadcast %143 : vector<1x32xf32> to vector<16x32xf32>
    %145 = arith.addf %141, %144 : vector<16x32xf32>
    %146 = arith.addf %145, %1 : vector<16x32xf32>
    %c0_59 = arith.constant 0 : index
    %c0_60 = arith.constant 0 : index
    %c0_61 = arith.constant 0 : index
    %147 = vector.load %arg12[%c0_59, %c0_60, %c0_61] : memref<4x1x32xf32, #tpu.memory_space<vmem>>, vector<1x1x32xf32>
    %148 = vector.shape_cast %147 : vector<1x1x32xf32> to vector<1x32xf32>
    %c0_62 = arith.constant 0 : index
    %c0_63 = arith.constant 0 : index
    %c0_64 = arith.constant 0 : index
    %149 = vector.load %arg13[%c0_62, %c0_63, %c0_64] : memref<4x1x32xf32, #tpu.memory_space<vmem>>, vector<1x1x32xf32>
    %150 = vector.shape_cast %149 : vector<1x1x32xf32> to vector<1x32xf32>
    %cst_65 = arith.constant dense<0.000000e+00> : vector<16xf32>
    %151 = vector.multi_reduction <add>, %146, %cst_65 [1] : vector<16x32xf32> to vector<16xf32>
    %152 = vector.shape_cast %151 : vector<16xf32> to vector<16x1xf32>
    %cst_66 = arith.constant 3.200000e+01 : f32
    %153 = vector.broadcast %cst_66 : f32 to vector<16x1xf32>
    %154 = arith.divf %152, %153 : vector<16x1xf32>
    %155 = vector.broadcast %154 : vector<16x1xf32> to vector<16x32xf32>
    %156 = arith.subf %146, %155 : vector<16x32xf32>
    %157 = arith.mulf %156, %156 : vector<16x32xf32>
    %cst_67 = arith.constant dense<0.000000e+00> : vector<16xf32>
    %158 = vector.multi_reduction <add>, %157, %cst_67 [1] : vector<16x32xf32> to vector<16xf32>
    %159 = vector.shape_cast %158 : vector<16xf32> to vector<16x1xf32>
    %cst_68 = arith.constant 3.200000e+01 : f32
    %160 = vector.broadcast %cst_68 : f32 to vector<16x1xf32>
    %161 = arith.divf %159, %160 : vector<16x1xf32>
    %cst_69 = arith.constant 9.99999997E-7 : f32
    %162 = vector.broadcast %cst_69 : f32 to vector<16x1xf32>
    %163 = arith.addf %161, %162 : vector<16x1xf32>
    %164 = math.rsqrt %163 : vector<16x1xf32>
    %165 = vector.broadcast %164 : vector<16x1xf32> to vector<16x32xf32>
    %166 = arith.mulf %156, %165 : vector<16x32xf32>
    %167 = vector.broadcast %148 : vector<1x32xf32> to vector<16x32xf32>
    %168 = arith.mulf %166, %167 : vector<16x32xf32>
    %169 = vector.broadcast %150 : vector<1x32xf32> to vector<16x32xf32>
    %170 = arith.addf %168, %169 : vector<16x32xf32>
    %171 = arith.truncf %170 : vector<16x32xf32> to vector<16x32xbf16>
    %c0_70 = arith.constant 0 : index
    %c0_71 = arith.constant 0 : index
    %c0_72 = arith.constant 0 : index
    %172 = vector.load %arg14[%c0_70, %c0_71, %c0_72] : memref<4x32x64xbf16, #tpu.memory_space<vmem>>, vector<1x32x64xbf16>
    %173 = vector.shape_cast %172 : vector<1x32x64xbf16> to vector<32x64xbf16>
    %cst_73 = arith.constant dense<0.000000e+00> : vector<16x64xf32>
    %174 = tpu.matmul %171, %173, %cst_73 {dimension_numbers = #tpu.dot_dimension_numbers<[1], [0], [0], [1], [0, 0, 1, 1], [], []>} : vector<16x32xbf16>, vector<32x64xbf16>, vector<16x64xf32> -> vector<16x64xf32>
    %c0_74 = arith.constant 0 : index
    %c0_75 = arith.constant 0 : index
    %c0_76 = arith.constant 0 : index
    %175 = vector.load %arg15[%c0_74, %c0_75, %c0_76] : memref<4x1x64xf32, #tpu.memory_space<vmem>>, vector<1x1x64xf32>
    %176 = vector.shape_cast %175 : vector<1x1x64xf32> to vector<1x64xf32>
    %177 = vector.broadcast %176 : vector<1x64xf32> to vector<16x64xf32>
    %178 = arith.addf %174, %177 : vector<16x64xf32>
    %cst_77 = arith.constant 0.000000e+00 : f32
    %179 = vector.broadcast %cst_77 : f32 to vector<16x64xf32>
    %180 = arith.maximumf %178, %179 : vector<16x64xf32>
    %181 = arith.truncf %180 : vector<16x64xf32> to vector<16x64xbf16>
    %c0_78 = arith.constant 0 : index
    %c0_79 = arith.constant 0 : index
    %c0_80 = arith.constant 0 : index
    %182 = vector.load %arg16[%c0_78, %c0_79, %c0_80] : memref<4x64x32xbf16, #tpu.memory_space<vmem>>, vector<1x64x32xbf16>
    %183 = vector.shape_cast %182 : vector<1x64x32xbf16> to vector<64x32xbf16>
    %cst_81 = arith.constant dense<0.000000e+00> : vector<16x32xf32>
    %184 = tpu.matmul %181, %183, %cst_81 {dimension_numbers = #tpu.dot_dimension_numbers<[1], [0], [0], [1], [0, 0, 1, 1], [], []>} : vector<16x64xbf16>, vector<64x32xbf16>, vector<16x32xf32> -> vector<16x32xf32>
    %c0_82 = arith.constant 0 : index
    %c0_83 = arith.constant 0 : index
    %c0_84 = arith.constant 0 : index
    %185 = vector.load %arg17[%c0_82, %c0_83, %c0_84] : memref<4x1x32xf32, #tpu.memory_space<vmem>>, vector<1x1x32xf32>
    %186 = vector.shape_cast %185 : vector<1x1x32xf32> to vector<1x32xf32>
    %187 = vector.broadcast %186 : vector<1x32xf32> to vector<16x32xf32>
    %188 = arith.addf %184, %187 : vector<16x32xf32>
    %189 = arith.addf %188, %146 : vector<16x32xf32>
    %cst_85 = arith.constant 0.000000e+00 : f32
    %190 = vector.broadcast %cst_85 : f32 to vector<16x32xf32>
    %191 = arith.maximumf %189, %190 : vector<16x32xf32>
    %c1 = arith.constant 1 : index
    %c0_86 = arith.constant 0 : index
    %c0_87 = arith.constant 0 : index
    %192 = vector.load %arg6[%c1, %c0_86, %c0_87] : memref<5x1x32xf32, #tpu.memory_space<vmem>>, vector<1x1x32xf32>
    %193 = vector.shape_cast %192 : vector<1x1x32xf32> to vector<1x32xf32>
    %c1_88 = arith.constant 1 : index
    %c0_89 = arith.constant 0 : index
    %c0_90 = arith.constant 0 : index
    %194 = vector.load %arg7[%c1_88, %c0_89, %c0_90] : memref<5x1x32xf32, #tpu.memory_space<vmem>>, vector<1x1x32xf32>
    %195 = vector.shape_cast %194 : vector<1x1x32xf32> to vector<1x32xf32>
    %cst_91 = arith.constant dense<0.000000e+00> : vector<16xf32>
    %196 = vector.multi_reduction <add>, %191, %cst_91 [1] : vector<16x32xf32> to vector<16xf32>
    %197 = vector.shape_cast %196 : vector<16xf32> to vector<16x1xf32>
    %cst_92 = arith.constant 3.200000e+01 : f32
    %198 = vector.broadcast %cst_92 : f32 to vector<16x1xf32>
    %199 = arith.divf %197, %198 : vector<16x1xf32>
    %200 = vector.broadcast %199 : vector<16x1xf32> to vector<16x32xf32>
    %201 = arith.subf %191, %200 : vector<16x32xf32>
    %202 = arith.mulf %201, %201 : vector<16x32xf32>
    %cst_93 = arith.constant dense<0.000000e+00> : vector<16xf32>
    %203 = vector.multi_reduction <add>, %202, %cst_93 [1] : vector<16x32xf32> to vector<16xf32>
    %204 = vector.shape_cast %203 : vector<16xf32> to vector<16x1xf32>
    %cst_94 = arith.constant 3.200000e+01 : f32
    %205 = vector.broadcast %cst_94 : f32 to vector<16x1xf32>
    %206 = arith.divf %204, %205 : vector<16x1xf32>
    %cst_95 = arith.constant 9.99999997E-7 : f32
    %207 = vector.broadcast %cst_95 : f32 to vector<16x1xf32>
    %208 = arith.addf %206, %207 : vector<16x1xf32>
    %209 = math.rsqrt %208 : vector<16x1xf32>
    %210 = vector.broadcast %209 : vector<16x1xf32> to vector<16x32xf32>
    %211 = arith.mulf %201, %210 : vector<16x32xf32>
    %212 = vector.broadcast %193 : vector<1x32xf32> to vector<16x32xf32>
    %213 = arith.mulf %211, %212 : vector<16x32xf32>
    %214 = vector.broadcast %195 : vector<1x32xf32> to vector<16x32xf32>
    %215 = arith.addf %213, %214 : vector<16x32xf32>
    %c1_96 = arith.constant 1 : index
    %c0_97 = arith.constant 0 : index
    %c0_98 = arith.constant 0 : index
    %216 = vector.load %arg8[%c1_96, %c0_97, %c0_98] : memref<5x32x96xbf16, #tpu.memory_space<vmem>>, vector<1x32x96xbf16>
    %217 = vector.shape_cast %216 : vector<1x32x96xbf16> to vector<32x96xbf16>
    %c1_99 = arith.constant 1 : index
    %c0_100 = arith.constant 0 : index
    %c0_101 = arith.constant 0 : index
    %218 = vector.load %arg9[%c1_99, %c0_100, %c0_101] : memref<5x1x96xf32, #tpu.memory_space<vmem>>, vector<1x1x96xf32>
    %219 = vector.shape_cast %218 : vector<1x1x96xf32> to vector<1x96xf32>
    %220 = arith.truncf %215 : vector<16x32xf32> to vector<16x32xbf16>
    %cst_102 = arith.constant dense<0.000000e+00> : vector<16x96xf32>
    %221 = tpu.matmul %220, %217, %cst_102 {dimension_numbers = #tpu.dot_dimension_numbers<[1], [0], [0], [1], [0, 0, 1, 1], [], []>} : vector<16x32xbf16>, vector<32x96xbf16>, vector<16x96xf32> -> vector<16x96xf32>
    %222 = vector.broadcast %219 : vector<1x96xf32> to vector<16x96xf32>
    %223 = arith.addf %221, %222 : vector<16x96xf32>
    %224 = vector.extract_strided_slice %223 {offsets = [0, 0], sizes = [16, 32], strides = [1, 1]} : vector<16x96xf32> to vector<16x32xf32>
    %225 = vector.extract_strided_slice %223 {offsets = [0, 32], sizes = [16, 32], strides = [1, 1]} : vector<16x96xf32> to vector<16x32xf32>
    %226 = vector.extract_strided_slice %223 {offsets = [0, 64], sizes = [16, 32], strides = [1, 1]} : vector<16x96xf32> to vector<16x32xf32>
    %227 = vector.extract_strided_slice %224 {offsets = [0, 0], sizes = [16, 8], strides = [1, 1]} : vector<16x32xf32> to vector<16x8xf32>
    %228 = vector.shape_cast %227 : vector<16x8xf32> to vector<2x8x8xf32>
    %229 = vector.extract_strided_slice %225 {offsets = [0, 0], sizes = [16, 8], strides = [1, 1]} : vector<16x32xf32> to vector<16x8xf32>
    %230 = vector.shape_cast %229 : vector<16x8xf32> to vector<2x8x8xf32>
    %231 = vector.extract_strided_slice %226 {offsets = [0, 0], sizes = [16, 8], strides = [1, 1]} : vector<16x32xf32> to vector<16x8xf32>
    %232 = vector.shape_cast %231 : vector<16x8xf32> to vector<2x8x8xf32>
    "tpu.trace_start"() <{level = 10 : i32, message = "bqd,bkd->bqk"}> : () -> ()
    %cst_103 = arith.constant dense<0.000000e+00> : vector<2x8x8xf32>
    %233 = tpu.matmul %228, %230, %cst_103 {dimension_numbers = #tpu.dot_dimension_numbers<[2], [2], [1], [1], [0, 0, 0, 1, 1, 1], [0], [0]>} : vector<2x8x8xf32>, vector<2x8x8xf32>, vector<2x8x8xf32> -> vector<2x8x8xf32>
    "tpu.trace_stop"() : () -> ()
    %cst_104 = arith.constant 0.353553385 : f32
    %234 = vector.broadcast %cst_104 : f32 to vector<2x8x8xf32>
    %235 = arith.mulf %233, %234 : vector<2x8x8xf32>
    %236 = vector.broadcast %8 : vector<2x1x8xf32> to vector<2x8x8xf32>
    %237 = arith.addf %235, %236 : vector<2x8x8xf32>
    %cst_105 = arith.constant dense<0xFF800000> : vector<2x8xf32>
    %238 = vector.multi_reduction <maximumf>, %237, %cst_105 [2] : vector<2x8x8xf32> to vector<2x8xf32>
    %239 = vector.shape_cast %238 : vector<2x8xf32> to vector<2x8x1xf32>
    %240 = vector.broadcast %239 : vector<2x8x1xf32> to vector<2x8x8xf32>
    %241 = arith.subf %237, %240 : vector<2x8x8xf32>
    %242 = math.exp %241 : vector<2x8x8xf32>
    %cst_106 = arith.constant dense<0.000000e+00> : vector<2x8xf32>
    %243 = vector.multi_reduction <add>, %242, %cst_106 [2] : vector<2x8x8xf32> to vector<2x8xf32>
    %244 = vector.shape_cast %243 : vector<2x8xf32> to vector<2x8x1xf32>
    %245 = vector.broadcast %244 : vector<2x8x1xf32> to vector<2x8x8xf32>
    %246 = arith.divf %242, %245 : vector<2x8x8xf32>
    "tpu.trace_start"() <{level = 10 : i32, message = "bqk,bkd->bqd"}> : () -> ()
    %cst_107 = arith.constant dense<0.000000e+00> : vector<2x8x8xf32>
    %247 = tpu.matmul %246, %232, %cst_107 {dimension_numbers = #tpu.dot_dimension_numbers<[2], [1], [1], [2], [0, 0, 0, 1, 1, 2], [0], [0]>} : vector<2x8x8xf32>, vector<2x8x8xf32>, vector<2x8x8xf32> -> vector<2x8x8xf32>
    "tpu.trace_stop"() : () -> ()
    %248 = vector.shape_cast %247 : vector<2x8x8xf32> to vector<16x8xf32>
    %249 = vector.extract_strided_slice %224 {offsets = [0, 8], sizes = [16, 8], strides = [1, 1]} : vector<16x32xf32> to vector<16x8xf32>
    %250 = vector.shape_cast %249 : vector<16x8xf32> to vector<2x8x8xf32>
    %251 = vector.extract_strided_slice %225 {offsets = [0, 8], sizes = [16, 8], strides = [1, 1]} : vector<16x32xf32> to vector<16x8xf32>
    %252 = vector.shape_cast %251 : vector<16x8xf32> to vector<2x8x8xf32>
    %253 = vector.extract_strided_slice %226 {offsets = [0, 8], sizes = [16, 8], strides = [1, 1]} : vector<16x32xf32> to vector<16x8xf32>
    %254 = vector.shape_cast %253 : vector<16x8xf32> to vector<2x8x8xf32>
    "tpu.trace_start"() <{level = 10 : i32, message = "bqd,bkd->bqk"}> : () -> ()
    %cst_108 = arith.constant dense<0.000000e+00> : vector<2x8x8xf32>
    %255 = tpu.matmul %250, %252, %cst_108 {dimension_numbers = #tpu.dot_dimension_numbers<[2], [2], [1], [1], [0, 0, 0, 1, 1, 1], [0], [0]>} : vector<2x8x8xf32>, vector<2x8x8xf32>, vector<2x8x8xf32> -> vector<2x8x8xf32>
    "tpu.trace_stop"() : () -> ()
    %cst_109 = arith.constant 0.353553385 : f32
    %256 = vector.broadcast %cst_109 : f32 to vector<2x8x8xf32>
    %257 = arith.mulf %255, %256 : vector<2x8x8xf32>
    %258 = vector.broadcast %8 : vector<2x1x8xf32> to vector<2x8x8xf32>
    %259 = arith.addf %257, %258 : vector<2x8x8xf32>
    %cst_110 = arith.constant dense<0xFF800000> : vector<2x8xf32>
    %260 = vector.multi_reduction <maximumf>, %259, %cst_110 [2] : vector<2x8x8xf32> to vector<2x8xf32>
    %261 = vector.shape_cast %260 : vector<2x8xf32> to vector<2x8x1xf32>
    %262 = vector.broadcast %261 : vector<2x8x1xf32> to vector<2x8x8xf32>
    %263 = arith.subf %259, %262 : vector<2x8x8xf32>
    %264 = math.exp %263 : vector<2x8x8xf32>
    %cst_111 = arith.constant dense<0.000000e+00> : vector<2x8xf32>
    %265 = vector.multi_reduction <add>, %264, %cst_111 [2] : vector<2x8x8xf32> to vector<2x8xf32>
    %266 = vector.shape_cast %265 : vector<2x8xf32> to vector<2x8x1xf32>
    %267 = vector.broadcast %266 : vector<2x8x1xf32> to vector<2x8x8xf32>
    %268 = arith.divf %264, %267 : vector<2x8x8xf32>
    "tpu.trace_start"() <{level = 10 : i32, message = "bqk,bkd->bqd"}> : () -> ()
    %cst_112 = arith.constant dense<0.000000e+00> : vector<2x8x8xf32>
    %269 = tpu.matmul %268, %254, %cst_112 {dimension_numbers = #tpu.dot_dimension_numbers<[2], [1], [1], [2], [0, 0, 0, 1, 1, 2], [0], [0]>} : vector<2x8x8xf32>, vector<2x8x8xf32>, vector<2x8x8xf32> -> vector<2x8x8xf32>
    "tpu.trace_stop"() : () -> ()
    %270 = vector.shape_cast %269 : vector<2x8x8xf32> to vector<16x8xf32>
    %271 = vector.extract_strided_slice %224 {offsets = [0, 16], sizes = [16, 8], strides = [1, 1]} : vector<16x32xf32> to vector<16x8xf32>
    %272 = vector.shape_cast %271 : vector<16x8xf32> to vector<2x8x8xf32>
    %273 = vector.extract_strided_slice %225 {offsets = [0, 16], sizes = [16, 8], strides = [1, 1]} : vector<16x32xf32> to vector<16x8xf32>
    %274 = vector.shape_cast %273 : vector<16x8xf32> to vector<2x8x8xf32>
    %275 = vector.extract_strided_slice %226 {offsets = [0, 16], sizes = [16, 8], strides = [1, 1]} : vector<16x32xf32> to vector<16x8xf32>
    %276 = vector.shape_cast %275 : vector<16x8xf32> to vector<2x8x8xf32>
    "tpu.trace_start"() <{level = 10 : i32, message = "bqd,bkd->bqk"}> : () -> ()
    %cst_113 = arith.constant dense<0.000000e+00> : vector<2x8x8xf32>
    %277 = tpu.matmul %272, %274, %cst_113 {dimension_numbers = #tpu.dot_dimension_numbers<[2], [2], [1], [1], [0, 0, 0, 1, 1, 1], [0], [0]>} : vector<2x8x8xf32>, vector<2x8x8xf32>, vector<2x8x8xf32> -> vector<2x8x8xf32>
    "tpu.trace_stop"() : () -> ()
    %cst_114 = arith.constant 0.353553385 : f32
    %278 = vector.broadcast %cst_114 : f32 to vector<2x8x8xf32>
    %279 = arith.mulf %277, %278 : vector<2x8x8xf32>
    %280 = vector.broadcast %8 : vector<2x1x8xf32> to vector<2x8x8xf32>
    %281 = arith.addf %279, %280 : vector<2x8x8xf32>
    %cst_115 = arith.constant dense<0xFF800000> : vector<2x8xf32>
    %282 = vector.multi_reduction <maximumf>, %281, %cst_115 [2] : vector<2x8x8xf32> to vector<2x8xf32>
    %283 = vector.shape_cast %282 : vector<2x8xf32> to vector<2x8x1xf32>
    %284 = vector.broadcast %283 : vector<2x8x1xf32> to vector<2x8x8xf32>
    %285 = arith.subf %281, %284 : vector<2x8x8xf32>
    %286 = math.exp %285 : vector<2x8x8xf32>
    %cst_116 = arith.constant dense<0.000000e+00> : vector<2x8xf32>
    %287 = vector.multi_reduction <add>, %286, %cst_116 [2] : vector<2x8x8xf32> to vector<2x8xf32>
    %288 = vector.shape_cast %287 : vector<2x8xf32> to vector<2x8x1xf32>
    %289 = vector.broadcast %288 : vector<2x8x1xf32> to vector<2x8x8xf32>
    %290 = arith.divf %286, %289 : vector<2x8x8xf32>
    "tpu.trace_start"() <{level = 10 : i32, message = "bqk,bkd->bqd"}> : () -> ()
    %cst_117 = arith.constant dense<0.000000e+00> : vector<2x8x8xf32>
    %291 = tpu.matmul %290, %276, %cst_117 {dimension_numbers = #tpu.dot_dimension_numbers<[2], [1], [1], [2], [0, 0, 0, 1, 1, 2], [0], [0]>} : vector<2x8x8xf32>, vector<2x8x8xf32>, vector<2x8x8xf32> -> vector<2x8x8xf32>
    "tpu.trace_stop"() : () -> ()
    %292 = vector.shape_cast %291 : vector<2x8x8xf32> to vector<16x8xf32>
    %293 = vector.extract_strided_slice %224 {offsets = [0, 24], sizes = [16, 8], strides = [1, 1]} : vector<16x32xf32> to vector<16x8xf32>
    %294 = vector.shape_cast %293 : vector<16x8xf32> to vector<2x8x8xf32>
    %295 = vector.extract_strided_slice %225 {offsets = [0, 24], sizes = [16, 8], strides = [1, 1]} : vector<16x32xf32> to vector<16x8xf32>
    %296 = vector.shape_cast %295 : vector<16x8xf32> to vector<2x8x8xf32>
    %297 = vector.extract_strided_slice %226 {offsets = [0, 24], sizes = [16, 8], strides = [1, 1]} : vector<16x32xf32> to vector<16x8xf32>
    %298 = vector.shape_cast %297 : vector<16x8xf32> to vector<2x8x8xf32>
    "tpu.trace_start"() <{level = 10 : i32, message = "bqd,bkd->bqk"}> : () -> ()
    %cst_118 = arith.constant dense<0.000000e+00> : vector<2x8x8xf32>
    %299 = tpu.matmul %294, %296, %cst_118 {dimension_numbers = #tpu.dot_dimension_numbers<[2], [2], [1], [1], [0, 0, 0, 1, 1, 1], [0], [0]>} : vector<2x8x8xf32>, vector<2x8x8xf32>, vector<2x8x8xf32> -> vector<2x8x8xf32>
    "tpu.trace_stop"() : () -> ()
    %cst_119 = arith.constant 0.353553385 : f32
    %300 = vector.broadcast %cst_119 : f32 to vector<2x8x8xf32>
    %301 = arith.mulf %299, %300 : vector<2x8x8xf32>
    %302 = vector.broadcast %8 : vector<2x1x8xf32> to vector<2x8x8xf32>
    %303 = arith.addf %301, %302 : vector<2x8x8xf32>
    %cst_120 = arith.constant dense<0xFF800000> : vector<2x8xf32>
    %304 = vector.multi_reduction <maximumf>, %303, %cst_120 [2] : vector<2x8x8xf32> to vector<2x8xf32>
    %305 = vector.shape_cast %304 : vector<2x8xf32> to vector<2x8x1xf32>
    %306 = vector.broadcast %305 : vector<2x8x1xf32> to vector<2x8x8xf32>
    %307 = arith.subf %303, %306 : vector<2x8x8xf32>
    %308 = math.exp %307 : vector<2x8x8xf32>
    %cst_121 = arith.constant dense<0.000000e+00> : vector<2x8xf32>
    %309 = vector.multi_reduction <add>, %308, %cst_121 [2] : vector<2x8x8xf32> to vector<2x8xf32>
    %310 = vector.shape_cast %309 : vector<2x8xf32> to vector<2x8x1xf32>
    %311 = vector.broadcast %310 : vector<2x8x1xf32> to vector<2x8x8xf32>
    %312 = arith.divf %308, %311 : vector<2x8x8xf32>
    "tpu.trace_start"() <{level = 10 : i32, message = "bqk,bkd->bqd"}> : () -> ()
    %cst_122 = arith.constant dense<0.000000e+00> : vector<2x8x8xf32>
    %313 = tpu.matmul %312, %298, %cst_122 {dimension_numbers = #tpu.dot_dimension_numbers<[2], [1], [1], [2], [0, 0, 0, 1, 1, 2], [0], [0]>} : vector<2x8x8xf32>, vector<2x8x8xf32>, vector<2x8x8xf32> -> vector<2x8x8xf32>
    "tpu.trace_stop"() : () -> ()
    %314 = vector.shape_cast %313 : vector<2x8x8xf32> to vector<16x8xf32>
    %315 = tpu.concatenate %248, %270, %292, %314 in 1 : vector<16x8xf32>, vector<16x8xf32>, vector<16x8xf32>, vector<16x8xf32> -> vector<16x32xf32>
    %316 = arith.truncf %315 : vector<16x32xf32> to vector<16x32xbf16>
    %c1_123 = arith.constant 1 : index
    %c0_124 = arith.constant 0 : index
    %c0_125 = arith.constant 0 : index
    %317 = vector.load %arg10[%c1_123, %c0_124, %c0_125] : memref<5x32x32xbf16, #tpu.memory_space<vmem>>, vector<1x32x32xbf16>
    %318 = vector.shape_cast %317 : vector<1x32x32xbf16> to vector<32x32xbf16>
    %cst_126 = arith.constant dense<0.000000e+00> : vector<16x32xf32>
    %319 = tpu.matmul %316, %318, %cst_126 {dimension_numbers = #tpu.dot_dimension_numbers<[1], [0], [0], [1], [0, 0, 1, 1], [], []>} : vector<16x32xbf16>, vector<32x32xbf16>, vector<16x32xf32> -> vector<16x32xf32>
    %c1_127 = arith.constant 1 : index
    %c0_128 = arith.constant 0 : index
    %c0_129 = arith.constant 0 : index
    %320 = vector.load %arg11[%c1_127, %c0_128, %c0_129] : memref<5x1x32xf32, #tpu.memory_space<vmem>>, vector<1x1x32xf32>
    %321 = vector.shape_cast %320 : vector<1x1x32xf32> to vector<1x32xf32>
    %322 = vector.broadcast %321 : vector<1x32xf32> to vector<16x32xf32>
    %323 = arith.addf %319, %322 : vector<16x32xf32>
    %324 = arith.addf %323, %191 : vector<16x32xf32>
    %c4 = arith.constant 4 : index
    %c0_130 = arith.constant 0 : index
    %c0_131 = arith.constant 0 : index
    %325 = vector.load %arg6[%c4, %c0_130, %c0_131] : memref<5x1x32xf32, #tpu.memory_space<vmem>>, vector<1x1x32xf32>
    %326 = vector.shape_cast %325 : vector<1x1x32xf32> to vector<1x32xf32>
    %c4_132 = arith.constant 4 : index
    %c0_133 = arith.constant 0 : index
    %c0_134 = arith.constant 0 : index
    %327 = vector.load %arg7[%c4_132, %c0_133, %c0_134] : memref<5x1x32xf32, #tpu.memory_space<vmem>>, vector<1x1x32xf32>
    %328 = vector.shape_cast %327 : vector<1x1x32xf32> to vector<1x32xf32>
    %cst_135 = arith.constant dense<0.000000e+00> : vector<16xf32>
    %329 = vector.multi_reduction <add>, %324, %cst_135 [1] : vector<16x32xf32> to vector<16xf32>
    %330 = vector.shape_cast %329 : vector<16xf32> to vector<16x1xf32>
    %cst_136 = arith.constant 3.200000e+01 : f32
    %331 = vector.broadcast %cst_136 : f32 to vector<16x1xf32>
    %332 = arith.divf %330, %331 : vector<16x1xf32>
    %333 = vector.broadcast %332 : vector<16x1xf32> to vector<16x32xf32>
    %334 = arith.subf %324, %333 : vector<16x32xf32>
    %335 = arith.mulf %334, %334 : vector<16x32xf32>
    %cst_137 = arith.constant dense<0.000000e+00> : vector<16xf32>
    %336 = vector.multi_reduction <add>, %335, %cst_137 [1] : vector<16x32xf32> to vector<16xf32>
    %337 = vector.shape_cast %336 : vector<16xf32> to vector<16x1xf32>
    %cst_138 = arith.constant 3.200000e+01 : f32
    %338 = vector.broadcast %cst_138 : f32 to vector<16x1xf32>
    %339 = arith.divf %337, %338 : vector<16x1xf32>
    %cst_139 = arith.constant 9.99999997E-7 : f32
    %340 = vector.broadcast %cst_139 : f32 to vector<16x1xf32>
    %341 = arith.addf %339, %340 : vector<16x1xf32>
    %342 = math.rsqrt %341 : vector<16x1xf32>
    %343 = vector.broadcast %342 : vector<16x1xf32> to vector<16x32xf32>
    %344 = arith.mulf %334, %343 : vector<16x32xf32>
    %345 = vector.broadcast %326 : vector<1x32xf32> to vector<16x32xf32>
    %346 = arith.mulf %344, %345 : vector<16x32xf32>
    %347 = vector.broadcast %328 : vector<1x32xf32> to vector<16x32xf32>
    %348 = arith.addf %346, %347 : vector<16x32xf32>
    %c4_140 = arith.constant 4 : index
    %c0_141 = arith.constant 0 : index
    %c0_142 = arith.constant 0 : index
    %349 = vector.load %arg8[%c4_140, %c0_141, %c0_142] : memref<5x32x96xbf16, #tpu.memory_space<vmem>>, vector<1x32x96xbf16>
    %350 = vector.shape_cast %349 : vector<1x32x96xbf16> to vector<32x96xbf16>
    %c4_143 = arith.constant 4 : index
    %c0_144 = arith.constant 0 : index
    %c0_145 = arith.constant 0 : index
    %351 = vector.load %arg9[%c4_143, %c0_144, %c0_145] : memref<5x1x96xf32, #tpu.memory_space<vmem>>, vector<1x1x96xf32>
    %352 = vector.shape_cast %351 : vector<1x1x96xf32> to vector<1x96xf32>
    %353 = arith.truncf %348 : vector<16x32xf32> to vector<16x32xbf16>
    %354 = vector.extract_strided_slice %350 {offsets = [0, 0], sizes = [32, 32], strides = [1, 1]} : vector<32x96xbf16> to vector<32x32xbf16>
    %cst_146 = arith.constant dense<0.000000e+00> : vector<16x32xf32>
    %355 = tpu.matmul %353, %354, %cst_146 {dimension_numbers = #tpu.dot_dimension_numbers<[1], [0], [0], [1], [0, 0, 1, 1], [], []>} : vector<16x32xbf16>, vector<32x32xbf16>, vector<16x32xf32> -> vector<16x32xf32>
    %356 = vector.extract_strided_slice %352 {offsets = [0, 0], sizes = [1, 32], strides = [1, 1]} : vector<1x96xf32> to vector<1x32xf32>
    %357 = vector.broadcast %356 : vector<1x32xf32> to vector<16x32xf32>
    %358 = arith.addf %355, %357 : vector<16x32xf32>
    %359 = arith.truncf %3 : vector<16x32xf32> to vector<16x32xbf16>
    %360 = vector.extract_strided_slice %350 {offsets = [0, 32], sizes = [32, 64], strides = [1, 1]} : vector<32x96xbf16> to vector<32x64xbf16>
    %cst_147 = arith.constant dense<0.000000e+00> : vector<16x64xf32>
    %361 = tpu.matmul %359, %360, %cst_147 {dimension_numbers = #tpu.dot_dimension_numbers<[1], [0], [0], [1], [0, 0, 1, 1], [], []>} : vector<16x32xbf16>, vector<32x64xbf16>, vector<16x64xf32> -> vector<16x64xf32>
    %362 = vector.extract_strided_slice %352 {offsets = [0, 32], sizes = [1, 64], strides = [1, 1]} : vector<1x96xf32> to vector<1x64xf32>
    %363 = vector.broadcast %362 : vector<1x64xf32> to vector<16x64xf32>
    %364 = arith.addf %361, %363 : vector<16x64xf32>
    %365 = vector.extract_strided_slice %364 {offsets = [0, 0], sizes = [16, 32], strides = [1, 1]} : vector<16x64xf32> to vector<16x32xf32>
    %366 = vector.extract_strided_slice %364 {offsets = [0, 32], sizes = [16, 32], strides = [1, 1]} : vector<16x64xf32> to vector<16x32xf32>
    %367 = vector.extract_strided_slice %358 {offsets = [0, 0], sizes = [16, 8], strides = [1, 1]} : vector<16x32xf32> to vector<16x8xf32>
    %368 = vector.shape_cast %367 : vector<16x8xf32> to vector<2x8x8xf32>
    %369 = vector.extract_strided_slice %365 {offsets = [0, 0], sizes = [16, 8], strides = [1, 1]} : vector<16x32xf32> to vector<16x8xf32>
    %370 = vector.shape_cast %369 : vector<16x8xf32> to vector<2x8x8xf32>
    %371 = vector.extract_strided_slice %366 {offsets = [0, 0], sizes = [16, 8], strides = [1, 1]} : vector<16x32xf32> to vector<16x8xf32>
    %372 = vector.shape_cast %371 : vector<16x8xf32> to vector<2x8x8xf32>
    "tpu.trace_start"() <{level = 10 : i32, message = "bqd,bkd->bqk"}> : () -> ()
    %cst_148 = arith.constant dense<0.000000e+00> : vector<2x8x8xf32>
    %373 = tpu.matmul %368, %370, %cst_148 {dimension_numbers = #tpu.dot_dimension_numbers<[2], [2], [1], [1], [0, 0, 0, 1, 1, 1], [0], [0]>} : vector<2x8x8xf32>, vector<2x8x8xf32>, vector<2x8x8xf32> -> vector<2x8x8xf32>
    "tpu.trace_stop"() : () -> ()
    %cst_149 = arith.constant 0.353553385 : f32
    %374 = vector.broadcast %cst_149 : f32 to vector<2x8x8xf32>
    %375 = arith.mulf %373, %374 : vector<2x8x8xf32>
    %376 = vector.broadcast %13 : vector<2x1x8xf32> to vector<2x8x8xf32>
    %377 = arith.addf %375, %376 : vector<2x8x8xf32>
    %cst_150 = arith.constant dense<0xFF800000> : vector<2x8xf32>
    %378 = vector.multi_reduction <maximumf>, %377, %cst_150 [2] : vector<2x8x8xf32> to vector<2x8xf32>
    %379 = vector.shape_cast %378 : vector<2x8xf32> to vector<2x8x1xf32>
    %380 = vector.broadcast %379 : vector<2x8x1xf32> to vector<2x8x8xf32>
    %381 = arith.subf %377, %380 : vector<2x8x8xf32>
    %382 = math.exp %381 : vector<2x8x8xf32>
    %cst_151 = arith.constant dense<0.000000e+00> : vector<2x8xf32>
    %383 = vector.multi_reduction <add>, %382, %cst_151 [2] : vector<2x8x8xf32> to vector<2x8xf32>
    %384 = vector.shape_cast %383 : vector<2x8xf32> to vector<2x8x1xf32>
    %385 = vector.broadcast %384 : vector<2x8x1xf32> to vector<2x8x8xf32>
    %386 = arith.divf %382, %385 : vector<2x8x8xf32>
    "tpu.trace_start"() <{level = 10 : i32, message = "bqk,bkd->bqd"}> : () -> ()
    %cst_152 = arith.constant dense<0.000000e+00> : vector<2x8x8xf32>
    %387 = tpu.matmul %386, %372, %cst_152 {dimension_numbers = #tpu.dot_dimension_numbers<[2], [1], [1], [2], [0, 0, 0, 1, 1, 2], [0], [0]>} : vector<2x8x8xf32>, vector<2x8x8xf32>, vector<2x8x8xf32> -> vector<2x8x8xf32>
    "tpu.trace_stop"() : () -> ()
    %388 = vector.shape_cast %387 : vector<2x8x8xf32> to vector<16x8xf32>
    %389 = vector.extract_strided_slice %358 {offsets = [0, 8], sizes = [16, 8], strides = [1, 1]} : vector<16x32xf32> to vector<16x8xf32>
    %390 = vector.shape_cast %389 : vector<16x8xf32> to vector<2x8x8xf32>
    %391 = vector.extract_strided_slice %365 {offsets = [0, 8], sizes = [16, 8], strides = [1, 1]} : vector<16x32xf32> to vector<16x8xf32>
    %392 = vector.shape_cast %391 : vector<16x8xf32> to vector<2x8x8xf32>
    %393 = vector.extract_strided_slice %366 {offsets = [0, 8], sizes = [16, 8], strides = [1, 1]} : vector<16x32xf32> to vector<16x8xf32>
    %394 = vector.shape_cast %393 : vector<16x8xf32> to vector<2x8x8xf32>
    "tpu.trace_start"() <{level = 10 : i32, message = "bqd,bkd->bqk"}> : () -> ()
    %cst_153 = arith.constant dense<0.000000e+00> : vector<2x8x8xf32>
    %395 = tpu.matmul %390, %392, %cst_153 {dimension_numbers = #tpu.dot_dimension_numbers<[2], [2], [1], [1], [0, 0, 0, 1, 1, 1], [0], [0]>} : vector<2x8x8xf32>, vector<2x8x8xf32>, vector<2x8x8xf32> -> vector<2x8x8xf32>
    "tpu.trace_stop"() : () -> ()
    %cst_154 = arith.constant 0.353553385 : f32
    %396 = vector.broadcast %cst_154 : f32 to vector<2x8x8xf32>
    %397 = arith.mulf %395, %396 : vector<2x8x8xf32>
    %398 = vector.broadcast %13 : vector<2x1x8xf32> to vector<2x8x8xf32>
    %399 = arith.addf %397, %398 : vector<2x8x8xf32>
    %cst_155 = arith.constant dense<0xFF800000> : vector<2x8xf32>
    %400 = vector.multi_reduction <maximumf>, %399, %cst_155 [2] : vector<2x8x8xf32> to vector<2x8xf32>
    %401 = vector.shape_cast %400 : vector<2x8xf32> to vector<2x8x1xf32>
    %402 = vector.broadcast %401 : vector<2x8x1xf32> to vector<2x8x8xf32>
    %403 = arith.subf %399, %402 : vector<2x8x8xf32>
    %404 = math.exp %403 : vector<2x8x8xf32>
    %cst_156 = arith.constant dense<0.000000e+00> : vector<2x8xf32>
    %405 = vector.multi_reduction <add>, %404, %cst_156 [2] : vector<2x8x8xf32> to vector<2x8xf32>
    %406 = vector.shape_cast %405 : vector<2x8xf32> to vector<2x8x1xf32>
    %407 = vector.broadcast %406 : vector<2x8x1xf32> to vector<2x8x8xf32>
    %408 = arith.divf %404, %407 : vector<2x8x8xf32>
    "tpu.trace_start"() <{level = 10 : i32, message = "bqk,bkd->bqd"}> : () -> ()
    %cst_157 = arith.constant dense<0.000000e+00> : vector<2x8x8xf32>
    %409 = tpu.matmul %408, %394, %cst_157 {dimension_numbers = #tpu.dot_dimension_numbers<[2], [1], [1], [2], [0, 0, 0, 1, 1, 2], [0], [0]>} : vector<2x8x8xf32>, vector<2x8x8xf32>, vector<2x8x8xf32> -> vector<2x8x8xf32>
    "tpu.trace_stop"() : () -> ()
    %410 = vector.shape_cast %409 : vector<2x8x8xf32> to vector<16x8xf32>
    %411 = vector.extract_strided_slice %358 {offsets = [0, 16], sizes = [16, 8], strides = [1, 1]} : vector<16x32xf32> to vector<16x8xf32>
    %412 = vector.shape_cast %411 : vector<16x8xf32> to vector<2x8x8xf32>
    %413 = vector.extract_strided_slice %365 {offsets = [0, 16], sizes = [16, 8], strides = [1, 1]} : vector<16x32xf32> to vector<16x8xf32>
    %414 = vector.shape_cast %413 : vector<16x8xf32> to vector<2x8x8xf32>
    %415 = vector.extract_strided_slice %366 {offsets = [0, 16], sizes = [16, 8], strides = [1, 1]} : vector<16x32xf32> to vector<16x8xf32>
    %416 = vector.shape_cast %415 : vector<16x8xf32> to vector<2x8x8xf32>
    "tpu.trace_start"() <{level = 10 : i32, message = "bqd,bkd->bqk"}> : () -> ()
    %cst_158 = arith.constant dense<0.000000e+00> : vector<2x8x8xf32>
    %417 = tpu.matmul %412, %414, %cst_158 {dimension_numbers = #tpu.dot_dimension_numbers<[2], [2], [1], [1], [0, 0, 0, 1, 1, 1], [0], [0]>} : vector<2x8x8xf32>, vector<2x8x8xf32>, vector<2x8x8xf32> -> vector<2x8x8xf32>
    "tpu.trace_stop"() : () -> ()
    %cst_159 = arith.constant 0.353553385 : f32
    %418 = vector.broadcast %cst_159 : f32 to vector<2x8x8xf32>
    %419 = arith.mulf %417, %418 : vector<2x8x8xf32>
    %420 = vector.broadcast %13 : vector<2x1x8xf32> to vector<2x8x8xf32>
    %421 = arith.addf %419, %420 : vector<2x8x8xf32>
    %cst_160 = arith.constant dense<0xFF800000> : vector<2x8xf32>
    %422 = vector.multi_reduction <maximumf>, %421, %cst_160 [2] : vector<2x8x8xf32> to vector<2x8xf32>
    %423 = vector.shape_cast %422 : vector<2x8xf32> to vector<2x8x1xf32>
    %424 = vector.broadcast %423 : vector<2x8x1xf32> to vector<2x8x8xf32>
    %425 = arith.subf %421, %424 : vector<2x8x8xf32>
    %426 = math.exp %425 : vector<2x8x8xf32>
    %cst_161 = arith.constant dense<0.000000e+00> : vector<2x8xf32>
    %427 = vector.multi_reduction <add>, %426, %cst_161 [2] : vector<2x8x8xf32> to vector<2x8xf32>
    %428 = vector.shape_cast %427 : vector<2x8xf32> to vector<2x8x1xf32>
    %429 = vector.broadcast %428 : vector<2x8x1xf32> to vector<2x8x8xf32>
    %430 = arith.divf %426, %429 : vector<2x8x8xf32>
    "tpu.trace_start"() <{level = 10 : i32, message = "bqk,bkd->bqd"}> : () -> ()
    %cst_162 = arith.constant dense<0.000000e+00> : vector<2x8x8xf32>
    %431 = tpu.matmul %430, %416, %cst_162 {dimension_numbers = #tpu.dot_dimension_numbers<[2], [1], [1], [2], [0, 0, 0, 1, 1, 2], [0], [0]>} : vector<2x8x8xf32>, vector<2x8x8xf32>, vector<2x8x8xf32> -> vector<2x8x8xf32>
    "tpu.trace_stop"() : () -> ()
    %432 = vector.shape_cast %431 : vector<2x8x8xf32> to vector<16x8xf32>
    %433 = vector.extract_strided_slice %358 {offsets = [0, 24], sizes = [16, 8], strides = [1, 1]} : vector<16x32xf32> to vector<16x8xf32>
    %434 = vector.shape_cast %433 : vector<16x8xf32> to vector<2x8x8xf32>
    %435 = vector.extract_strided_slice %365 {offsets = [0, 24], sizes = [16, 8], strides = [1, 1]} : vector<16x32xf32> to vector<16x8xf32>
    %436 = vector.shape_cast %435 : vector<16x8xf32> to vector<2x8x8xf32>
    %437 = vector.extract_strided_slice %366 {offsets = [0, 24], sizes = [16, 8], strides = [1, 1]} : vector<16x32xf32> to vector<16x8xf32>
    %438 = vector.shape_cast %437 : vector<16x8xf32> to vector<2x8x8xf32>
    "tpu.trace_start"() <{level = 10 : i32, message = "bqd,bkd->bqk"}> : () -> ()
    %cst_163 = arith.constant dense<0.000000e+00> : vector<2x8x8xf32>
    %439 = tpu.matmul %434, %436, %cst_163 {dimension_numbers = #tpu.dot_dimension_numbers<[2], [2], [1], [1], [0, 0, 0, 1, 1, 1], [0], [0]>} : vector<2x8x8xf32>, vector<2x8x8xf32>, vector<2x8x8xf32> -> vector<2x8x8xf32>
    "tpu.trace_stop"() : () -> ()
    %cst_164 = arith.constant 0.353553385 : f32
    %440 = vector.broadcast %cst_164 : f32 to vector<2x8x8xf32>
    %441 = arith.mulf %439, %440 : vector<2x8x8xf32>
    %442 = vector.broadcast %13 : vector<2x1x8xf32> to vector<2x8x8xf32>
    %443 = arith.addf %441, %442 : vector<2x8x8xf32>
    %cst_165 = arith.constant dense<0xFF800000> : vector<2x8xf32>
    %444 = vector.multi_reduction <maximumf>, %443, %cst_165 [2] : vector<2x8x8xf32> to vector<2x8xf32>
    %445 = vector.shape_cast %444 : vector<2x8xf32> to vector<2x8x1xf32>
    %446 = vector.broadcast %445 : vector<2x8x1xf32> to vector<2x8x8xf32>
    %447 = arith.subf %443, %446 : vector<2x8x8xf32>
    %448 = math.exp %447 : vector<2x8x8xf32>
    %cst_166 = arith.constant dense<0.000000e+00> : vector<2x8xf32>
    %449 = vector.multi_reduction <add>, %448, %cst_166 [2] : vector<2x8x8xf32> to vector<2x8xf32>
    %450 = vector.shape_cast %449 : vector<2x8xf32> to vector<2x8x1xf32>
    %451 = vector.broadcast %450 : vector<2x8x1xf32> to vector<2x8x8xf32>
    %452 = arith.divf %448, %451 : vector<2x8x8xf32>
    "tpu.trace_start"() <{level = 10 : i32, message = "bqk,bkd->bqd"}> : () -> ()
    %cst_167 = arith.constant dense<0.000000e+00> : vector<2x8x8xf32>
    %453 = tpu.matmul %452, %438, %cst_167 {dimension_numbers = #tpu.dot_dimension_numbers<[2], [1], [1], [2], [0, 0, 0, 1, 1, 2], [0], [0]>} : vector<2x8x8xf32>, vector<2x8x8xf32>, vector<2x8x8xf32> -> vector<2x8x8xf32>
    "tpu.trace_stop"() : () -> ()
    %454 = vector.shape_cast %453 : vector<2x8x8xf32> to vector<16x8xf32>
    %455 = tpu.concatenate %388, %410, %432, %454 in 1 : vector<16x8xf32>, vector<16x8xf32>, vector<16x8xf32>, vector<16x8xf32> -> vector<16x32xf32>
    %456 = arith.truncf %455 : vector<16x32xf32> to vector<16x32xbf16>
    %c4_168 = arith.constant 4 : index
    %c0_169 = arith.constant 0 : index
    %c0_170 = arith.constant 0 : index
    %457 = vector.load %arg10[%c4_168, %c0_169, %c0_170] : memref<5x32x32xbf16, #tpu.memory_space<vmem>>, vector<1x32x32xbf16>
    %458 = vector.shape_cast %457 : vector<1x32x32xbf16> to vector<32x32xbf16>
    %cst_171 = arith.constant dense<0.000000e+00> : vector<16x32xf32>
    %459 = tpu.matmul %456, %458, %cst_171 {dimension_numbers = #tpu.dot_dimension_numbers<[1], [0], [0], [1], [0, 0, 1, 1], [], []>} : vector<16x32xbf16>, vector<32x32xbf16>, vector<16x32xf32> -> vector<16x32xf32>
    %c4_172 = arith.constant 4 : index
    %c0_173 = arith.constant 0 : index
    %c0_174 = arith.constant 0 : index
    %460 = vector.load %arg11[%c4_172, %c0_173, %c0_174] : memref<5x1x32xf32, #tpu.memory_space<vmem>>, vector<1x1x32xf32>
    %461 = vector.shape_cast %460 : vector<1x1x32xf32> to vector<1x32xf32>
    %462 = vector.broadcast %461 : vector<1x32xf32> to vector<16x32xf32>
    %463 = arith.addf %459, %462 : vector<16x32xf32>
    %464 = arith.addf %463, %324 : vector<16x32xf32>
    %c1_175 = arith.constant 1 : index
    %c0_176 = arith.constant 0 : index
    %c0_177 = arith.constant 0 : index
    %465 = vector.load %arg12[%c1_175, %c0_176, %c0_177] : memref<4x1x32xf32, #tpu.memory_space<vmem>>, vector<1x1x32xf32>
    %466 = vector.shape_cast %465 : vector<1x1x32xf32> to vector<1x32xf32>
    %c1_178 = arith.constant 1 : index
    %c0_179 = arith.constant 0 : index
    %c0_180 = arith.constant 0 : index
    %467 = vector.load %arg13[%c1_178, %c0_179, %c0_180] : memref<4x1x32xf32, #tpu.memory_space<vmem>>, vector<1x1x32xf32>
    %468 = vector.shape_cast %467 : vector<1x1x32xf32> to vector<1x32xf32>
    %cst_181 = arith.constant dense<0.000000e+00> : vector<16xf32>
    %469 = vector.multi_reduction <add>, %464, %cst_181 [1] : vector<16x32xf32> to vector<16xf32>
    %470 = vector.shape_cast %469 : vector<16xf32> to vector<16x1xf32>
    %cst_182 = arith.constant 3.200000e+01 : f32
    %471 = vector.broadcast %cst_182 : f32 to vector<16x1xf32>
    %472 = arith.divf %470, %471 : vector<16x1xf32>
    %473 = vector.broadcast %472 : vector<16x1xf32> to vector<16x32xf32>
    %474 = arith.subf %464, %473 : vector<16x32xf32>
    %475 = arith.mulf %474, %474 : vector<16x32xf32>
    %cst_183 = arith.constant dense<0.000000e+00> : vector<16xf32>
    %476 = vector.multi_reduction <add>, %475, %cst_183 [1] : vector<16x32xf32> to vector<16xf32>
    %477 = vector.shape_cast %476 : vector<16xf32> to vector<16x1xf32>
    %cst_184 = arith.constant 3.200000e+01 : f32
    %478 = vector.broadcast %cst_184 : f32 to vector<16x1xf32>
    %479 = arith.divf %477, %478 : vector<16x1xf32>
    %cst_185 = arith.constant 9.99999997E-7 : f32
    %480 = vector.broadcast %cst_185 : f32 to vector<16x1xf32>
    %481 = arith.addf %479, %480 : vector<16x1xf32>
    %482 = math.rsqrt %481 : vector<16x1xf32>
    %483 = vector.broadcast %482 : vector<16x1xf32> to vector<16x32xf32>
    %484 = arith.mulf %474, %483 : vector<16x32xf32>
    %485 = vector.broadcast %466 : vector<1x32xf32> to vector<16x32xf32>
    %486 = arith.mulf %484, %485 : vector<16x32xf32>
    %487 = vector.broadcast %468 : vector<1x32xf32> to vector<16x32xf32>
    %488 = arith.addf %486, %487 : vector<16x32xf32>
    %489 = arith.truncf %488 : vector<16x32xf32> to vector<16x32xbf16>
    %c1_186 = arith.constant 1 : index
    %c0_187 = arith.constant 0 : index
    %c0_188 = arith.constant 0 : index
    %490 = vector.load %arg14[%c1_186, %c0_187, %c0_188] : memref<4x32x64xbf16, #tpu.memory_space<vmem>>, vector<1x32x64xbf16>
    %491 = vector.shape_cast %490 : vector<1x32x64xbf16> to vector<32x64xbf16>
    %cst_189 = arith.constant dense<0.000000e+00> : vector<16x64xf32>
    %492 = tpu.matmul %489, %491, %cst_189 {dimension_numbers = #tpu.dot_dimension_numbers<[1], [0], [0], [1], [0, 0, 1, 1], [], []>} : vector<16x32xbf16>, vector<32x64xbf16>, vector<16x64xf32> -> vector<16x64xf32>
    %c1_190 = arith.constant 1 : index
    %c0_191 = arith.constant 0 : index
    %c0_192 = arith.constant 0 : index
    %493 = vector.load %arg15[%c1_190, %c0_191, %c0_192] : memref<4x1x64xf32, #tpu.memory_space<vmem>>, vector<1x1x64xf32>
    %494 = vector.shape_cast %493 : vector<1x1x64xf32> to vector<1x64xf32>
    %495 = vector.broadcast %494 : vector<1x64xf32> to vector<16x64xf32>
    %496 = arith.addf %492, %495 : vector<16x64xf32>
    %cst_193 = arith.constant 0.000000e+00 : f32
    %497 = vector.broadcast %cst_193 : f32 to vector<16x64xf32>
    %498 = arith.maximumf %496, %497 : vector<16x64xf32>
    %499 = arith.truncf %498 : vector<16x64xf32> to vector<16x64xbf16>
    %c1_194 = arith.constant 1 : index
    %c0_195 = arith.constant 0 : index
    %c0_196 = arith.constant 0 : index
    %500 = vector.load %arg16[%c1_194, %c0_195, %c0_196] : memref<4x64x32xbf16, #tpu.memory_space<vmem>>, vector<1x64x32xbf16>
    %501 = vector.shape_cast %500 : vector<1x64x32xbf16> to vector<64x32xbf16>
    %cst_197 = arith.constant dense<0.000000e+00> : vector<16x32xf32>
    %502 = tpu.matmul %499, %501, %cst_197 {dimension_numbers = #tpu.dot_dimension_numbers<[1], [0], [0], [1], [0, 0, 1, 1], [], []>} : vector<16x64xbf16>, vector<64x32xbf16>, vector<16x32xf32> -> vector<16x32xf32>
    %c1_198 = arith.constant 1 : index
    %c0_199 = arith.constant 0 : index
    %c0_200 = arith.constant 0 : index
    %503 = vector.load %arg17[%c1_198, %c0_199, %c0_200] : memref<4x1x32xf32, #tpu.memory_space<vmem>>, vector<1x1x32xf32>
    %504 = vector.shape_cast %503 : vector<1x1x32xf32> to vector<1x32xf32>
    %505 = vector.broadcast %504 : vector<1x32xf32> to vector<16x32xf32>
    %506 = arith.addf %502, %505 : vector<16x32xf32>
    %507 = arith.addf %506, %464 : vector<16x32xf32>
    %cst_201 = arith.constant 0.000000e+00 : f32
    %508 = vector.broadcast %cst_201 : f32 to vector<16x32xf32>
    %509 = arith.maximumf %507, %508 : vector<16x32xf32>
    %c2 = arith.constant 2 : index
    %c0_202 = arith.constant 0 : index
    %c0_203 = arith.constant 0 : index
    %510 = vector.load %arg6[%c2, %c0_202, %c0_203] : memref<5x1x32xf32, #tpu.memory_space<vmem>>, vector<1x1x32xf32>
    %511 = vector.shape_cast %510 : vector<1x1x32xf32> to vector<1x32xf32>
    %c2_204 = arith.constant 2 : index
    %c0_205 = arith.constant 0 : index
    %c0_206 = arith.constant 0 : index
    %512 = vector.load %arg7[%c2_204, %c0_205, %c0_206] : memref<5x1x32xf32, #tpu.memory_space<vmem>>, vector<1x1x32xf32>
    %513 = vector.shape_cast %512 : vector<1x1x32xf32> to vector<1x32xf32>
    %cst_207 = arith.constant dense<0.000000e+00> : vector<16xf32>
    %514 = vector.multi_reduction <add>, %509, %cst_207 [1] : vector<16x32xf32> to vector<16xf32>
    %515 = vector.shape_cast %514 : vector<16xf32> to vector<16x1xf32>
    %cst_208 = arith.constant 3.200000e+01 : f32
    %516 = vector.broadcast %cst_208 : f32 to vector<16x1xf32>
    %517 = arith.divf %515, %516 : vector<16x1xf32>
    %518 = vector.broadcast %517 : vector<16x1xf32> to vector<16x32xf32>
    %519 = arith.subf %509, %518 : vector<16x32xf32>
    %520 = arith.mulf %519, %519 : vector<16x32xf32>
    %cst_209 = arith.constant dense<0.000000e+00> : vector<16xf32>
    %521 = vector.multi_reduction <add>, %520, %cst_209 [1] : vector<16x32xf32> to vector<16xf32>
    %522 = vector.shape_cast %521 : vector<16xf32> to vector<16x1xf32>
    %cst_210 = arith.constant 3.200000e+01 : f32
    %523 = vector.broadcast %cst_210 : f32 to vector<16x1xf32>
    %524 = arith.divf %522, %523 : vector<16x1xf32>
    %cst_211 = arith.constant 9.99999997E-7 : f32
    %525 = vector.broadcast %cst_211 : f32 to vector<16x1xf32>
    %526 = arith.addf %524, %525 : vector<16x1xf32>
    %527 = math.rsqrt %526 : vector<16x1xf32>
    %528 = vector.broadcast %527 : vector<16x1xf32> to vector<16x32xf32>
    %529 = arith.mulf %519, %528 : vector<16x32xf32>
    %530 = vector.broadcast %511 : vector<1x32xf32> to vector<16x32xf32>
    %531 = arith.mulf %529, %530 : vector<16x32xf32>
    %532 = vector.broadcast %513 : vector<1x32xf32> to vector<16x32xf32>
    %533 = arith.addf %531, %532 : vector<16x32xf32>
    %c2_212 = arith.constant 2 : index
    %c0_213 = arith.constant 0 : index
    %c0_214 = arith.constant 0 : index
    %534 = vector.load %arg8[%c2_212, %c0_213, %c0_214] : memref<5x32x96xbf16, #tpu.memory_space<vmem>>, vector<1x32x96xbf16>
    %535 = vector.shape_cast %534 : vector<1x32x96xbf16> to vector<32x96xbf16>
    %c2_215 = arith.constant 2 : index
    %c0_216 = arith.constant 0 : index
    %c0_217 = arith.constant 0 : index
    %536 = vector.load %arg9[%c2_215, %c0_216, %c0_217] : memref<5x1x96xf32, #tpu.memory_space<vmem>>, vector<1x1x96xf32>
    %537 = vector.shape_cast %536 : vector<1x1x96xf32> to vector<1x96xf32>
    %538 = arith.truncf %533 : vector<16x32xf32> to vector<16x32xbf16>
    %cst_218 = arith.constant dense<0.000000e+00> : vector<16x96xf32>
    %539 = tpu.matmul %538, %535, %cst_218 {dimension_numbers = #tpu.dot_dimension_numbers<[1], [0], [0], [1], [0, 0, 1, 1], [], []>} : vector<16x32xbf16>, vector<32x96xbf16>, vector<16x96xf32> -> vector<16x96xf32>
    %540 = vector.broadcast %537 : vector<1x96xf32> to vector<16x96xf32>
    %541 = arith.addf %539, %540 : vector<16x96xf32>
    %542 = vector.extract_strided_slice %541 {offsets = [0, 0], sizes = [16, 32], strides = [1, 1]} : vector<16x96xf32> to vector<16x32xf32>
    %543 = vector.extract_strided_slice %541 {offsets = [0, 32], sizes = [16, 32], strides = [1, 1]} : vector<16x96xf32> to vector<16x32xf32>
    %544 = vector.extract_strided_slice %541 {offsets = [0, 64], sizes = [16, 32], strides = [1, 1]} : vector<16x96xf32> to vector<16x32xf32>
    %545 = vector.extract_strided_slice %542 {offsets = [0, 0], sizes = [16, 8], strides = [1, 1]} : vector<16x32xf32> to vector<16x8xf32>
    %546 = vector.shape_cast %545 : vector<16x8xf32> to vector<2x8x8xf32>
    %547 = vector.extract_strided_slice %543 {offsets = [0, 0], sizes = [16, 8], strides = [1, 1]} : vector<16x32xf32> to vector<16x8xf32>
    %548 = vector.shape_cast %547 : vector<16x8xf32> to vector<2x8x8xf32>
    %549 = vector.extract_strided_slice %544 {offsets = [0, 0], sizes = [16, 8], strides = [1, 1]} : vector<16x32xf32> to vector<16x8xf32>
    %550 = vector.shape_cast %549 : vector<16x8xf32> to vector<2x8x8xf32>
    "tpu.trace_start"() <{level = 10 : i32, message = "bqd,bkd->bqk"}> : () -> ()
    %cst_219 = arith.constant dense<0.000000e+00> : vector<2x8x8xf32>
    %551 = tpu.matmul %546, %548, %cst_219 {dimension_numbers = #tpu.dot_dimension_numbers<[2], [2], [1], [1], [0, 0, 0, 1, 1, 1], [0], [0]>} : vector<2x8x8xf32>, vector<2x8x8xf32>, vector<2x8x8xf32> -> vector<2x8x8xf32>
    "tpu.trace_stop"() : () -> ()
    %cst_220 = arith.constant 0.353553385 : f32
    %552 = vector.broadcast %cst_220 : f32 to vector<2x8x8xf32>
    %553 = arith.mulf %551, %552 : vector<2x8x8xf32>
    %554 = vector.broadcast %8 : vector<2x1x8xf32> to vector<2x8x8xf32>
    %555 = arith.addf %553, %554 : vector<2x8x8xf32>
    %cst_221 = arith.constant dense<0xFF800000> : vector<2x8xf32>
    %556 = vector.multi_reduction <maximumf>, %555, %cst_221 [2] : vector<2x8x8xf32> to vector<2x8xf32>
    %557 = vector.shape_cast %556 : vector<2x8xf32> to vector<2x8x1xf32>
    %558 = vector.broadcast %557 : vector<2x8x1xf32> to vector<2x8x8xf32>
    %559 = arith.subf %555, %558 : vector<2x8x8xf32>
    %560 = math.exp %559 : vector<2x8x8xf32>
    %cst_222 = arith.constant dense<0.000000e+00> : vector<2x8xf32>
    %561 = vector.multi_reduction <add>, %560, %cst_222 [2] : vector<2x8x8xf32> to vector<2x8xf32>
    %562 = vector.shape_cast %561 : vector<2x8xf32> to vector<2x8x1xf32>
    %563 = vector.broadcast %562 : vector<2x8x1xf32> to vector<2x8x8xf32>
    %564 = arith.divf %560, %563 : vector<2x8x8xf32>
    "tpu.trace_start"() <{level = 10 : i32, message = "bqk,bkd->bqd"}> : () -> ()
    %cst_223 = arith.constant dense<0.000000e+00> : vector<2x8x8xf32>
    %565 = tpu.matmul %564, %550, %cst_223 {dimension_numbers = #tpu.dot_dimension_numbers<[2], [1], [1], [2], [0, 0, 0, 1, 1, 2], [0], [0]>} : vector<2x8x8xf32>, vector<2x8x8xf32>, vector<2x8x8xf32> -> vector<2x8x8xf32>
    "tpu.trace_stop"() : () -> ()
    %566 = vector.shape_cast %565 : vector<2x8x8xf32> to vector<16x8xf32>
    %567 = vector.extract_strided_slice %542 {offsets = [0, 8], sizes = [16, 8], strides = [1, 1]} : vector<16x32xf32> to vector<16x8xf32>
    %568 = vector.shape_cast %567 : vector<16x8xf32> to vector<2x8x8xf32>
    %569 = vector.extract_strided_slice %543 {offsets = [0, 8], sizes = [16, 8], strides = [1, 1]} : vector<16x32xf32> to vector<16x8xf32>
    %570 = vector.shape_cast %569 : vector<16x8xf32> to vector<2x8x8xf32>
    %571 = vector.extract_strided_slice %544 {offsets = [0, 8], sizes = [16, 8], strides = [1, 1]} : vector<16x32xf32> to vector<16x8xf32>
    %572 = vector.shape_cast %571 : vector<16x8xf32> to vector<2x8x8xf32>
    "tpu.trace_start"() <{level = 10 : i32, message = "bqd,bkd->bqk"}> : () -> ()
    %cst_224 = arith.constant dense<0.000000e+00> : vector<2x8x8xf32>
    %573 = tpu.matmul %568, %570, %cst_224 {dimension_numbers = #tpu.dot_dimension_numbers<[2], [2], [1], [1], [0, 0, 0, 1, 1, 1], [0], [0]>} : vector<2x8x8xf32>, vector<2x8x8xf32>, vector<2x8x8xf32> -> vector<2x8x8xf32>
    "tpu.trace_stop"() : () -> ()
    %cst_225 = arith.constant 0.353553385 : f32
    %574 = vector.broadcast %cst_225 : f32 to vector<2x8x8xf32>
    %575 = arith.mulf %573, %574 : vector<2x8x8xf32>
    %576 = vector.broadcast %8 : vector<2x1x8xf32> to vector<2x8x8xf32>
    %577 = arith.addf %575, %576 : vector<2x8x8xf32>
    %cst_226 = arith.constant dense<0xFF800000> : vector<2x8xf32>
    %578 = vector.multi_reduction <maximumf>, %577, %cst_226 [2] : vector<2x8x8xf32> to vector<2x8xf32>
    %579 = vector.shape_cast %578 : vector<2x8xf32> to vector<2x8x1xf32>
    %580 = vector.broadcast %579 : vector<2x8x1xf32> to vector<2x8x8xf32>
    %581 = arith.subf %577, %580 : vector<2x8x8xf32>
    %582 = math.exp %581 : vector<2x8x8xf32>
    %cst_227 = arith.constant dense<0.000000e+00> : vector<2x8xf32>
    %583 = vector.multi_reduction <add>, %582, %cst_227 [2] : vector<2x8x8xf32> to vector<2x8xf32>
    %584 = vector.shape_cast %583 : vector<2x8xf32> to vector<2x8x1xf32>
    %585 = vector.broadcast %584 : vector<2x8x1xf32> to vector<2x8x8xf32>
    %586 = arith.divf %582, %585 : vector<2x8x8xf32>
    "tpu.trace_start"() <{level = 10 : i32, message = "bqk,bkd->bqd"}> : () -> ()
    %cst_228 = arith.constant dense<0.000000e+00> : vector<2x8x8xf32>
    %587 = tpu.matmul %586, %572, %cst_228 {dimension_numbers = #tpu.dot_dimension_numbers<[2], [1], [1], [2], [0, 0, 0, 1, 1, 2], [0], [0]>} : vector<2x8x8xf32>, vector<2x8x8xf32>, vector<2x8x8xf32> -> vector<2x8x8xf32>
    "tpu.trace_stop"() : () -> ()
    %588 = vector.shape_cast %587 : vector<2x8x8xf32> to vector<16x8xf32>
    %589 = vector.extract_strided_slice %542 {offsets = [0, 16], sizes = [16, 8], strides = [1, 1]} : vector<16x32xf32> to vector<16x8xf32>
    %590 = vector.shape_cast %589 : vector<16x8xf32> to vector<2x8x8xf32>
    %591 = vector.extract_strided_slice %543 {offsets = [0, 16], sizes = [16, 8], strides = [1, 1]} : vector<16x32xf32> to vector<16x8xf32>
    %592 = vector.shape_cast %591 : vector<16x8xf32> to vector<2x8x8xf32>
    %593 = vector.extract_strided_slice %544 {offsets = [0, 16], sizes = [16, 8], strides = [1, 1]} : vector<16x32xf32> to vector<16x8xf32>
    %594 = vector.shape_cast %593 : vector<16x8xf32> to vector<2x8x8xf32>
    "tpu.trace_start"() <{level = 10 : i32, message = "bqd,bkd->bqk"}> : () -> ()
    %cst_229 = arith.constant dense<0.000000e+00> : vector<2x8x8xf32>
    %595 = tpu.matmul %590, %592, %cst_229 {dimension_numbers = #tpu.dot_dimension_numbers<[2], [2], [1], [1], [0, 0, 0, 1, 1, 1], [0], [0]>} : vector<2x8x8xf32>, vector<2x8x8xf32>, vector<2x8x8xf32> -> vector<2x8x8xf32>
    "tpu.trace_stop"() : () -> ()
    %cst_230 = arith.constant 0.353553385 : f32
    %596 = vector.broadcast %cst_230 : f32 to vector<2x8x8xf32>
    %597 = arith.mulf %595, %596 : vector<2x8x8xf32>
    %598 = vector.broadcast %8 : vector<2x1x8xf32> to vector<2x8x8xf32>
    %599 = arith.addf %597, %598 : vector<2x8x8xf32>
    %cst_231 = arith.constant dense<0xFF800000> : vector<2x8xf32>
    %600 = vector.multi_reduction <maximumf>, %599, %cst_231 [2] : vector<2x8x8xf32> to vector<2x8xf32>
    %601 = vector.shape_cast %600 : vector<2x8xf32> to vector<2x8x1xf32>
    %602 = vector.broadcast %601 : vector<2x8x1xf32> to vector<2x8x8xf32>
    %603 = arith.subf %599, %602 : vector<2x8x8xf32>
    %604 = math.exp %603 : vector<2x8x8xf32>
    %cst_232 = arith.constant dense<0.000000e+00> : vector<2x8xf32>
    %605 = vector.multi_reduction <add>, %604, %cst_232 [2] : vector<2x8x8xf32> to vector<2x8xf32>
    %606 = vector.shape_cast %605 : vector<2x8xf32> to vector<2x8x1xf32>
    %607 = vector.broadcast %606 : vector<2x8x1xf32> to vector<2x8x8xf32>
    %608 = arith.divf %604, %607 : vector<2x8x8xf32>
    "tpu.trace_start"() <{level = 10 : i32, message = "bqk,bkd->bqd"}> : () -> ()
    %cst_233 = arith.constant dense<0.000000e+00> : vector<2x8x8xf32>
    %609 = tpu.matmul %608, %594, %cst_233 {dimension_numbers = #tpu.dot_dimension_numbers<[2], [1], [1], [2], [0, 0, 0, 1, 1, 2], [0], [0]>} : vector<2x8x8xf32>, vector<2x8x8xf32>, vector<2x8x8xf32> -> vector<2x8x8xf32>
    "tpu.trace_stop"() : () -> ()
    %610 = vector.shape_cast %609 : vector<2x8x8xf32> to vector<16x8xf32>
    %611 = vector.extract_strided_slice %542 {offsets = [0, 24], sizes = [16, 8], strides = [1, 1]} : vector<16x32xf32> to vector<16x8xf32>
    %612 = vector.shape_cast %611 : vector<16x8xf32> to vector<2x8x8xf32>
    %613 = vector.extract_strided_slice %543 {offsets = [0, 24], sizes = [16, 8], strides = [1, 1]} : vector<16x32xf32> to vector<16x8xf32>
    %614 = vector.shape_cast %613 : vector<16x8xf32> to vector<2x8x8xf32>
    %615 = vector.extract_strided_slice %544 {offsets = [0, 24], sizes = [16, 8], strides = [1, 1]} : vector<16x32xf32> to vector<16x8xf32>
    %616 = vector.shape_cast %615 : vector<16x8xf32> to vector<2x8x8xf32>
    "tpu.trace_start"() <{level = 10 : i32, message = "bqd,bkd->bqk"}> : () -> ()
    %cst_234 = arith.constant dense<0.000000e+00> : vector<2x8x8xf32>
    %617 = tpu.matmul %612, %614, %cst_234 {dimension_numbers = #tpu.dot_dimension_numbers<[2], [2], [1], [1], [0, 0, 0, 1, 1, 1], [0], [0]>} : vector<2x8x8xf32>, vector<2x8x8xf32>, vector<2x8x8xf32> -> vector<2x8x8xf32>
    "tpu.trace_stop"() : () -> ()
    %cst_235 = arith.constant 0.353553385 : f32
    %618 = vector.broadcast %cst_235 : f32 to vector<2x8x8xf32>
    %619 = arith.mulf %617, %618 : vector<2x8x8xf32>
    %620 = vector.broadcast %8 : vector<2x1x8xf32> to vector<2x8x8xf32>
    %621 = arith.addf %619, %620 : vector<2x8x8xf32>
    %cst_236 = arith.constant dense<0xFF800000> : vector<2x8xf32>
    %622 = vector.multi_reduction <maximumf>, %621, %cst_236 [2] : vector<2x8x8xf32> to vector<2x8xf32>
    %623 = vector.shape_cast %622 : vector<2x8xf32> to vector<2x8x1xf32>
    %624 = vector.broadcast %623 : vector<2x8x1xf32> to vector<2x8x8xf32>
    %625 = arith.subf %621, %624 : vector<2x8x8xf32>
    %626 = math.exp %625 : vector<2x8x8xf32>
    %cst_237 = arith.constant dense<0.000000e+00> : vector<2x8xf32>
    %627 = vector.multi_reduction <add>, %626, %cst_237 [2] : vector<2x8x8xf32> to vector<2x8xf32>
    %628 = vector.shape_cast %627 : vector<2x8xf32> to vector<2x8x1xf32>
    %629 = vector.broadcast %628 : vector<2x8x1xf32> to vector<2x8x8xf32>
    %630 = arith.divf %626, %629 : vector<2x8x8xf32>
    "tpu.trace_start"() <{level = 10 : i32, message = "bqk,bkd->bqd"}> : () -> ()
    %cst_238 = arith.constant dense<0.000000e+00> : vector<2x8x8xf32>
    %631 = tpu.matmul %630, %616, %cst_238 {dimension_numbers = #tpu.dot_dimension_numbers<[2], [1], [1], [2], [0, 0, 0, 1, 1, 2], [0], [0]>} : vector<2x8x8xf32>, vector<2x8x8xf32>, vector<2x8x8xf32> -> vector<2x8x8xf32>
    "tpu.trace_stop"() : () -> ()
    %632 = vector.shape_cast %631 : vector<2x8x8xf32> to vector<16x8xf32>
    %633 = tpu.concatenate %566, %588, %610, %632 in 1 : vector<16x8xf32>, vector<16x8xf32>, vector<16x8xf32>, vector<16x8xf32> -> vector<16x32xf32>
    %634 = arith.truncf %633 : vector<16x32xf32> to vector<16x32xbf16>
    %c2_239 = arith.constant 2 : index
    %c0_240 = arith.constant 0 : index
    %c0_241 = arith.constant 0 : index
    %635 = vector.load %arg10[%c2_239, %c0_240, %c0_241] : memref<5x32x32xbf16, #tpu.memory_space<vmem>>, vector<1x32x32xbf16>
    %636 = vector.shape_cast %635 : vector<1x32x32xbf16> to vector<32x32xbf16>
    %cst_242 = arith.constant dense<0.000000e+00> : vector<16x32xf32>
    %637 = tpu.matmul %634, %636, %cst_242 {dimension_numbers = #tpu.dot_dimension_numbers<[1], [0], [0], [1], [0, 0, 1, 1], [], []>} : vector<16x32xbf16>, vector<32x32xbf16>, vector<16x32xf32> -> vector<16x32xf32>
    %c2_243 = arith.constant 2 : index
    %c0_244 = arith.constant 0 : index
    %c0_245 = arith.constant 0 : index
    %638 = vector.load %arg11[%c2_243, %c0_244, %c0_245] : memref<5x1x32xf32, #tpu.memory_space<vmem>>, vector<1x1x32xf32>
    %639 = vector.shape_cast %638 : vector<1x1x32xf32> to vector<1x32xf32>
    %640 = vector.broadcast %639 : vector<1x32xf32> to vector<16x32xf32>
    %641 = arith.addf %637, %640 : vector<16x32xf32>
    %642 = arith.addf %641, %509 : vector<16x32xf32>
    %c2_246 = arith.constant 2 : index
    %c0_247 = arith.constant 0 : index
    %c0_248 = arith.constant 0 : index
    %643 = vector.load %arg12[%c2_246, %c0_247, %c0_248] : memref<4x1x32xf32, #tpu.memory_space<vmem>>, vector<1x1x32xf32>
    %644 = vector.shape_cast %643 : vector<1x1x32xf32> to vector<1x32xf32>
    %c2_249 = arith.constant 2 : index
    %c0_250 = arith.constant 0 : index
    %c0_251 = arith.constant 0 : index
    %645 = vector.load %arg13[%c2_249, %c0_250, %c0_251] : memref<4x1x32xf32, #tpu.memory_space<vmem>>, vector<1x1x32xf32>
    %646 = vector.shape_cast %645 : vector<1x1x32xf32> to vector<1x32xf32>
    %cst_252 = arith.constant dense<0.000000e+00> : vector<16xf32>
    %647 = vector.multi_reduction <add>, %642, %cst_252 [1] : vector<16x32xf32> to vector<16xf32>
    %648 = vector.shape_cast %647 : vector<16xf32> to vector<16x1xf32>
    %cst_253 = arith.constant 3.200000e+01 : f32
    %649 = vector.broadcast %cst_253 : f32 to vector<16x1xf32>
    %650 = arith.divf %648, %649 : vector<16x1xf32>
    %651 = vector.broadcast %650 : vector<16x1xf32> to vector<16x32xf32>
    %652 = arith.subf %642, %651 : vector<16x32xf32>
    %653 = arith.mulf %652, %652 : vector<16x32xf32>
    %cst_254 = arith.constant dense<0.000000e+00> : vector<16xf32>
    %654 = vector.multi_reduction <add>, %653, %cst_254 [1] : vector<16x32xf32> to vector<16xf32>
    %655 = vector.shape_cast %654 : vector<16xf32> to vector<16x1xf32>
    %cst_255 = arith.constant 3.200000e+01 : f32
    %656 = vector.broadcast %cst_255 : f32 to vector<16x1xf32>
    %657 = arith.divf %655, %656 : vector<16x1xf32>
    %cst_256 = arith.constant 9.99999997E-7 : f32
    %658 = vector.broadcast %cst_256 : f32 to vector<16x1xf32>
    %659 = arith.addf %657, %658 : vector<16x1xf32>
    %660 = math.rsqrt %659 : vector<16x1xf32>
    %661 = vector.broadcast %660 : vector<16x1xf32> to vector<16x32xf32>
    %662 = arith.mulf %652, %661 : vector<16x32xf32>
    %663 = vector.broadcast %644 : vector<1x32xf32> to vector<16x32xf32>
    %664 = arith.mulf %662, %663 : vector<16x32xf32>
    %665 = vector.broadcast %646 : vector<1x32xf32> to vector<16x32xf32>
    %666 = arith.addf %664, %665 : vector<16x32xf32>
    %667 = arith.truncf %666 : vector<16x32xf32> to vector<16x32xbf16>
    %c2_257 = arith.constant 2 : index
    %c0_258 = arith.constant 0 : index
    %c0_259 = arith.constant 0 : index
    %668 = vector.load %arg14[%c2_257, %c0_258, %c0_259] : memref<4x32x64xbf16, #tpu.memory_space<vmem>>, vector<1x32x64xbf16>
    %669 = vector.shape_cast %668 : vector<1x32x64xbf16> to vector<32x64xbf16>
    %cst_260 = arith.constant dense<0.000000e+00> : vector<16x64xf32>
    %670 = tpu.matmul %667, %669, %cst_260 {dimension_numbers = #tpu.dot_dimension_numbers<[1], [0], [0], [1], [0, 0, 1, 1], [], []>} : vector<16x32xbf16>, vector<32x64xbf16>, vector<16x64xf32> -> vector<16x64xf32>
    %c2_261 = arith.constant 2 : index
    %c0_262 = arith.constant 0 : index
    %c0_263 = arith.constant 0 : index
    %671 = vector.load %arg15[%c2_261, %c0_262, %c0_263] : memref<4x1x64xf32, #tpu.memory_space<vmem>>, vector<1x1x64xf32>
    %672 = vector.shape_cast %671 : vector<1x1x64xf32> to vector<1x64xf32>
    %673 = vector.broadcast %672 : vector<1x64xf32> to vector<16x64xf32>
    %674 = arith.addf %670, %673 : vector<16x64xf32>
    %cst_264 = arith.constant 0.000000e+00 : f32
    %675 = vector.broadcast %cst_264 : f32 to vector<16x64xf32>
    %676 = arith.maximumf %674, %675 : vector<16x64xf32>
    %677 = arith.truncf %676 : vector<16x64xf32> to vector<16x64xbf16>
    %c2_265 = arith.constant 2 : index
    %c0_266 = arith.constant 0 : index
    %c0_267 = arith.constant 0 : index
    %678 = vector.load %arg16[%c2_265, %c0_266, %c0_267] : memref<4x64x32xbf16, #tpu.memory_space<vmem>>, vector<1x64x32xbf16>
    %679 = vector.shape_cast %678 : vector<1x64x32xbf16> to vector<64x32xbf16>
    %cst_268 = arith.constant dense<0.000000e+00> : vector<16x32xf32>
    %680 = tpu.matmul %677, %679, %cst_268 {dimension_numbers = #tpu.dot_dimension_numbers<[1], [0], [0], [1], [0, 0, 1, 1], [], []>} : vector<16x64xbf16>, vector<64x32xbf16>, vector<16x32xf32> -> vector<16x32xf32>
    %c2_269 = arith.constant 2 : index
    %c0_270 = arith.constant 0 : index
    %c0_271 = arith.constant 0 : index
    %681 = vector.load %arg17[%c2_269, %c0_270, %c0_271] : memref<4x1x32xf32, #tpu.memory_space<vmem>>, vector<1x1x32xf32>
    %682 = vector.shape_cast %681 : vector<1x1x32xf32> to vector<1x32xf32>
    %683 = vector.broadcast %682 : vector<1x32xf32> to vector<16x32xf32>
    %684 = arith.addf %680, %683 : vector<16x32xf32>
    %685 = arith.addf %684, %642 : vector<16x32xf32>
    %cst_272 = arith.constant 0.000000e+00 : f32
    %686 = vector.broadcast %cst_272 : f32 to vector<16x32xf32>
    %687 = arith.maximumf %685, %686 : vector<16x32xf32>
    %c0_273 = arith.constant 0 : index
    %c0_274 = arith.constant 0 : index
    %688 = vector.load %arg4[%c0_273, %c0_274] : memref<2x1xi32, #tpu.memory_space<vmem>>, vector<2x1xi32>
    %c0_275 = arith.constant 0 : index
    %c0_276 = arith.constant 0 : index
    %689 = vector.load %arg5[%c0_275, %c0_276] : memref<4x32xf32, #tpu.memory_space<vmem>>, vector<4x32xf32>
    %cst_277 = arith.constant 0.000000e+00 : f32
    %690 = vector.broadcast %cst_277 : f32 to vector<2x32xf32>
    %c0_i32 = arith.constant 0 : i32
    %691 = vector.broadcast %c0_i32 : i32 to vector<2x1xi32>
    %692 = arith.cmpi eq, %688, %691 : vector<2x1xi32>
    %693 = arith.extui %692 : vector<2x1xi1> to vector<2x1xi32>
    %694 = arith.sitofp %693 : vector<2x1xi32> to vector<2x1xf32>
    %695 = vector.extract_strided_slice %689 {offsets = [0, 0], sizes = [1, 32], strides = [1, 1]} : vector<4x32xf32> to vector<1x32xf32>
    %696 = vector.broadcast %694 : vector<2x1xf32> to vector<2x32xf32>
    %697 = vector.broadcast %695 : vector<1x32xf32> to vector<2x32xf32>
    %698 = arith.mulf %696, %697 : vector<2x32xf32>
    %699 = arith.addf %690, %698 : vector<2x32xf32>
    %c1_i32 = arith.constant 1 : i32
    %700 = vector.broadcast %c1_i32 : i32 to vector<2x1xi32>
    %701 = arith.cmpi eq, %688, %700 : vector<2x1xi32>
    %702 = arith.extui %701 : vector<2x1xi1> to vector<2x1xi32>
    %703 = arith.sitofp %702 : vector<2x1xi32> to vector<2x1xf32>
    %704 = vector.extract_strided_slice %689 {offsets = [1, 0], sizes = [1, 32], strides = [1, 1]} : vector<4x32xf32> to vector<1x32xf32>
    %705 = vector.broadcast %703 : vector<2x1xf32> to vector<2x32xf32>
    %706 = vector.broadcast %704 : vector<1x32xf32> to vector<2x32xf32>
    %707 = arith.mulf %705, %706 : vector<2x32xf32>
    %708 = arith.addf %699, %707 : vector<2x32xf32>
    %c2_i32 = arith.constant 2 : i32
    %709 = vector.broadcast %c2_i32 : i32 to vector<2x1xi32>
    %710 = arith.cmpi eq, %688, %709 : vector<2x1xi32>
    %711 = arith.extui %710 : vector<2x1xi1> to vector<2x1xi32>
    %712 = arith.sitofp %711 : vector<2x1xi32> to vector<2x1xf32>
    %713 = vector.extract_strided_slice %689 {offsets = [2, 0], sizes = [1, 32], strides = [1, 1]} : vector<4x32xf32> to vector<1x32xf32>
    %714 = vector.broadcast %712 : vector<2x1xf32> to vector<2x32xf32>
    %715 = vector.broadcast %713 : vector<1x32xf32> to vector<2x32xf32>
    %716 = arith.mulf %714, %715 : vector<2x32xf32>
    %717 = arith.addf %708, %716 : vector<2x32xf32>
    %c3_i32 = arith.constant 3 : i32
    %718 = vector.broadcast %c3_i32 : i32 to vector<2x1xi32>
    %719 = arith.cmpi eq, %688, %718 : vector<2x1xi32>
    %720 = arith.extui %719 : vector<2x1xi1> to vector<2x1xi32>
    %721 = arith.sitofp %720 : vector<2x1xi32> to vector<2x1xf32>
    %722 = vector.extract_strided_slice %689 {offsets = [3, 0], sizes = [1, 32], strides = [1, 1]} : vector<4x32xf32> to vector<1x32xf32>
    %723 = vector.broadcast %721 : vector<2x1xf32> to vector<2x32xf32>
    %724 = vector.broadcast %722 : vector<1x32xf32> to vector<2x32xf32>
    %725 = arith.mulf %723, %724 : vector<2x32xf32>
    %726 = arith.addf %717, %725 : vector<2x32xf32>
    %727 = vector.shape_cast %687 : vector<16x32xf32> to vector<2x8x32xf32>
    %728 = vector.shape_cast %726 : vector<2x32xf32> to vector<2x1x32xf32>
    %729 = vector.broadcast %728 : vector<2x1x32xf32> to vector<2x8x32xf32>
    %730 = arith.addf %727, %729 : vector<2x8x32xf32>
    %731 = vector.shape_cast %730 : vector<2x8x32xf32> to vector<16x32xf32>
    %c3 = arith.constant 3 : index
    %c0_278 = arith.constant 0 : index
    %c0_279 = arith.constant 0 : index
    %732 = vector.load %arg6[%c3, %c0_278, %c0_279] : memref<5x1x32xf32, #tpu.memory_space<vmem>>, vector<1x1x32xf32>
    %733 = vector.shape_cast %732 : vector<1x1x32xf32> to vector<1x32xf32>
    %c3_280 = arith.constant 3 : index
    %c0_281 = arith.constant 0 : index
    %c0_282 = arith.constant 0 : index
    %734 = vector.load %arg7[%c3_280, %c0_281, %c0_282] : memref<5x1x32xf32, #tpu.memory_space<vmem>>, vector<1x1x32xf32>
    %735 = vector.shape_cast %734 : vector<1x1x32xf32> to vector<1x32xf32>
    %cst_283 = arith.constant dense<0.000000e+00> : vector<16xf32>
    %736 = vector.multi_reduction <add>, %731, %cst_283 [1] : vector<16x32xf32> to vector<16xf32>
    %737 = vector.shape_cast %736 : vector<16xf32> to vector<16x1xf32>
    %cst_284 = arith.constant 3.200000e+01 : f32
    %738 = vector.broadcast %cst_284 : f32 to vector<16x1xf32>
    %739 = arith.divf %737, %738 : vector<16x1xf32>
    %740 = vector.broadcast %739 : vector<16x1xf32> to vector<16x32xf32>
    %741 = arith.subf %731, %740 : vector<16x32xf32>
    %742 = arith.mulf %741, %741 : vector<16x32xf32>
    %cst_285 = arith.constant dense<0.000000e+00> : vector<16xf32>
    %743 = vector.multi_reduction <add>, %742, %cst_285 [1] : vector<16x32xf32> to vector<16xf32>
    %744 = vector.shape_cast %743 : vector<16xf32> to vector<16x1xf32>
    %cst_286 = arith.constant 3.200000e+01 : f32
    %745 = vector.broadcast %cst_286 : f32 to vector<16x1xf32>
    %746 = arith.divf %744, %745 : vector<16x1xf32>
    %cst_287 = arith.constant 9.99999997E-7 : f32
    %747 = vector.broadcast %cst_287 : f32 to vector<16x1xf32>
    %748 = arith.addf %746, %747 : vector<16x1xf32>
    %749 = math.rsqrt %748 : vector<16x1xf32>
    %750 = vector.broadcast %749 : vector<16x1xf32> to vector<16x32xf32>
    %751 = arith.mulf %741, %750 : vector<16x32xf32>
    %752 = vector.broadcast %733 : vector<1x32xf32> to vector<16x32xf32>
    %753 = arith.mulf %751, %752 : vector<16x32xf32>
    %754 = vector.broadcast %735 : vector<1x32xf32> to vector<16x32xf32>
    %755 = arith.addf %753, %754 : vector<16x32xf32>
    %c3_288 = arith.constant 3 : index
    %c0_289 = arith.constant 0 : index
    %c0_290 = arith.constant 0 : index
    %756 = vector.load %arg8[%c3_288, %c0_289, %c0_290] : memref<5x32x96xbf16, #tpu.memory_space<vmem>>, vector<1x32x96xbf16>
    %757 = vector.shape_cast %756 : vector<1x32x96xbf16> to vector<32x96xbf16>
    %c3_291 = arith.constant 3 : index
    %c0_292 = arith.constant 0 : index
    %c0_293 = arith.constant 0 : index
    %758 = vector.load %arg9[%c3_291, %c0_292, %c0_293] : memref<5x1x96xf32, #tpu.memory_space<vmem>>, vector<1x1x96xf32>
    %759 = vector.shape_cast %758 : vector<1x1x96xf32> to vector<1x96xf32>
    %760 = arith.truncf %755 : vector<16x32xf32> to vector<16x32xbf16>
    %cst_294 = arith.constant dense<0.000000e+00> : vector<16x96xf32>
    %761 = tpu.matmul %760, %757, %cst_294 {dimension_numbers = #tpu.dot_dimension_numbers<[1], [0], [0], [1], [0, 0, 1, 1], [], []>} : vector<16x32xbf16>, vector<32x96xbf16>, vector<16x96xf32> -> vector<16x96xf32>
    %762 = vector.broadcast %759 : vector<1x96xf32> to vector<16x96xf32>
    %763 = arith.addf %761, %762 : vector<16x96xf32>
    %764 = vector.extract_strided_slice %763 {offsets = [0, 0], sizes = [16, 32], strides = [1, 1]} : vector<16x96xf32> to vector<16x32xf32>
    %765 = vector.extract_strided_slice %763 {offsets = [0, 32], sizes = [16, 32], strides = [1, 1]} : vector<16x96xf32> to vector<16x32xf32>
    %766 = vector.extract_strided_slice %763 {offsets = [0, 64], sizes = [16, 32], strides = [1, 1]} : vector<16x96xf32> to vector<16x32xf32>
    %767 = vector.extract_strided_slice %764 {offsets = [0, 0], sizes = [16, 8], strides = [1, 1]} : vector<16x32xf32> to vector<16x8xf32>
    %768 = vector.shape_cast %767 : vector<16x8xf32> to vector<2x8x8xf32>
    %769 = vector.extract_strided_slice %765 {offsets = [0, 0], sizes = [16, 8], strides = [1, 1]} : vector<16x32xf32> to vector<16x8xf32>
    %770 = vector.shape_cast %769 : vector<16x8xf32> to vector<2x8x8xf32>
    %771 = vector.extract_strided_slice %766 {offsets = [0, 0], sizes = [16, 8], strides = [1, 1]} : vector<16x32xf32> to vector<16x8xf32>
    %772 = vector.shape_cast %771 : vector<16x8xf32> to vector<2x8x8xf32>
    "tpu.trace_start"() <{level = 10 : i32, message = "bqd,bkd->bqk"}> : () -> ()
    %cst_295 = arith.constant dense<0.000000e+00> : vector<2x8x8xf32>
    %773 = tpu.matmul %768, %770, %cst_295 {dimension_numbers = #tpu.dot_dimension_numbers<[2], [2], [1], [1], [0, 0, 0, 1, 1, 1], [0], [0]>} : vector<2x8x8xf32>, vector<2x8x8xf32>, vector<2x8x8xf32> -> vector<2x8x8xf32>
    "tpu.trace_stop"() : () -> ()
    %cst_296 = arith.constant 0.353553385 : f32
    %774 = vector.broadcast %cst_296 : f32 to vector<2x8x8xf32>
    %775 = arith.mulf %773, %774 : vector<2x8x8xf32>
    %776 = vector.broadcast %8 : vector<2x1x8xf32> to vector<2x8x8xf32>
    %777 = arith.addf %775, %776 : vector<2x8x8xf32>
    %cst_297 = arith.constant dense<0xFF800000> : vector<2x8xf32>
    %778 = vector.multi_reduction <maximumf>, %777, %cst_297 [2] : vector<2x8x8xf32> to vector<2x8xf32>
    %779 = vector.shape_cast %778 : vector<2x8xf32> to vector<2x8x1xf32>
    %780 = vector.broadcast %779 : vector<2x8x1xf32> to vector<2x8x8xf32>
    %781 = arith.subf %777, %780 : vector<2x8x8xf32>
    %782 = math.exp %781 : vector<2x8x8xf32>
    %cst_298 = arith.constant dense<0.000000e+00> : vector<2x8xf32>
    %783 = vector.multi_reduction <add>, %782, %cst_298 [2] : vector<2x8x8xf32> to vector<2x8xf32>
    %784 = vector.shape_cast %783 : vector<2x8xf32> to vector<2x8x1xf32>
    %785 = vector.broadcast %784 : vector<2x8x1xf32> to vector<2x8x8xf32>
    %786 = arith.divf %782, %785 : vector<2x8x8xf32>
    "tpu.trace_start"() <{level = 10 : i32, message = "bqk,bkd->bqd"}> : () -> ()
    %cst_299 = arith.constant dense<0.000000e+00> : vector<2x8x8xf32>
    %787 = tpu.matmul %786, %772, %cst_299 {dimension_numbers = #tpu.dot_dimension_numbers<[2], [1], [1], [2], [0, 0, 0, 1, 1, 2], [0], [0]>} : vector<2x8x8xf32>, vector<2x8x8xf32>, vector<2x8x8xf32> -> vector<2x8x8xf32>
    "tpu.trace_stop"() : () -> ()
    %788 = vector.shape_cast %787 : vector<2x8x8xf32> to vector<16x8xf32>
    %789 = vector.extract_strided_slice %764 {offsets = [0, 8], sizes = [16, 8], strides = [1, 1]} : vector<16x32xf32> to vector<16x8xf32>
    %790 = vector.shape_cast %789 : vector<16x8xf32> to vector<2x8x8xf32>
    %791 = vector.extract_strided_slice %765 {offsets = [0, 8], sizes = [16, 8], strides = [1, 1]} : vector<16x32xf32> to vector<16x8xf32>
    %792 = vector.shape_cast %791 : vector<16x8xf32> to vector<2x8x8xf32>
    %793 = vector.extract_strided_slice %766 {offsets = [0, 8], sizes = [16, 8], strides = [1, 1]} : vector<16x32xf32> to vector<16x8xf32>
    %794 = vector.shape_cast %793 : vector<16x8xf32> to vector<2x8x8xf32>
    "tpu.trace_start"() <{level = 10 : i32, message = "bqd,bkd->bqk"}> : () -> ()
    %cst_300 = arith.constant dense<0.000000e+00> : vector<2x8x8xf32>
    %795 = tpu.matmul %790, %792, %cst_300 {dimension_numbers = #tpu.dot_dimension_numbers<[2], [2], [1], [1], [0, 0, 0, 1, 1, 1], [0], [0]>} : vector<2x8x8xf32>, vector<2x8x8xf32>, vector<2x8x8xf32> -> vector<2x8x8xf32>
    "tpu.trace_stop"() : () -> ()
    %cst_301 = arith.constant 0.353553385 : f32
    %796 = vector.broadcast %cst_301 : f32 to vector<2x8x8xf32>
    %797 = arith.mulf %795, %796 : vector<2x8x8xf32>
    %798 = vector.broadcast %8 : vector<2x1x8xf32> to vector<2x8x8xf32>
    %799 = arith.addf %797, %798 : vector<2x8x8xf32>
    %cst_302 = arith.constant dense<0xFF800000> : vector<2x8xf32>
    %800 = vector.multi_reduction <maximumf>, %799, %cst_302 [2] : vector<2x8x8xf32> to vector<2x8xf32>
    %801 = vector.shape_cast %800 : vector<2x8xf32> to vector<2x8x1xf32>
    %802 = vector.broadcast %801 : vector<2x8x1xf32> to vector<2x8x8xf32>
    %803 = arith.subf %799, %802 : vector<2x8x8xf32>
    %804 = math.exp %803 : vector<2x8x8xf32>
    %cst_303 = arith.constant dense<0.000000e+00> : vector<2x8xf32>
    %805 = vector.multi_reduction <add>, %804, %cst_303 [2] : vector<2x8x8xf32> to vector<2x8xf32>
    %806 = vector.shape_cast %805 : vector<2x8xf32> to vector<2x8x1xf32>
    %807 = vector.broadcast %806 : vector<2x8x1xf32> to vector<2x8x8xf32>
    %808 = arith.divf %804, %807 : vector<2x8x8xf32>
    "tpu.trace_start"() <{level = 10 : i32, message = "bqk,bkd->bqd"}> : () -> ()
    %cst_304 = arith.constant dense<0.000000e+00> : vector<2x8x8xf32>
    %809 = tpu.matmul %808, %794, %cst_304 {dimension_numbers = #tpu.dot_dimension_numbers<[2], [1], [1], [2], [0, 0, 0, 1, 1, 2], [0], [0]>} : vector<2x8x8xf32>, vector<2x8x8xf32>, vector<2x8x8xf32> -> vector<2x8x8xf32>
    "tpu.trace_stop"() : () -> ()
    %810 = vector.shape_cast %809 : vector<2x8x8xf32> to vector<16x8xf32>
    %811 = vector.extract_strided_slice %764 {offsets = [0, 16], sizes = [16, 8], strides = [1, 1]} : vector<16x32xf32> to vector<16x8xf32>
    %812 = vector.shape_cast %811 : vector<16x8xf32> to vector<2x8x8xf32>
    %813 = vector.extract_strided_slice %765 {offsets = [0, 16], sizes = [16, 8], strides = [1, 1]} : vector<16x32xf32> to vector<16x8xf32>
    %814 = vector.shape_cast %813 : vector<16x8xf32> to vector<2x8x8xf32>
    %815 = vector.extract_strided_slice %766 {offsets = [0, 16], sizes = [16, 8], strides = [1, 1]} : vector<16x32xf32> to vector<16x8xf32>
    %816 = vector.shape_cast %815 : vector<16x8xf32> to vector<2x8x8xf32>
    "tpu.trace_start"() <{level = 10 : i32, message = "bqd,bkd->bqk"}> : () -> ()
    %cst_305 = arith.constant dense<0.000000e+00> : vector<2x8x8xf32>
    %817 = tpu.matmul %812, %814, %cst_305 {dimension_numbers = #tpu.dot_dimension_numbers<[2], [2], [1], [1], [0, 0, 0, 1, 1, 1], [0], [0]>} : vector<2x8x8xf32>, vector<2x8x8xf32>, vector<2x8x8xf32> -> vector<2x8x8xf32>
    "tpu.trace_stop"() : () -> ()
    %cst_306 = arith.constant 0.353553385 : f32
    %818 = vector.broadcast %cst_306 : f32 to vector<2x8x8xf32>
    %819 = arith.mulf %817, %818 : vector<2x8x8xf32>
    %820 = vector.broadcast %8 : vector<2x1x8xf32> to vector<2x8x8xf32>
    %821 = arith.addf %819, %820 : vector<2x8x8xf32>
    %cst_307 = arith.constant dense<0xFF800000> : vector<2x8xf32>
    %822 = vector.multi_reduction <maximumf>, %821, %cst_307 [2] : vector<2x8x8xf32> to vector<2x8xf32>
    %823 = vector.shape_cast %822 : vector<2x8xf32> to vector<2x8x1xf32>
    %824 = vector.broadcast %823 : vector<2x8x1xf32> to vector<2x8x8xf32>
    %825 = arith.subf %821, %824 : vector<2x8x8xf32>
    %826 = math.exp %825 : vector<2x8x8xf32>
    %cst_308 = arith.constant dense<0.000000e+00> : vector<2x8xf32>
    %827 = vector.multi_reduction <add>, %826, %cst_308 [2] : vector<2x8x8xf32> to vector<2x8xf32>
    %828 = vector.shape_cast %827 : vector<2x8xf32> to vector<2x8x1xf32>
    %829 = vector.broadcast %828 : vector<2x8x1xf32> to vector<2x8x8xf32>
    %830 = arith.divf %826, %829 : vector<2x8x8xf32>
    "tpu.trace_start"() <{level = 10 : i32, message = "bqk,bkd->bqd"}> : () -> ()
    %cst_309 = arith.constant dense<0.000000e+00> : vector<2x8x8xf32>
    %831 = tpu.matmul %830, %816, %cst_309 {dimension_numbers = #tpu.dot_dimension_numbers<[2], [1], [1], [2], [0, 0, 0, 1, 1, 2], [0], [0]>} : vector<2x8x8xf32>, vector<2x8x8xf32>, vector<2x8x8xf32> -> vector<2x8x8xf32>
    "tpu.trace_stop"() : () -> ()
    %832 = vector.shape_cast %831 : vector<2x8x8xf32> to vector<16x8xf32>
    %833 = vector.extract_strided_slice %764 {offsets = [0, 24], sizes = [16, 8], strides = [1, 1]} : vector<16x32xf32> to vector<16x8xf32>
    %834 = vector.shape_cast %833 : vector<16x8xf32> to vector<2x8x8xf32>
    %835 = vector.extract_strided_slice %765 {offsets = [0, 24], sizes = [16, 8], strides = [1, 1]} : vector<16x32xf32> to vector<16x8xf32>
    %836 = vector.shape_cast %835 : vector<16x8xf32> to vector<2x8x8xf32>
    %837 = vector.extract_strided_slice %766 {offsets = [0, 24], sizes = [16, 8], strides = [1, 1]} : vector<16x32xf32> to vector<16x8xf32>
    %838 = vector.shape_cast %837 : vector<16x8xf32> to vector<2x8x8xf32>
    "tpu.trace_start"() <{level = 10 : i32, message = "bqd,bkd->bqk"}> : () -> ()
    %cst_310 = arith.constant dense<0.000000e+00> : vector<2x8x8xf32>
    %839 = tpu.matmul %834, %836, %cst_310 {dimension_numbers = #tpu.dot_dimension_numbers<[2], [2], [1], [1], [0, 0, 0, 1, 1, 1], [0], [0]>} : vector<2x8x8xf32>, vector<2x8x8xf32>, vector<2x8x8xf32> -> vector<2x8x8xf32>
    "tpu.trace_stop"() : () -> ()
    %cst_311 = arith.constant 0.353553385 : f32
    %840 = vector.broadcast %cst_311 : f32 to vector<2x8x8xf32>
    %841 = arith.mulf %839, %840 : vector<2x8x8xf32>
    %842 = vector.broadcast %8 : vector<2x1x8xf32> to vector<2x8x8xf32>
    %843 = arith.addf %841, %842 : vector<2x8x8xf32>
    %cst_312 = arith.constant dense<0xFF800000> : vector<2x8xf32>
    %844 = vector.multi_reduction <maximumf>, %843, %cst_312 [2] : vector<2x8x8xf32> to vector<2x8xf32>
    %845 = vector.shape_cast %844 : vector<2x8xf32> to vector<2x8x1xf32>
    %846 = vector.broadcast %845 : vector<2x8x1xf32> to vector<2x8x8xf32>
    %847 = arith.subf %843, %846 : vector<2x8x8xf32>
    %848 = math.exp %847 : vector<2x8x8xf32>
    %cst_313 = arith.constant dense<0.000000e+00> : vector<2x8xf32>
    %849 = vector.multi_reduction <add>, %848, %cst_313 [2] : vector<2x8x8xf32> to vector<2x8xf32>
    %850 = vector.shape_cast %849 : vector<2x8xf32> to vector<2x8x1xf32>
    %851 = vector.broadcast %850 : vector<2x8x1xf32> to vector<2x8x8xf32>
    %852 = arith.divf %848, %851 : vector<2x8x8xf32>
    "tpu.trace_start"() <{level = 10 : i32, message = "bqk,bkd->bqd"}> : () -> ()
    %cst_314 = arith.constant dense<0.000000e+00> : vector<2x8x8xf32>
    %853 = tpu.matmul %852, %838, %cst_314 {dimension_numbers = #tpu.dot_dimension_numbers<[2], [1], [1], [2], [0, 0, 0, 1, 1, 2], [0], [0]>} : vector<2x8x8xf32>, vector<2x8x8xf32>, vector<2x8x8xf32> -> vector<2x8x8xf32>
    "tpu.trace_stop"() : () -> ()
    %854 = vector.shape_cast %853 : vector<2x8x8xf32> to vector<16x8xf32>
    %855 = tpu.concatenate %788, %810, %832, %854 in 1 : vector<16x8xf32>, vector<16x8xf32>, vector<16x8xf32>, vector<16x8xf32> -> vector<16x32xf32>
    %856 = arith.truncf %855 : vector<16x32xf32> to vector<16x32xbf16>
    %c3_315 = arith.constant 3 : index
    %c0_316 = arith.constant 0 : index
    %c0_317 = arith.constant 0 : index
    %857 = vector.load %arg10[%c3_315, %c0_316, %c0_317] : memref<5x32x32xbf16, #tpu.memory_space<vmem>>, vector<1x32x32xbf16>
    %858 = vector.shape_cast %857 : vector<1x32x32xbf16> to vector<32x32xbf16>
    %cst_318 = arith.constant dense<0.000000e+00> : vector<16x32xf32>
    %859 = tpu.matmul %856, %858, %cst_318 {dimension_numbers = #tpu.dot_dimension_numbers<[1], [0], [0], [1], [0, 0, 1, 1], [], []>} : vector<16x32xbf16>, vector<32x32xbf16>, vector<16x32xf32> -> vector<16x32xf32>
    %c3_319 = arith.constant 3 : index
    %c0_320 = arith.constant 0 : index
    %c0_321 = arith.constant 0 : index
    %860 = vector.load %arg11[%c3_319, %c0_320, %c0_321] : memref<5x1x32xf32, #tpu.memory_space<vmem>>, vector<1x1x32xf32>
    %861 = vector.shape_cast %860 : vector<1x1x32xf32> to vector<1x32xf32>
    %862 = vector.broadcast %861 : vector<1x32xf32> to vector<16x32xf32>
    %863 = arith.addf %859, %862 : vector<16x32xf32>
    %864 = arith.addf %863, %731 : vector<16x32xf32>
    %c3_322 = arith.constant 3 : index
    %c0_323 = arith.constant 0 : index
    %c0_324 = arith.constant 0 : index
    %865 = vector.load %arg12[%c3_322, %c0_323, %c0_324] : memref<4x1x32xf32, #tpu.memory_space<vmem>>, vector<1x1x32xf32>
    %866 = vector.shape_cast %865 : vector<1x1x32xf32> to vector<1x32xf32>
    %c3_325 = arith.constant 3 : index
    %c0_326 = arith.constant 0 : index
    %c0_327 = arith.constant 0 : index
    %867 = vector.load %arg13[%c3_325, %c0_326, %c0_327] : memref<4x1x32xf32, #tpu.memory_space<vmem>>, vector<1x1x32xf32>
    %868 = vector.shape_cast %867 : vector<1x1x32xf32> to vector<1x32xf32>
    %cst_328 = arith.constant dense<0.000000e+00> : vector<16xf32>
    %869 = vector.multi_reduction <add>, %864, %cst_328 [1] : vector<16x32xf32> to vector<16xf32>
    %870 = vector.shape_cast %869 : vector<16xf32> to vector<16x1xf32>
    %cst_329 = arith.constant 3.200000e+01 : f32
    %871 = vector.broadcast %cst_329 : f32 to vector<16x1xf32>
    %872 = arith.divf %870, %871 : vector<16x1xf32>
    %873 = vector.broadcast %872 : vector<16x1xf32> to vector<16x32xf32>
    %874 = arith.subf %864, %873 : vector<16x32xf32>
    %875 = arith.mulf %874, %874 : vector<16x32xf32>
    %cst_330 = arith.constant dense<0.000000e+00> : vector<16xf32>
    %876 = vector.multi_reduction <add>, %875, %cst_330 [1] : vector<16x32xf32> to vector<16xf32>
    %877 = vector.shape_cast %876 : vector<16xf32> to vector<16x1xf32>
    %cst_331 = arith.constant 3.200000e+01 : f32
    %878 = vector.broadcast %cst_331 : f32 to vector<16x1xf32>
    %879 = arith.divf %877, %878 : vector<16x1xf32>
    %cst_332 = arith.constant 9.99999997E-7 : f32
    %880 = vector.broadcast %cst_332 : f32 to vector<16x1xf32>
    %881 = arith.addf %879, %880 : vector<16x1xf32>
    %882 = math.rsqrt %881 : vector<16x1xf32>
    %883 = vector.broadcast %882 : vector<16x1xf32> to vector<16x32xf32>
    %884 = arith.mulf %874, %883 : vector<16x32xf32>
    %885 = vector.broadcast %866 : vector<1x32xf32> to vector<16x32xf32>
    %886 = arith.mulf %884, %885 : vector<16x32xf32>
    %887 = vector.broadcast %868 : vector<1x32xf32> to vector<16x32xf32>
    %888 = arith.addf %886, %887 : vector<16x32xf32>
    %889 = arith.truncf %888 : vector<16x32xf32> to vector<16x32xbf16>
    %c3_333 = arith.constant 3 : index
    %c0_334 = arith.constant 0 : index
    %c0_335 = arith.constant 0 : index
    %890 = vector.load %arg14[%c3_333, %c0_334, %c0_335] : memref<4x32x64xbf16, #tpu.memory_space<vmem>>, vector<1x32x64xbf16>
    %891 = vector.shape_cast %890 : vector<1x32x64xbf16> to vector<32x64xbf16>
    %cst_336 = arith.constant dense<0.000000e+00> : vector<16x64xf32>
    %892 = tpu.matmul %889, %891, %cst_336 {dimension_numbers = #tpu.dot_dimension_numbers<[1], [0], [0], [1], [0, 0, 1, 1], [], []>} : vector<16x32xbf16>, vector<32x64xbf16>, vector<16x64xf32> -> vector<16x64xf32>
    %c3_337 = arith.constant 3 : index
    %c0_338 = arith.constant 0 : index
    %c0_339 = arith.constant 0 : index
    %893 = vector.load %arg15[%c3_337, %c0_338, %c0_339] : memref<4x1x64xf32, #tpu.memory_space<vmem>>, vector<1x1x64xf32>
    %894 = vector.shape_cast %893 : vector<1x1x64xf32> to vector<1x64xf32>
    %895 = vector.broadcast %894 : vector<1x64xf32> to vector<16x64xf32>
    %896 = arith.addf %892, %895 : vector<16x64xf32>
    %cst_340 = arith.constant 0.000000e+00 : f32
    %897 = vector.broadcast %cst_340 : f32 to vector<16x64xf32>
    %898 = arith.maximumf %896, %897 : vector<16x64xf32>
    %899 = arith.truncf %898 : vector<16x64xf32> to vector<16x64xbf16>
    %c3_341 = arith.constant 3 : index
    %c0_342 = arith.constant 0 : index
    %c0_343 = arith.constant 0 : index
    %900 = vector.load %arg16[%c3_341, %c0_342, %c0_343] : memref<4x64x32xbf16, #tpu.memory_space<vmem>>, vector<1x64x32xbf16>
    %901 = vector.shape_cast %900 : vector<1x64x32xbf16> to vector<64x32xbf16>
    %cst_344 = arith.constant dense<0.000000e+00> : vector<16x32xf32>
    %902 = tpu.matmul %899, %901, %cst_344 {dimension_numbers = #tpu.dot_dimension_numbers<[1], [0], [0], [1], [0, 0, 1, 1], [], []>} : vector<16x64xbf16>, vector<64x32xbf16>, vector<16x32xf32> -> vector<16x32xf32>
    %c3_345 = arith.constant 3 : index
    %c0_346 = arith.constant 0 : index
    %c0_347 = arith.constant 0 : index
    %903 = vector.load %arg17[%c3_345, %c0_346, %c0_347] : memref<4x1x32xf32, #tpu.memory_space<vmem>>, vector<1x1x32xf32>
    %904 = vector.shape_cast %903 : vector<1x1x32xf32> to vector<1x32xf32>
    %905 = vector.broadcast %904 : vector<1x32xf32> to vector<16x32xf32>
    %906 = arith.addf %902, %905 : vector<16x32xf32>
    %907 = arith.addf %906, %864 : vector<16x32xf32>
    %cst_348 = arith.constant 0.000000e+00 : f32
    %908 = vector.broadcast %cst_348 : f32 to vector<16x32xf32>
    %909 = arith.maximumf %907, %908 : vector<16x32xf32>
    %cst_349 = arith.constant dense<0.000000e+00> : vector<16xf32>
    %910 = vector.multi_reduction <add>, %909, %cst_349 [1] : vector<16x32xf32> to vector<16xf32>
    %911 = vector.shape_cast %910 : vector<16xf32> to vector<16x1xf32>
    %cst_350 = arith.constant 3.200000e+01 : f32
    %912 = vector.broadcast %cst_350 : f32 to vector<16x1xf32>
    %913 = arith.divf %911, %912 : vector<16x1xf32>
    %914 = vector.broadcast %913 : vector<16x1xf32> to vector<16x32xf32>
    %915 = arith.subf %909, %914 : vector<16x32xf32>
    %916 = arith.mulf %915, %915 : vector<16x32xf32>
    %cst_351 = arith.constant dense<0.000000e+00> : vector<16xf32>
    %917 = vector.multi_reduction <add>, %916, %cst_351 [1] : vector<16x32xf32> to vector<16xf32>
    %918 = vector.shape_cast %917 : vector<16xf32> to vector<16x1xf32>
    %cst_352 = arith.constant 3.200000e+01 : f32
    %919 = vector.broadcast %cst_352 : f32 to vector<16x1xf32>
    %920 = arith.divf %918, %919 : vector<16x1xf32>
    %cst_353 = arith.constant 9.99999997E-7 : f32
    %921 = vector.broadcast %cst_353 : f32 to vector<16x1xf32>
    %922 = arith.addf %920, %921 : vector<16x1xf32>
    %923 = math.rsqrt %922 : vector<16x1xf32>
    %924 = vector.broadcast %923 : vector<16x1xf32> to vector<16x32xf32>
    %925 = arith.mulf %915, %924 : vector<16x32xf32>
    %926 = vector.shape_cast %925 : vector<16x32xf32> to vector<2x8x32xf32>
    %c0_354 = arith.constant 0 : index
    %c0_355 = arith.constant 0 : index
    %c0_356 = arith.constant 0 : index
    %927 = vector.load %arg18[%c0_354, %c0_355, %c0_356] : memref<2x8x32xf32, #tpu.memory_space<vmem>>, vector<2x8x32xf32>
    tpu.vector_store %arg18[%c0_354, %c0_355, %c0_356], %926 {strides = array<i32>} : memref<2x8x32xf32, #tpu.memory_space<vmem>>, vector<2x8x32xf32>,
    return
  }
}

</mosaic_0001>

<bundles_post_ra>
// kernel: labelwise_cross_transformer_encoder.1
= control target key start
LH: loop header
LB: loop body
LE: loop exit
PB: predicated region body
PF: predicated region fallthrough
CT: control target
= control target key end

     0   :  { %s12274_s0 = inlined_call_operand.vmem [shape: f32[2,8,32], index: 0, kind: input, shape index: {}]   ;;  %s12275_s1 = inlined_call_operand.hbm [shape: f32[2,1,8], index: 1, kind: input, shape index: {}]   ;;  %s12276_s2 = inlined_call_operand.vmem [shape: f32[2,8,32], index: 2, kind: input, shape index: {}]   ;;  %s12277_s3 = inlined_call_operand.vmem [shape: f32[2,1,8], index: 3, kind: input, shape index: {}]   ;;  %s12278_s4 = inlined_call_operand.vmem [shape: s32[2,1], index: 4, kind: input, shape index: {}]   ;;  %s12279_s5 = inlined_call_operand.hbm [shape: f32[4,32], index: 5, kind: input, shape index: {}]   ;;  %s12280_s6 = inlined_call_operand.hbm [shape: f32[5,1,32], index: 6, kind: input, shape index: {}]   ;;  %s12281_s7 = inlined_call_operand.hbm [shape: f32[5,1,32], index: 7, kind: input, shape index: {}]   ;;  %s12282_s8 = inlined_call_operand.vmem [shape: bf16[5,32,96], index: 8, kind: input, shape index: {}]   ;;  %s12283_s9 = inlined_call_operand.hbm [shape: f32[5,1,96], index: 9, kind: input, shape index: {}]   ;;  %s12284_s10 = inlined_call_operand.vmem [shape: bf16[5,32,32], index: 10, kind: input, shape index: {}]   ;;  %s12285_s11 = inlined_call_operand.hbm [shape: f32[5,1,32], index: 11, kind: input, shape index: {}]   ;;  %s12286_s12 = inlined_call_operand.hbm [shape: f32[4,1,32], index: 12, kind: input, shape index: {}]   ;;  %s12287_s13 = inlined_call_operand.hbm [shape: f32[4,1,32], index: 13, kind: input, shape index: {}]   ;;  %s12288_s14 = inlined_call_operand.vmem [shape: bf16[4,32,64], index: 14, kind: input, shape index: {}]   ;;  %s12289_s15 = inlined_call_operand.hbm [shape: f32[4,1,64], index: 15, kind: input, shape index: {}]   ;;  %s12290_s16 = inlined_call_operand.vmem [shape: bf16[4,64,32], index: 16, kind: input, shape index: {}]   ;;  %s12291_s17 = inlined_call_operand.hbm [shape: f32[4,1,32], index: 17, kind: input, shape index: {}]   ;;  %s12292_s18 = inlined_call_operand.hbm [shape: f32[2,8,32], index: 18, kind: output, shape index: {}]  }
   0x1   :  { %12296 = sst [smem:[#allocation27_spill]] %s12274_s0 }
   0x2   :  { %12297 = sst [smem:[#allocation28_spill]] %s12275_s1 }
   0x3   :  { %12298 = sst [smem:[#allocation29_spill]] %s12276_s2 }
   0x4   :  { %23 = vsyncpa [#allocation3], 0 }
   0x5   :  { %24 = vsyncpa [#allocation6], 0 }
   0x6   :  { %25 = vsyncpa [#allocation9], 0 }
   0x7   :  { %26 = vsyncpa [#allocation12], 0 }
   0x8   :  { %27 = vsyncpa [#allocation15], 0 }
   0x9   :  { %28 = vsyncpa [#allocation18], 0 }
   0xa   :  { %29 = vsyncpa [#allocation4], 0  ;;  %s10717_s27 = smov [#allocation5]   ;;  %s10461_s0 = scalar_lea.hbm %s12279_s5, 64 }
   0xb   :  { %s56_s28 = sshll.u32 %s10717_s27, 4  ;;  %p10462_p0 = scmp.ne.s32.totalorder %s12279_s5, %s10461_s0  ;;  %s57_s28 = int_to_ptr.vmem [resolvable:$true] %s56_s28 }
   0xc   :  { %p10465_p1 = scmp.lt.u32.totalorder %s10461_s0, %s12279_s5 }
   0xe   :  { %p10467_p2 = pnand %p10465_p1, %p10462_p0 }
  0x10   :  { %10470 = shalt.err (!%p10467_p2)
}
  0x11   :  { %s10471_s22 = scalar_lea.vmem %s57_s28, 64  ;;  %p10476_p4 = scmp.lt.s32.totalorder %s57_s28, %s57_s28 }
  0x12   :  { %p10472_p3 = scmp.ne.s32.totalorder %s57_s28, %s10471_s22  ;;  %p10477_p5 = scmp.lt.s32.totalorder %s10471_s22, %s10471_s22 }
  0x14   :  { %p10478_p6 = por %p10477_p5, %p10476_p4 }
  0x16   :  { %p10479_p7 = pnand %p10478_p6, %p10472_p3 }
  0x18   :  { %10482 = shalt.err (!%p10479_p7)
}
  0x19   :  { %59 = dma.hbm_to_vmem [thread:$0]  %s12279_s5, 64, %s57_s28, [#allocation6]  }
  0x1a   :  { %s10718_s24 = smov [#allocation8]   ;;  %s10719_s26 = smov [#allocation11]  }
  0x1b   :  { %s77_s25 = sshll.u32 %s10718_s24, 4  ;;  %s105_s27 = sshll.u32 %s10719_s26, 4  ;;  %s78_s25 = int_to_ptr.vmem [resolvable:$true] %s77_s25  ;;  %s106_s27 = int_to_ptr.vmem [resolvable:$true] %s105_s27 }
  0x1c   :  { %s10483_s0 = scalar_lea.hbm %s12281_s7, 80 }
  0x1d   :  { %p10484_p8 = scmp.ne.s32.totalorder %s12281_s7, %s10483_s0  ;;  %p10487_p9 = scmp.lt.u32.totalorder %s10483_s0, %s12281_s7 }
  0x1f   :  { %p10489_p10 = pnand %p10487_p9, %p10484_p8 }
  0x21   :  { %10492 = shalt.err (!%p10489_p10)
}
  0x22   :  { %s10493_s5 = scalar_lea.vmem %s78_s25, 80  ;;  %s10497_s28 = scalar_lea.vmem %s78_s25, 96 }
  0x23   :  { %p10494_p11 = scmp.ne.s32.totalorder %s78_s25, %s10493_s5  ;;  %p10498_p12 = scmp.lt.s32.totalorder %s78_s25, %s78_s25 }
  0x24   :  { %p10499_p13 = scmp.lt.s32.totalorder %s10497_s28, %s10493_s5 }
  0x26   :  { %p10500_p0 = por %p10499_p13, %p10498_p12 }
  0x28   :  { %p10501_p1 = pnand %p10500_p0, %p10494_p11 }
  0x2a   :  { %10504 = shalt.err (!%p10501_p1)
}
  0x2b   :  { %s10720_s22 = smov 16   ;;  %s10721_s2 = smov 1  }
  0x2c   :  { %83 = dma.hbm_to_vmem [thread:$0]  %s12281_s7, 80, %s78_s25, [#allocation9], %s10720_s22, %s10720_s22, %s10721_s2  }
  0x2d   :  { %s10505_s30 = scalar_lea.hbm %s12285_s11, 80 }
  0x2e   :  { %p10506_p2 = scmp.ne.s32.totalorder %s12285_s11, %s10505_s30  ;;  %p10509_p3 = scmp.lt.u32.totalorder %s10505_s30, %s12285_s11 }
  0x30   :  { %p10511_p4 = pnand %p10509_p3, %p10506_p2 }
  0x32   :  { %10514 = shalt.err (!%p10511_p4)
}
  0x33   :  { %s10515_s21 = scalar_lea.vmem %s106_s27, 80  ;;  %s10519_s5 = scalar_lea.vmem %s106_s27, 96 }
  0x34   :  { %p10516_p5 = scmp.ne.s32.totalorder %s106_s27, %s10515_s21  ;;  %p10520_p6 = scmp.lt.s32.totalorder %s106_s27, %s106_s27 }
  0x35   :  { %p10521_p7 = scmp.lt.s32.totalorder %s10519_s5, %s10515_s21 }
  0x37   :  { %p10522_p8 = por %p10521_p7, %p10520_p6 }
  0x39   :  { %p10523_p9 = pnand %p10522_p8, %p10516_p5 }
  0x3b   :  { %10526 = shalt.err (!%p10523_p9)
}
  0x3c   :  { %111 = dma.hbm_to_vmem [thread:$0]  %s12285_s11, 80, %s106_s27, [#allocation12], %s10720_s22, %s10720_s22, %s10721_s2  }
  0x3d   :  { %s10722_s28 = smov [#allocation14]   ;;  %s10723_s24 = smov [#allocation2]  }
  0x3e   :  { %s129_s23 = sshll.u32 %s10722_s28, 4  ;;  %s37_s26 = sshll.u32 %s10723_s24, 4  ;;  %s130_s23 = int_to_ptr.vmem [resolvable:$true] %s129_s23  ;;  %s38_s26 = int_to_ptr.vmem [resolvable:$true] %s37_s26 }
  0x3f   :  { %s10527_s0 = scalar_lea.hbm %s12287_s13, 64 }
  0x40   :  { %p10528_p10 = scmp.ne.s32.totalorder %s12287_s13, %s10527_s0  ;;  %p10531_p11 = scmp.lt.u32.totalorder %s10527_s0, %s12287_s13 }
  0x42   :  { %p10533_p12 = pnand %p10531_p11, %p10528_p10 }
  0x44   :  { %10536 = shalt.err (!%p10533_p12)
}
  0x45   :  { %s10537_s11 = scalar_lea.vmem %s130_s23, 64  ;;  %p10542_p0 = scmp.lt.s32.totalorder %s130_s23, %s130_s23 }
  0x46   :  { %p10538_p13 = scmp.ne.s32.totalorder %s130_s23, %s10537_s11  ;;  %p10543_p1 = scmp.lt.s32.totalorder %s10537_s11, %s10537_s11 }
  0x48   :  { %p10544_p2 = por %p10543_p1, %p10542_p0 }
  0x4a   :  { %p10545_p3 = pnand %p10544_p2, %p10538_p13 }
  0x4c   :  { %10548 = shalt.err (!%p10545_p3)
}
  0x4d   :  { %135 = dma.hbm_to_vmem [thread:$0]  %s12287_s13, 64, %s130_s23, [#allocation15], %s10720_s22, %s10720_s22, %s10721_s2  }
  0x4e   :  { %s12299_s28 = sld [smem:[#allocation28_spill]] }
  0x54   :  { %s10549_s24 = scalar_lea.hbm %s12299_s28, 32 }
  0x55   :  { %p10550_p4 = scmp.ne.s32.totalorder %s12299_s28, %s10549_s24  ;;  %p10553_p5 = scmp.lt.u32.totalorder %s10549_s24, %s12299_s28 }
  0x57   :  { %p10555_p6 = pnand %p10553_p5, %p10550_p4 }
  0x59   :  { %10558 = shalt.err (!%p10555_p6)
}
  0x5a   :  { %s10559_s1 = scalar_lea.vmem %s38_s26, 32  ;;  %p10564_p8 = scmp.lt.s32.totalorder %s38_s26, %s38_s26 }
  0x5b   :  { %p10560_p7 = scmp.ne.s32.totalorder %s38_s26, %s10559_s1  ;;  %p10565_p9 = scmp.lt.s32.totalorder %s10559_s1, %s10559_s1 }
  0x5d   :  { %p10566_p10 = por %p10565_p9, %p10564_p8 }
  0x5f   :  { %p10567_p11 = pnand %p10566_p10, %p10560_p7 }
  0x61   :  { %10570 = shalt.err (!%p10567_p11)
}
  0x62   :  { %43 = dma.hbm_to_vmem [thread:$0]  %s12299_s28, 32, %s38_s26, [#allocation3], %s10720_s22, %s10720_s22, %s10721_s2  }
  0x63   :  { %s10724_s20 = smov [#allocation7]   ;;  %s10725_s11 = smov [#allocation10]  }
  0x64   :  { %s65_s21 = sshll.u32 %s10724_s20, 4  ;;  %s91_s27 = sshll.u32 %s10725_s11, 4  ;;  %s66_s21 = int_to_ptr.vmem [resolvable:$true] %s65_s21  ;;  %s92_s27 = int_to_ptr.vmem [resolvable:$true] %s91_s27 }
  0x65   :  { %s10571_s25 = scalar_lea.hbm %s12280_s6, 80 }
  0x66   :  { %p10572_p12 = scmp.ne.s32.totalorder %s12280_s6, %s10571_s25  ;;  %p10575_p13 = scmp.lt.u32.totalorder %s10571_s25, %s12280_s6 }
  0x68   :  { %p10577_p0 = pnand %p10575_p13, %p10572_p12 }
  0x6a   :  { %10580 = shalt.err (!%p10577_p0)
}
  0x6b   :  { %s10581_s26 = scalar_lea.vmem %s66_s21, 80  ;;  %s10585_s28 = scalar_lea.vmem %s66_s21, 96 }
  0x6c   :  { %p10582_p1 = scmp.ne.s32.totalorder %s66_s21, %s10581_s26  ;;  %p10586_p2 = scmp.lt.s32.totalorder %s66_s21, %s66_s21 }
  0x6d   :  { %p10587_p3 = scmp.lt.s32.totalorder %s10585_s28, %s10581_s26 }
  0x6f   :  { %p10588_p4 = por %p10587_p3, %p10586_p2 }
  0x71   :  { %p10589_p5 = pnand %p10588_p4, %p10582_p1 }
  0x73   :  { %10592 = shalt.err (!%p10589_p5)
}
  0x74   :  { %71 = dma.hbm_to_vmem [thread:$0]  %s12280_s6, 80, %s66_s21, [#allocation6], %s10720_s22, %s10720_s22, %s10721_s2  }
  0x75   :  { %s10593_s20 = scalar_lea.hbm %s12283_s9, 80 }
  0x76   :  { %p10594_p6 = scmp.ne.s32.totalorder %s12283_s9, %s10593_s20  ;;  %p10597_p7 = scmp.lt.u32.totalorder %s10593_s20, %s12283_s9 }
  0x78   :  { %p10599_p8 = pnand %p10597_p7, %p10594_p6 }
  0x7a   :  { %10602 = shalt.err (!%p10599_p8)
}
  0x7b   :  { %s10603_s24 = scalar_lea.vmem %s92_s27, 80  ;;  %s10607_s29 = scalar_lea.vmem %s92_s27, 96 }
  0x7c   :  { %p10604_p9 = scmp.ne.s32.totalorder %s92_s27, %s10603_s24  ;;  %p10608_p10 = scmp.lt.s32.totalorder %s92_s27, %s92_s27 }
  0x7d   :  { %p10609_p11 = scmp.lt.s32.totalorder %s10607_s29, %s10603_s24 }
  0x7f   :  { %p10610_p12 = por %p10609_p11, %p10608_p10 }
  0x81   :  { %p10611_p13 = pnand %p10610_p12, %p10604_p9 }
  0x83   :  { %10614 = shalt.err (!%p10611_p13)
}
  0x84   :  { %97 = dma.hbm_to_vmem [thread:$0]  %s12283_s9, 80, %s92_s27, [#allocation9], %s10720_s22, %s10720_s22, %s10721_s2  }
  0x85   :  { %s10726_s30 = smov [#allocation13]   ;;  %s10727_s26 = smov [#allocation16]  }
  0x86   :  { %s117_s0 = sshll.u32 %s10726_s30, 4  ;;  %s143_s28 = sshll.u32 %s10727_s26, 4  ;;  %s118_s0 = int_to_ptr.vmem [resolvable:$true] %s117_s0  ;;  %s144_s28 = int_to_ptr.vmem [resolvable:$true] %s143_s28 }
  0x87   :  { %s10615_s13 = scalar_lea.hbm %s12286_s12, 64 }
  0x88   :  { %p10616_p0 = scmp.ne.s32.totalorder %s12286_s12, %s10615_s13  ;;  %p10619_p1 = scmp.lt.u32.totalorder %s10615_s13, %s12286_s12 }
  0x8a   :  { %p10621_p2 = pnand %p10619_p1, %p10616_p0 }
  0x8c   :  { %10624 = shalt.err (!%p10621_p2)
}
  0x8d   :  { %s10625_s9 = scalar_lea.vmem %s118_s0, 64  ;;  %p10630_p4 = scmp.lt.s32.totalorder %s118_s0, %s118_s0 }
  0x8e   :  { %p10626_p3 = scmp.ne.s32.totalorder %s118_s0, %s10625_s9  ;;  %p10631_p5 = scmp.lt.s32.totalorder %s10625_s9, %s10625_s9 }
  0x90   :  { %p10632_p6 = por %p10631_p5, %p10630_p4 }
  0x92   :  { %p10633_p7 = pnand %p10632_p6, %p10626_p3 }
  0x94   :  { %10636 = shalt.err (!%p10633_p7)
}
  0x95   :  { %123 = dma.hbm_to_vmem [thread:$0]  %s12286_s12, 64, %s118_s0, [#allocation12], %s10720_s22, %s10720_s22, %s10721_s2  }
  0x96   :  { %s10637_s29 = scalar_lea.hbm %s12289_s15, 64 }
  0x97   :  { %p10638_p8 = scmp.ne.s32.totalorder %s12289_s15, %s10637_s29  ;;  %p10641_p9 = scmp.lt.u32.totalorder %s10637_s29, %s12289_s15 }
  0x99   :  { %p10643_p10 = pnand %p10641_p9, %p10638_p8 }
  0x9b   :  { %10646 = shalt.err (!%p10643_p10)
}
  0x9c   :  { %s10647_s19 = scalar_lea.vmem %s144_s28, 64  ;;  %p10652_p12 = scmp.lt.s32.totalorder %s144_s28, %s144_s28 }
  0x9d   :  { %p10648_p11 = scmp.ne.s32.totalorder %s144_s28, %s10647_s19  ;;  %p10653_p13 = scmp.lt.s32.totalorder %s10647_s19, %s10647_s19 }
  0x9f   :  { %p10654_p0 = por %p10653_p13, %p10652_p12 }
  0xa1   :  { %p10655_p1 = pnand %p10654_p0, %p10648_p11 }
  0xa3   :  { %10658 = shalt.err (!%p10655_p1)
}
  0xa4   :  { %149 = dma.hbm_to_vmem [thread:$0]  %s12289_s15, 64, %s144_s28, [#allocation15], %s10720_s22, %s10720_s22, %s10721_s2  }
  0xa5   :  { %s10728_s1 = smov [#allocation17]   ;;  %s10659_s11 = scalar_lea.hbm %s12291_s17, 64 }
  0xa6   :  { %s157_s13 = sshll.u32 %s10728_s1, 4  ;;  %p10660_p2 = scmp.ne.s32.totalorder %s12291_s17, %s10659_s11  ;;  %s158_s13 = int_to_ptr.vmem [resolvable:$true] %s157_s13 }
  0xa7   :  { %p10663_p3 = scmp.lt.u32.totalorder %s10659_s11, %s12291_s17 }
  0xa9   :  { %p10665_p4 = pnand %p10663_p3, %p10660_p2 }
  0xab   :  { %10668 = shalt.err (!%p10665_p4)
}
  0xac   :  { %s10669_s25 = scalar_lea.vmem %s158_s13, 64  ;;  %p10674_p6 = scmp.lt.s32.totalorder %s158_s13, %s158_s13 }
  0xad   :  { %p10670_p5 = scmp.ne.s32.totalorder %s158_s13, %s10669_s25  ;;  %p10675_p7 = scmp.lt.s32.totalorder %s10669_s25, %s10669_s25 }
  0xaf   :  { %p10676_p8 = por %p10675_p7, %p10674_p6 }
  0xb1   :  { %p10677_p9 = pnand %p10676_p8, %p10670_p5 }
  0xb3   :  { %10680 = shalt.err (!%p10677_p9)
}
  0xb4   :  { %163 = dma.hbm_to_vmem [thread:$0]  %s12291_s17, 64, %s158_s13, [#allocation18], %s10720_s22, %s10720_s22, %s10721_s2  }
  0xb5   :  { %10703 = dma.done.wait [#allocation3], 32  }
  0xb6   :  { %10704 = vsyncadd [#allocation3], 4294967264 }
  0xb7   :  { %10705 = dma.done.wait [#allocation6], 144  }
  0xb8   :  { %10706 = vsyncadd [#allocation6], 4294967152 }
  0xb9   :  { %10707 = dma.done.wait [#allocation9], 160  }
  0xba   :  { %10708 = vsyncadd [#allocation9], 4294967136 }
  0xbb   :  { %10709 = dma.done.wait [#allocation12], 144  }
  0xbc   :  { %10710 = vsyncadd [#allocation12], 4294967152 }
  0xbd   :  { %10711 = dma.done.wait [#allocation15], 128  }
  0xbe   :  { %10712 = vsyncadd [#allocation15], 4294967168 }
  0xbf   :  { %10713 = dma.done.wait [#allocation18], 64  }
  0xc0   :  { %10714 = vsyncadd [#allocation18], 4294967232  ;;  %vm213_vm0 = vcmask 261120   ;;  %s12300_s6 = sld [smem:[#allocation27_spill]]  ;;  %v10217_v14 = vld [vmem:[%s12282_s8] sm:$0xff]   ;;  %v10729_v15 = vmov 0.0   ;;  %v484_v43 = vlaneseq }
  0xc1   :  { %9536 = vmatprep.subr.bf16.mxu0 %v10729_v15  ;;  %vm10730_vm1 = vmmov 0   ;;  %v10218_v16 = vld [vmem:[%s12282_s8 + $0x8] sm:$0xff]   ;;  %9549 = vmatprep.subr.mxu1 %v10729_v15  ;;  %v9020_v25 = vld [vmem:[#allocation7] ss:$0 sm:$0xff]  ;;  %v9022_v34 = vld [vmem:[#allocation10] ss:$0 sm:$0xff] }
  0xc2   :  { %9540 = vmatprep.mubr.msk.bf16.mxu0 %vm10730_vm1, %v10729_v15  ;;  %9537 = vmatpush3.bf16.msra.mxu0 %v10217_v14  ;;  %v9021_v29 = vld [vmem:[#allocation8] ss:$0 sm:$0xff]  ;;  %s10731_s12 = smov 96   ;;  %vm328_vm2 = vcmask 64512   ;;  %v199_v44 = vld [vmem:[#allocation2] sm:$0x1] }
  0xc3   :  { %9538 = vmatprep.subr.bf16.mxu0 %v10729_v15  ;;  %9551 = vmatprep.mubr.msk.f32.mxu1 %vm10730_vm1, %v10729_v15  ;;  %v200_v45 = vld [vmem:[#allocation2 + $0x1] sm:$0x1]  ;;  %v9016_v46 = vadd.f32 -1.0, %v199_v44  ;;  %v11045_v47 = vshrl.u32 %v484_v43, 7  ;;  %s10732_s0 = smov 64   ;;  %s10733_s1 = smov 88  }
  0xc4   :  { %v9017_v48 = vadd.f32 -1.0, %v200_v45  ;;  %s10734_s13 = smov 120   ;;  %s10735_s23 = smov 56   ;;  %vm1698_vm3 = vcmask 130048   ;;  %vm1701_vm4 = vcmask 195584   ;;  %vm1928_vm5 = vcmask 523264  }
  0xc5   :  { %v203_v49 = vmul.f32 1e+09, %v9016_v46  ;;  %v11048_v50 = vsub.s32 0, %v11045_v47  ;;  %s10736_s20 = smov 80   ;;  %s10737_s11 = smov 112  }
  0xc6   :  { %v10993_v0 = vld [vmem:[%s12300_s6] sm:$0xff]  ;;  %v10998_v1 = vld [vmem:[%s12300_s6 + $0x8] sm:$0xff]  ;;  %9539 = vmatpush3.bf16.msra.mxu0 %v10218_v16  ;;  %v204_v51 = vmul.f32 1e+09, %v9017_v48  ;;  %s10738_s5 = smov 48   ;;  %s10739_s9 = smov 72  }
  0xc7   :  { %v214_v2 = vsel %vm213_vm0, %v10993_v0, 0.0  ;;  %v217_v3 = vsel %vm213_vm0, %v10998_v1, 0.0  ;;  %9544 = vmatprep.subr.mxu0 %v10729_v15  ;;  %v11051_v52 = vrot.slane %v203_v49, %v11048_v50  ;;  %s10740_s27 = smov 104   ;;  %s10741_s7 = smov 40  }
  0xc8   :  { %215 = vadd.xlane.f32.xlu0 %v214_v2  ;;  %v11054_v56 = vrot.slane %v204_v51, %v11048_v50  ;;  %s10742_s25 = smov 8   ;;  %s10743_s6 = smov 24  }
  0xc9   :  { %s12301_s15 = sld [smem:[#allocation29_spill]] }
  0xcc   :  { %218 = vadd.xlane.f32.xlu0 %v217_v3 }
 0x155   :  { %v216_v4 = vpop.xlane.xlu0 %215 }
 0x156   :  { %v221_v5 = vmul.f32 0.03125, %v216_v4 }
 0x158   :  { %v223_v6 = vsub.f32 %v10993_v0, %v221_v5 }
 0x159   :  { %v219_v7 = vpop.xlane.xlu0 %218 }
 0x15a   :  { %v222_v8 = vmul.f32 0.03125, %v219_v7  ;;  %v225_v9 = vmul.f32 %v223_v6, %v223_v6 }
 0x15c   :  { %v224_v10 = vsub.f32 %v10998_v1, %v222_v8  ;;  %v227_v11 = vsel %vm213_vm0, %v225_v9, 0.0 }
 0x15d   :  { %228 = vadd.xlane.f32.xlu1 %v227_v11 }
 0x15e   :  { %v226_v12 = vmul.f32 %v224_v10, %v224_v10 }
 0x160   :  { %v230_v13 = vsel %vm213_vm0, %v226_v12, 0.0 }
 0x161   :  { %231 = vadd.xlane.f32.xlu1 %v230_v13 }
 0x1ea   :  { %v229_v17 = vpop.xlane.xlu1 %228 }
 0x1eb   :  { %v233_v18 = vmul.f32 0.03125, %v229_v17 }
 0x1ed   :  { %v235_v19 = vadd.f32 1e-06, %v233_v18 }
 0x1ee   :  { %v232_v20 = vpop.xlane.xlu1 %231 }
 0x1ef   :  { %10261 = vrsqrt.f32 %v235_v19  ;;  %v234_v21 = vmul.f32 0.03125, %v232_v20 }
 0x1f1   :  { %v236_v22 = vadd.f32 1e-06, %v234_v21 }
 0x1f3   :  { %10263 = vrsqrt.f32 %v236_v22 }
 0x1f9   :  { %v10262_v23 = vpop.eup %10261 }
 0x1fa   :  { %v239_v24 = vmul.f32 %v10262_v23, %v223_v6 }
 0x1fc   :  { %v247_v28 = vmul.f32 %v9020_v25, %v239_v24 }
 0x1fd   :  { %v10264_v26 = vpop.eup %10263 }
 0x1fe   :  { %v240_v27 = vmul.f32 %v10264_v26, %v224_v10  ;;  %v255_v31 = vadd.f32 %v9021_v29, %v247_v28 }
 0x200   :  { %v248_v30 = vmul.f32 %v9020_v25, %v240_v27 }
 0x202   :  { %v256_v32 = vadd.f32 %v9021_v29, %v248_v30 }
 0x204   :  { %v262_v33 = vpack.c.bf16 %v256_v32, %v255_v31 }
 0x206   :  { %9541 = vmatmul.mubr.msk.bf16.vlgmr.msra.gmra.mrb[0].mxu0 %vm213_vm0, %v262_v33 }
 0x207   :  { %9546 = vmatprep.mubr.msk.f32.mxu0 %vm10730_vm1, %v10729_v15 }
 0x2d9   :  { %v318_v35 = vpop.f32.mrb[0].mxu0 }
 0x2da   :  { %v11025_v36 = vadd.f32 %v9022_v34, %v318_v35  ;;  %v9542_v37 = vpop.f32.mrb[1].mxu0 }
 0x2db   :  { %v321_v38 = vpop.f32.mrb[2].mxu0 }
 0x2dc   :  { %v11027_v39 = vadd.f32 %v9022_v34, %v321_v38  ;;  %326 = vrot.lane.b32.xlu0 %v11025_v36, %s10731_s12  ;;  %v9543_v40 = vpop.f32.mrb[3].mxu0 }
 0x2de   :  { %404 = vrot.lane.b32.xlu1 %v11027_v39, %s10731_s12 }
 0x34e   :  { %v327_v41 = vpop.permute.xlu0 %326 }
 0x34f   :  { %9545 = vmatpush3.xpose.msk.msra.mxu0 %vm328_vm2, %v327_v41 }
 0x350   :  { %v405_v42 = vpop.permute.xlu1 %404  ;;  %9559 = vmatprep.subr.mxu0 %v10729_v15 }
 0x351   :  { %9550 = vmatpush3.xpose.msk.msra.mxu1 %vm328_vm2, %v405_v42 }
 0x352   :  { %9547 = vmatmul.mubr.msk.f32.vlgmr.msra.gmra.mrb[4].mxu0 %vm328_vm2, %v11025_v36  ;;  %9554 = vmatprep.subr.mxu1 %v10729_v15 }
 0x353   :  { %9561 = vmatprep.mubr.msk.f32.mxu0 %vm10730_vm1, %v10729_v15 }
 0x354   :  { %9552 = vmatmul.mubr.msk.f32.vlgmr.msra.gmra.mrb[0].mxu1 %vm328_vm2, %v11027_v39 }
 0x355   :  { %9556 = vmatprep.mubr.msk.f32.mxu1 %vm10730_vm1, %v10729_v15 }
 0x425   :  { %v399_v53 = vpop.f32.mrb[4].mxu0 }
 0x426   :  { %v480_v54 = vmul.f32 0.35355338, %v399_v53  ;;  %v9548_v55 = vpop.f32.mrb[5].mxu0 }
 0x427   :  { %v476_v57 = vpop.f32.mrb[0].mxu1 }
 0x428   :  { %v481_v58 = vmul.f32 0.35355338, %v476_v57  ;;  %v9553_v59 = vpop.f32.mrb[1].mxu1  ;;  %v494_v60 = vadd.f32 %v11051_v52, %v480_v54 }
 0x42a   :  { %v496_v61 = vsel %vm328_vm2, %v494_v60, -inf  ;;  %v495_v62 = vadd.f32 %v11054_v56, %v481_v58 }
 0x42b   :  { %497 = vmax.xlane.f32.xlu1 %v496_v61 }
 0x42c   :  { %v499_v63 = vsel %vm328_vm2, %v495_v62, -inf }
 0x42d   :  { %500 = vmax.xlane.f32.xlu0 %v499_v63 }
 0x43c   :  { %594 = vrot.lane.b32.xlu1 %v11027_v39, %s10732_s0 }
 0x440   :  { %672 = vrot.lane.b32.xlu1 %v11025_v36, %s10733_s1 }
 0x443   :  { %518 = vrot.lane.b32.xlu0 %v11025_v36, %s10732_s0 }
 0x444   :  { %750 = vrot.lane.b32.xlu1 %v11027_v39, %s10733_s1 }
 0x4b8   :  { %v498_v2 = vpop.xlane.xlu1 %497 }
 0x4b9   :  { %v502_v3 = vsub.f32 %v494_v60, %v498_v2 }
 0x4ba   :  { %v501_v4 = vpop.xlane.xlu0 %500 }
 0x4bb   :  { %v504_v5 = vmul.f32 1.442695, %v502_v3  ;;  %v503_v6 = vsub.f32 %v495_v62, %v501_v4 }
 0x4bc   :  { %v595_v7 = vpop.permute.xlu1 %594 }
 0x4bd   :  { %10265 = vpow2.f32 %v504_v5  ;;  %v506_v8 = vmul.f32 1.442695, %v503_v6  ;;  %9560 = vmatpush3.msra.mxu0 %v595_v7 }
 0x4be   :  { %v519_v9 = vpop.permute.xlu0 %518  ;;  %9569 = vmatprep.subr.mxu0 %v10729_v15 }
 0x4bf   :  { %10267 = vpow2.f32 %v506_v8  ;;  %9555 = vmatpush3.msra.mxu1 %v519_v9 }
 0x4c0   :  { %9564 = vmatprep.subr.mxu1 %v10729_v15  ;;  %v673_v14 = vpop.permute.xlu1 %672 }
 0x4c4   :  { %v751_v16 = vpop.permute.xlu1 %750 }
 0x4c7   :  { %v10266_v10 = vpop.eup %10265 }
 0x4c8   :  { %v508_v11 = vsel %vm328_vm2, %v10266_v10, 0.0 }
 0x4c9   :  { %v10268_v12 = vpop.eup %10267  ;;  %509 = vadd.xlane.f32.xlu0 %v508_v11 }
 0x4ca   :  { %v511_v13 = vsel %vm328_vm2, %v10268_v12, 0.0 }
 0x4cb   :  { %512 = vadd.xlane.f32.xlu1 %v511_v13 }
 0x4dc   :  { %748 = vrot.lane.b32.xlu1 %v11027_v39, %s10734_s13 }
 0x4df   :  { %670 = vrot.lane.b32.xlu0 %v11025_v36, %s10734_s13 }
 0x556   :  { %v510_v17 = vpop.xlane.xlu0 %509 }
 0x557   :  { %10269 = vrcp.f32 %v510_v17 }
 0x558   :  { %v513_v18 = vpop.xlane.xlu1 %512 }
 0x559   :  { %10271 = vrcp.f32 %v513_v18 }
 0x55a   :  { %v671_v23 = vpop.permute.xlu0 %670 }
 0x55c   :  { %v749_v24 = vpop.permute.xlu1 %748 }
 0x561   :  { %v10270_v19 = vpop.eup %10269 }
 0x562   :  { %v515_v20 = vmul.f32 %v10270_v19, %v10266_v10 }
 0x563   :  { %v10272_v21 = vpop.eup %10271 }
 0x564   :  { %9557 = vmatmul.mubr.msk.f32.vlgmr.msra.gmra.mrb[2].mxu1 %vm328_vm2, %v515_v20  ;;  %v517_v22 = vmul.f32 %v10272_v21, %v10268_v12 }
 0x565   :  { %9565 = vmatpush3.xpose.msk.msra.mxu1 %vm328_vm2, %v673_v14  ;;  %9566 = vmatprep.mubr.msk.f32.mxu1 %vm10730_vm1, %v10729_v15 }
 0x566   :  { %9562 = vmatmul.mubr.msk.f32.vlgmr.msra.gmra.mrb[6].mxu0 %vm328_vm2, %v517_v22  ;;  %9574 = vmatprep.subr.mxu1 %v10729_v15 }
 0x567   :  { %9570 = vmatpush3.xpose.msk.msra.mxu0 %vm328_vm2, %v751_v16  ;;  %9571 = vmatprep.mubr.msk.f32.mxu0 %vm10730_vm1, %v10729_v15 }
 0x568   :  { %9567 = vmatmul.mubr.msk.f32.vlgmr.msra.gmra.mrb[4].mxu1 %vm328_vm2, %v671_v23  ;;  %9579 = vmatprep.subr.mxu0 %v10729_v15 }
 0x569   :  { %9576 = vmatprep.mubr.msk.f32.mxu1 %vm10730_vm1, %v10729_v15 }
 0x56a   :  { %9572 = vmatmul.mubr.msk.f32.vlgmr.msra.gmra.mrb[8].mxu0 %vm328_vm2, %v749_v24 }
 0x56b   :  { %9581 = vmatprep.mubr.msk.f32.mxu0 %vm10730_vm1, %v10729_v15 }
 0x637   :  { %v11092_v25 = vpop.f32.mrb[2].mxu1 }
 0x638   :  { %v9558_v26 = vpop.f32.mrb[3].mxu1 }
 0x639   :  { %v11094_v27 = vpop.f32.mrb[6].mxu0 }
 0x63a   :  { %v9563_v28 = vpop.f32.mrb[7].mxu0 }
 0x63b   :  { %v744_v29 = vpop.f32.mrb[4].mxu1 }
 0x63c   :  { %v826_v30 = vmul.f32 0.35355338, %v744_v29  ;;  %v9568_v31 = vpop.f32.mrb[5].mxu1 }
 0x63d   :  { %v822_v32 = vpop.f32.mrb[8].mxu0 }
 0x63e   :  { %v827_v33 = vmul.f32 0.35355338, %v822_v32  ;;  %v9573_v34 = vpop.f32.mrb[9].mxu0  ;;  %v828_v35 = vadd.f32 %v826_v30, %v11051_v52 }
 0x640   :  { %v830_v37 = vsel %vm328_vm2, %v828_v35, -inf  ;;  %v829_v38 = vadd.f32 %v827_v33, %v11054_v56 }
 0x641   :  { %831 = vmax.xlane.f32.xlu0 %v830_v37 }
 0x642   :  { %v833_v40 = vsel %vm328_vm2, %v829_v38, -inf }
 0x643   :  { %834 = vmax.xlane.f32.xlu1 %v833_v40 }
 0x654   :  { %928 = vrot.lane.b32.xlu1 %v11027_v39, %s10735_s23 }
 0x657   :  { %852 = vrot.lane.b32.xlu0 %v11025_v36, %s10735_s23 }
 0x658   :  { %1006 = vrot.lane.b32.xlu1 %v11025_v36, %s10736_s20 }
 0x65c   :  { %1084 = vrot.lane.b32.xlu1 %v11027_v39, %s10736_s20 }
 0x660   :  { %1082 = vrot.lane.b32.xlu1 %v11027_v39, %s10737_s11 }
 0x6ce   :  { %v832_v41 = vpop.xlane.xlu0 %831 }
 0x6cf   :  { %v836_v42 = vsub.f32 %v828_v35, %v832_v41 }
 0x6d0   :  { %v835_v43 = vpop.xlane.xlu1 %834 }
 0x6d1   :  { %v838_v44 = vmul.f32 1.442695, %v836_v42  ;;  %v837_v45 = vsub.f32 %v829_v38, %v835_v43 }
 0x6d2   :  { %v853_v46 = vpop.permute.xlu0 %852 }
 0x6d3   :  { %10273 = vpow2.f32 %v838_v44  ;;  %v840_v48 = vmul.f32 1.442695, %v837_v45  ;;  %9575 = vmatpush3.msra.mxu1 %v853_v46 }
 0x6d4   :  { %v929_v49 = vpop.permute.xlu1 %928  ;;  %9584 = vmatprep.subr.mxu1 %v10729_v15 }
 0x6d5   :  { %10275 = vpow2.f32 %v840_v48  ;;  %9580 = vmatpush3.msra.mxu0 %v929_v49 }
 0x6d6   :  { %9589 = vmatprep.subr.mxu0 %v10729_v15 }
 0x6d8   :  { %v1007_v59 = vpop.permute.xlu1 %1006 }
 0x6dc   :  { %v1085_v63 = vpop.permute.xlu1 %1084 }
 0x6dd   :  { %v10274_v51 = vpop.eup %10273 }
 0x6de   :  { %v842_v53 = vsel %vm328_vm2, %v10274_v51, 0.0 }
 0x6df   :  { %v10276_v54 = vpop.eup %10275  ;;  %843 = vadd.xlane.f32.xlu0 %v842_v53 }
 0x6e0   :  { %v845_v55 = vsel %vm328_vm2, %v10276_v54, 0.0  ;;  %v1083_v4 = vpop.permute.xlu1 %1082 }
 0x6e3   :  { %846 = vadd.xlane.f32.xlu0 %v845_v55 }
 0x6f9   :  { %1004 = vrot.lane.b32.xlu0 %v11025_v36, %s10737_s11 }
 0x76c   :  { %v844_v57 = vpop.xlane.xlu0 %843 }
 0x76d   :  { %10277 = vrcp.f32 %v844_v57 }
 0x770   :  { %v847_v58 = vpop.xlane.xlu0 %846 }
 0x771   :  { %10279 = vrcp.f32 %v847_v58 }
 0x774   :  { %v1005_v3 = vpop.permute.xlu0 %1004 }
 0x777   :  { %v10278_v60 = vpop.eup %10277 }
 0x778   :  { %v849_v61 = vmul.f32 %v10278_v60, %v10274_v51 }
 0x77a   :  { %9577 = vmatmul.mubr.msk.f32.vlgmr.msra.gmra.mrb[6].mxu1 %vm328_vm2, %v849_v61 }
 0x77b   :  { %v10280_v62 = vpop.eup %10279  ;;  %9585 = vmatpush3.xpose.msk.msra.mxu1 %vm328_vm2, %v1007_v59  ;;  %9586 = vmatprep.mubr.msk.f32.mxu1 %vm10730_vm1, %v10729_v15 }
 0x77c   :  { %v851_v2 = vmul.f32 %v10280_v62, %v10276_v54  ;;  %9594 = vmatprep.subr.mxu1 %v10729_v15 }
 0x77e   :  { %9582 = vmatmul.mubr.msk.f32.vlgmr.msra.gmra.mrb[10].mxu0 %vm328_vm2, %v851_v2  ;;  %9587 = vmatmul.mubr.msk.f32.vlgmr.msra.gmra.mrb[8].mxu1 %vm328_vm2, %v1005_v3 }
 0x77f   :  { %9590 = vmatpush3.xpose.msk.msra.mxu0 %vm328_vm2, %v1085_v63  ;;  %9591 = vmatprep.mubr.msk.f32.mxu0 %vm10730_vm1, %v10729_v15 }
 0x780   :  { %9599 = vmatprep.subr.mxu0 %v10729_v15  ;;  %9596 = vmatprep.mubr.msk.f32.mxu1 %vm10730_vm1, %v10729_v15 }
 0x782   :  { %9592 = vmatmul.mubr.msk.f32.vlgmr.msra.gmra.mrb[12].mxu0 %vm328_vm2, %v1083_v4 }
 0x783   :  { %9601 = vmatprep.mubr.msk.f32.mxu0 %vm10730_vm1, %v10729_v15 }
 0x84d   :  { %v11132_v5 = vpop.f32.mrb[6].mxu1 }
 0x84e   :  { %v9578_v6 = vpop.f32.mrb[7].mxu1 }
 0x851   :  { %v11134_v7 = vpop.f32.mrb[10].mxu0  ;;  %v1078_v8 = vpop.f32.mrb[8].mxu1 }
 0x852   :  { %v10135_v9 = vpack.i.bf16 %v11134_v7, %v11132_v5  ;;  %v1160_v10 = vmul.f32 0.35355338, %v1078_v8  ;;  %v9583_v11 = vpop.f32.mrb[11].mxu0  ;;  %v9588_v12 = vpop.f32.mrb[9].mxu1 }
 0x854   :  { %v1162_v13 = vadd.f32 %v1160_v10, %v11051_v52 }
 0x855   :  { %v1156_v14 = vpop.f32.mrb[12].mxu0 }
 0x856   :  { %v1161_v16 = vmul.f32 0.35355338, %v1156_v14  ;;  %v9593_v17 = vpop.f32.mrb[13].mxu0  ;;  %v1164_v18 = vsel %vm328_vm2, %v1162_v13, -inf }
 0x857   :  { %1165 = vmax.xlane.f32.xlu0 %v1164_v18 }
 0x858   :  { %v1163_v19 = vadd.f32 %v1161_v16, %v11054_v56 }
 0x85a   :  { %v1167_v20 = vsel %vm328_vm2, %v1163_v19, -inf }
 0x85b   :  { %1168 = vmax.xlane.f32.xlu1 %v1167_v20 }
 0x86c   :  { %1262 = vrot.lane.b32.xlu1 %v11027_v39, %s10738_s5 }
 0x86d   :  { %1186 = vrot.lane.b32.xlu0 %v11025_v36, %s10738_s5 }
 0x870   :  { %1340 = vrot.lane.b32.xlu1 %v11025_v36, %s10739_s9 }
 0x874   :  { %1418 = vrot.lane.b32.xlu1 %v11027_v39, %s10739_s9 }
 0x878   :  { %1416 = vrot.lane.b32.xlu1 %v11027_v39, %s10740_s27 }
 0x8e4   :  { %v1166_v21 = vpop.xlane.xlu0 %1165 }
 0x8e5   :  { %v1170_v22 = vsub.f32 %v1162_v13, %v1166_v21 }
 0x8e7   :  { %v1172_v23 = vmul.f32 1.442695, %v1170_v22  ;;  %v10220_v22 = vld [vmem:[%s12284_s10 + $0x8] sm:$0xff]  }
 0x8e8   :  { %v1187_v24 = vpop.permute.xlu0 %1186  ;;  %v1169_v26 = vpop.xlane.xlu1 %1168 }
 0x8e9   :  { %10281 = vpow2.f32 %v1172_v23  ;;  %v1171_v28 = vsub.f32 %v1163_v19, %v1169_v26  ;;  %9595 = vmatpush3.msra.mxu1 %v1187_v24 }
 0x8ea   :  { %9604 = vmatprep.subr.mxu1 %v10729_v15 }
 0x8eb   :  { %v1174_v29 = vmul.f32 1.442695, %v1171_v28 }
 0x8ec   :  { %v1263_v30 = vpop.permute.xlu1 %1262 }
 0x8ed   :  { %10283 = vpow2.f32 %v1174_v29  ;;  %9600 = vmatpush3.msra.mxu0 %v1263_v30 }
 0x8ee   :  { %9609 = vmatprep.subr.mxu0 %v10729_v15 }
 0x8f0   :  { %v1341_v38 = vpop.permute.xlu1 %1340 }
 0x8f3   :  { %v10282_v31 = vpop.eup %10281 }
 0x8f4   :  { %v1176_v32 = vsel %vm328_vm2, %v10282_v31, 0.0  ;;  %v1419_v43 = vpop.permute.xlu1 %1418 }
 0x8f5   :  { %1177 = vadd.xlane.f32.xlu0 %v1176_v32 }
 0x8f7   :  { %v10284_v33 = vpop.eup %10283 }
 0x8f8   :  { %v1179_v34 = vsel %vm328_vm2, %v10284_v33, 0.0  ;;  %v1417_v46 = vpop.permute.xlu1 %1416 }
 0x8f9   :  { %1180 = vadd.xlane.f32.xlu0 %v1179_v34 }
 0x90f   :  { %1338 = vrot.lane.b32.xlu0 %v11025_v36, %s10740_s27 }
 0x982   :  { %v1178_v35 = vpop.xlane.xlu0 %1177 }
 0x983   :  { %10285 = vrcp.f32 %v1178_v35 }
 0x986   :  { %v1181_v37 = vpop.xlane.xlu0 %1180 }
 0x987   :  { %10287 = vrcp.f32 %v1181_v37 }
 0x98a   :  { %v1339_v45 = vpop.permute.xlu0 %1338 }
 0x98d   :  { %v10286_v40 = vpop.eup %10285 }
 0x98e   :  { %v1183_v41 = vmul.f32 %v10286_v40, %v10282_v31 }
 0x990   :  { %9597 = vmatmul.mubr.msk.f32.vlgmr.msra.gmra.mrb[10].mxu1 %vm328_vm2, %v1183_v41 }
 0x991   :  { %v10288_v42 = vpop.eup %10287  ;;  %9605 = vmatpush3.xpose.msk.msra.mxu1 %vm328_vm2, %v1341_v38  ;;  %9606 = vmatprep.mubr.msk.f32.mxu1 %vm10730_vm1, %v10729_v15 }
 0x992   :  { %v1185_v44 = vmul.f32 %v10288_v42, %v10284_v33  ;;  %9614 = vmatprep.subr.mxu1 %v10729_v15 }
 0x994   :  { %9602 = vmatmul.mubr.msk.f32.vlgmr.msra.gmra.mrb[14].mxu0 %vm328_vm2, %v1185_v44  ;;  %9607 = vmatmul.mubr.msk.f32.vlgmr.msra.gmra.mrb[12].mxu1 %vm328_vm2, %v1339_v45 }
 0x995   :  { %9610 = vmatpush3.xpose.msk.msra.mxu0 %vm328_vm2, %v1419_v43  ;;  %9611 = vmatprep.mubr.msk.f32.mxu0 %vm10730_vm1, %v10729_v15 }
 0x996   :  { %9619 = vmatprep.subr.mxu0 %v10729_v15  ;;  %9616 = vmatprep.mubr.msk.f32.mxu1 %vm10730_vm1, %v10729_v15 }
 0x998   :  { %9612 = vmatmul.mubr.msk.f32.vlgmr.msra.gmra.mrb[16].mxu0 %vm328_vm2, %v1417_v46 }
 0x999   :  { %9621 = vmatprep.mubr.msk.f32.mxu0 %vm10730_vm1, %v10729_v15 }
 0xa63   :  { %v1258_v48 = vpop.f32.mrb[10].mxu1 }
 0xa64   :  { %v9598_v49 = vpop.f32.mrb[11].mxu1 }
 0xa67   :  { %v1334_v51 = vpop.f32.mrb[14].mxu0  ;;  %v1412_v53 = vpop.f32.mrb[12].mxu1 }
 0xa68   :  { %v10140_v54 = vpack.i.bf16 %v1334_v51, %v1258_v48  ;;  %v1494_v55 = vmul.f32 0.35355338, %v1412_v53  ;;  %v9603_v57 = vpop.f32.mrb[15].mxu0  ;;  %v9608_v58 = vpop.f32.mrb[13].mxu1 }
 0xa6a   :  { %v1496_v59 = vadd.f32 %v1494_v55, %v11051_v52 }
 0xa6b   :  { %v1490_v60 = vpop.f32.mrb[16].mxu0 }
 0xa6c   :  { %v1495_v61 = vmul.f32 0.35355338, %v1490_v60  ;;  %v9613_v62 = vpop.f32.mrb[17].mxu0  ;;  %v1498_v63 = vsel %vm328_vm2, %v1496_v59, -inf }
 0xa6d   :  { %1499 = vmax.xlane.f32.xlu0 %v1498_v63 }
 0xa6e   :  { %v1497_v2 = vadd.f32 %v1495_v61, %v11054_v56 }
 0xa70   :  { %v1501_v3 = vsel %vm328_vm2, %v1497_v2, -inf }
 0xa71   :  { %1502 = vmax.xlane.f32.xlu1 %v1501_v3 }
 0xa82   :  { %1596 = vrot.lane.b32.xlu1 %v11027_v39, %s10741_s7 }
 0xa86   :  { %10136 = vrot.lane.b32.xlu1 %v10135_v9, %s10742_s25 }
 0xa8a   :  { %10141 = vrot.lane.b32.xlu1 %v10140_v54, %s10720_s22 }
 0xafa   :  { %v1500_v4 = vpop.xlane.xlu0 %1499 }
 0xafb   :  { %v1504_v6 = vsub.f32 %v1496_v59, %v1500_v4 }
 0xafd   :  { %v1506_v8 = vmul.f32 1.442695, %v1504_v6 }
 0xafe   :  { %v1503_v10 = vpop.xlane.xlu1 %1502 }
 0xaff   :  { %10289 = vpow2.f32 %v1506_v8  ;;  %v1505_v11 = vsub.f32 %v1497_v2, %v1503_v10  ;;  %v10221_v10 = vld [vmem:[%s12288_s14] sm:$0xff]  }
 0xb01   :  { %v1508_v12 = vmul.f32 1.442695, %v1505_v11  ;;  %v10222_v11 = vld [vmem:[%s12288_s14 + $0x8] sm:$0xff]  }
 0xb02   :  { %v1597_v13 = vpop.permute.xlu1 %1596 }
 0xb03   :  { %10291 = vpow2.f32 %v1508_v12  ;;  %9620 = vmatpush3.msra.mxu0 %v1597_v13  ;;  %v10223_v12 = vld [vmem:[%s12290_s16] sm:$0xff]   ;;  %v10224_v13 = vld [vmem:[%s12290_s16 + $0x8] sm:$0xff]  }
 0xb04   :  { %9632 = vmatprep.subr.bf16.mxu0 %v10729_v15 }
 0xb06   :  { %v10137_v30 = vpop.permute.xlu1 %10136 }
 0xb07   :  { %v10139_v32 = vunpack.i.h.bf16 %v10137_v30  ;;  %v10138_v33 = vunpack.i.l.bf16 %v10137_v30  ;;  %v10226_v30 = vld [vmem:[%s12290_s16 + $0x18] sm:$0xff]  }
 0xb09   :  { %v10290_v39 = vpop.eup %10289  ;;  %v1697_v38 = vsel %vm328_vm2, %v11094_v27, %v10139_v32  ;;  %v1696_v40 = vsel %vm328_vm2, %v11092_v25, %v10138_v33  ;;  %v9050_v27 = vld [vmem:[#allocation11] ss:$0 sm:$0xff] }
 0xb0a   :  { %v1510_v14 = vsel %vm328_vm2, %v10290_v39, 0.0  ;;  %v10142_v31 = vpop.permute.xlu1 %10141 }
 0xb0b   :  { %1511 = vadd.xlane.f32.xlu0 %v1510_v14  ;;  %v10144_v34 = vunpack.i.h.bf16 %v10142_v31  ;;  %v10143_v35 = vunpack.i.l.bf16 %v10142_v31  ;;  %v9056_v31 = vld [vmem:[#allocation16] ss:$0 sm:$0xff] }
 0xb0d   :  { %v10292_v5 = vpop.eup %10291  ;;  %v1699_v43 = vsel %vm1698_vm3, %v1696_v40, %v10143_v35  ;;  %v1700_v44 = vsel %vm1698_vm3, %v1697_v38, %v10144_v34 }
 0xb0e   :  { %v1513_v7 = vsel %vm328_vm2, %v10292_v5, 0.0 }
 0xb0f   :  { %1514 = vadd.xlane.f32.xlu0 %v1513_v7 }
 0xb25   :  { %1520 = vrot.lane.b32.xlu0 %v11025_v36, %s10741_s7  ;;  %v10219_v36 = vld [vmem:[%s12284_s10] sm:$0xff]  }
 0xb98   :  { %v1512_v9 = vpop.xlane.xlu0 %1511 }
 0xb99   :  { %10293 = vrcp.f32 %v1512_v9 }
 0xb9c   :  { %v1515_v16 = vpop.xlane.xlu0 %1514 }
 0xb9d   :  { %10295 = vrcp.f32 %v1515_v16 }
 0xba0   :  { %v1521_v17 = vpop.permute.xlu0 %1520 }
 0xba1   :  { %9615 = vmatpush3.msra.mxu1 %v1521_v17 }
 0xba2   :  { %9624 = vmatprep.subr.bf16.mxu1 %v10729_v15 }
 0xba3   :  { %v10294_v18 = vpop.eup %10293 }
 0xba4   :  { %v1517_v19 = vmul.f32 %v10294_v18, %v10290_v39 }
 0xba6   :  { %9617 = vmatmul.mubr.msk.f32.vlgmr.msra.gmra.mrb[14].mxu1 %vm328_vm2, %v1517_v19  ;;  %v9054_v19 = vld [vmem:[#allocation13] ss:$0 sm:$0xff] }
 0xba7   :  { %v10296_v20 = vpop.eup %10295  ;;  %9628 = vmatprep.mubr.msk.bf16.mxu1 %vm10730_vm1, %v10729_v15  ;;  %9625 = vmatpush3.bf16.msra.mxu1 %v10219_v36 }
 0xba8   :  { %v1519_v21 = vmul.f32 %v10296_v20, %v10292_v5  ;;  %9626 = vmatprep.subr.bf16.mxu1 %v10729_v15 }
 0xbaa   :  { %9622 = vmatmul.mubr.msk.f32.vlgmr.msra.gmra.mrb[18].mxu0 %vm328_vm2, %v1519_v21 }
 0xbab   :  { %9636 = vmatprep.mubr.msk.bf16.mxu0 %vm10730_vm1, %v10729_v15  ;;  %9627 = vmatpush3.bf16.msra.mxu1 %v10220_v22  ;;  %v9055_v22 = vld [vmem:[#allocation14] ss:$0 sm:$0xff] }
 0xbac   :  { %9640 = vmatprep.subr.bf16.mxu1 %v10729_v15  ;;  %9633 = vmatpush3.bf16.msra.mxu0 %v10221_v10 }
 0xbad   :  { %9634 = vmatprep.subr.bf16.mxu0 %v10729_v15 }
 0xbb0   :  { %9635 = vmatpush3.bf16.msra.mxu0 %v10222_v11 }
 0xbb1   :  { %9652 = vmatprep.subr.bf16.mxu0 %v10729_v15 }
 0xc79   :  { %v1592_v23 = vpop.f32.mrb[14].mxu1 }
 0xc7a   :  { %v9618_v24 = vpop.f32.mrb[15].mxu1 }
 0xc7d   :  { %v1668_v26 = vpop.f32.mrb[18].mxu0 }
 0xc7e   :  { %v10145_v28 = vpack.i.bf16 %v1668_v26, %v1592_v23  ;;  %v9623_v29 = vpop.f32.mrb[19].mxu0 }
 0xc7f   :  { %v10225_v29 = vld [vmem:[%s12290_s16 + $0x10] sm:$0xff]  }
 0xc80   :  { %10146 = vrot.lane.b32.xlu0 %v10145_v28, %s10743_s6 }
 0xcf2   :  { %v10147_v37 = vpop.permute.xlu0 %10146 }
 0xcf3   :  { %v10149_v41 = vunpack.i.h.bf16 %v10147_v37  ;;  %v10148_v42 = vunpack.i.l.bf16 %v10147_v37 }
 0xcf5   :  { %v1703_v45 = vsel %vm1701_vm4, %v1700_v44, %v10149_v41  ;;  %v1702_v46 = vsel %vm1701_vm4, %v1699_v43, %v10148_v42  ;;  %v9060_v43 = vld [vmem:[#allocation17] ss:$0 sm:$0xff] }
 0xcf6   :  { %v1704_v48 = vpack.c.bf16 %v1703_v45, %v1702_v46 }
 0xcf8   :  { %9629 = vmatmul.mubr.msk.bf16.vlgmr.msra.gmra.mrb[16].mxu1 %vm213_vm0, %v1704_v48 }
 0xcf9   :  { %9648 = vmatprep.mubr.msk.bf16.mxu1 %vm10730_vm1, %v10729_v15  ;;  %9641 = vmatpush3.bf16.msra.mxu1 %v10223_v12 }
 0xcfa   :  { %9642 = vmatprep.subr.bf16.mxu1 %v10729_v15 }
 0xcfd   :  { %9643 = vmatpush3.bf16.msra.mxu1 %v10224_v13 }
 0xcfe   :  { %9644 = vmatprep.subr.bf16.mxu1 %v10729_v15 }
 0xd01   :  { %9645 = vmatpush3.bf16.msra.mxu1 %v10225_v29 }
 0xd02   :  { %9646 = vmatprep.subr.bf16.mxu1 %v10729_v15 }
 0xd05   :  { %9647 = vmatpush3.bf16.msra.mxu1 %v10226_v30 }
 0xd06   :  { %9670 = vmatprep.subr.mxu1 %v10729_v15 }
 0xdcb   :  { %v1765_v49 = vpop.f32.mrb[16].mxu1 }
 0xdcc   :  { %v1766_v51 = vadd.f32 %v9050_v27, %v1765_v49  ;;  %v9630_v25 = vpop.f32.mrb[17].mxu1 }
 0xdcd   :  { %v1768_v53 = vpop.f32.mrb[18].mxu1 }
 0xdce   :  { %v11218_v54 = vadd.f32 %v1766_v51, %v10993_v0  ;;  %v1769_v55 = vadd.f32 %v9050_v27, %v1768_v53  ;;  %v9631_v57 = vpop.f32.mrb[19].mxu1 }
 0xdd0   :  { %v11221_v58 = vadd.f32 %v1769_v55, %v10998_v1  ;;  %v1776_v59 = vsel %vm213_vm0, %v11218_v54, 0.0 }
 0xdd1   :  { %1777 = vadd.xlane.f32.xlu1 %v1776_v59 }
 0xdd2   :  { %v1779_v60 = vsel %vm213_vm0, %v11221_v58, 0.0 }
 0xdd3   :  { %1780 = vadd.xlane.f32.xlu0 %v1779_v60 }
 0xe5e   :  { %v1778_v61 = vpop.xlane.xlu1 %1777 }
 0xe5f   :  { %v1782_v62 = vmul.f32 0.03125, %v1778_v61 }
 0xe60   :  { %v1781_v63 = vpop.xlane.xlu0 %1780 }
 0xe61   :  { %v1784_v2 = vsub.f32 %v11218_v54, %v1782_v62  ;;  %v1783_v0 = vmul.f32 0.03125, %v1781_v63 }
 0xe63   :  { %v1785_v3 = vsub.f32 %v11221_v58, %v1783_v0  ;;  %v1786_v4 = vmul.f32 %v1784_v2, %v1784_v2 }
 0xe65   :  { %v1788_v1 = vsel %vm213_vm0, %v1786_v4, 0.0  ;;  %v1787_v6 = vmul.f32 %v1785_v3, %v1785_v3 }
 0xe66   :  { %1789 = vadd.xlane.f32.xlu0 %v1788_v1  ;;  %v10227_v1 = vld [vmem:[%s12282_s8 + $0x10] sm:$0xff]  }
 0xe67   :  { %v1791_v8 = vsel %vm213_vm0, %v1787_v6, 0.0  ;;  %v10228_v6 = vld [vmem:[%s12282_s8 + $0x18] sm:$0xff]  }
 0xe6a   :  { %1792 = vadd.xlane.f32.xlu0 %v1791_v8 }
 0xef3   :  { %v1790_v39 = vpop.xlane.xlu0 %1789 }
 0xef4   :  { %v1794_v14 = vmul.f32 0.03125, %v1790_v39 }
 0xef6   :  { %v1796_v5 = vadd.f32 1e-06, %v1794_v14 }
 0xef7   :  { %v1793_v7 = vpop.xlane.xlu0 %1792 }
 0xef8   :  { %10297 = vrsqrt.f32 %v1796_v5  ;;  %v1795_v9 = vmul.f32 0.03125, %v1793_v7  ;;  %v9066_v5 = vld [vmem:[#allocation7 + $0x1] ss:$0 sm:$0xff] }
 0xefa   :  { %v1797_v16 = vadd.f32 1e-06, %v1795_v9 }
 0xefc   :  { %10299 = vrsqrt.f32 %v1797_v16 }
 0xf02   :  { %v10298_v17 = vpop.eup %10297 }
 0xf03   :  { %v1800_v18 = vmul.f32 %v10298_v17, %v1784_v2 }
 0xf05   :  { %v1808_v21 = vmul.f32 %v9054_v19, %v1800_v18  ;;  %v9067_v18 = vld [vmem:[#allocation8 + $0x1] ss:$0 sm:$0xff] }
 0xf06   :  { %v10300_v20 = vpop.eup %10299 }
 0xf07   :  { %v1801_v36 = vmul.f32 %v10300_v20, %v1785_v3  ;;  %v1816_v24 = vadd.f32 %v9055_v22, %v1808_v21 }
 0xf09   :  { %v1809_v23 = vmul.f32 %v9054_v19, %v1801_v36 }
 0xf0b   :  { %v1817_v26 = vadd.f32 %v9055_v22, %v1809_v23  ;;  %v9072_v22 = vld [vmem:[#allocation10 + $0x1] ss:$0 sm:$0xff] }
 0xf0d   :  { %v1818_v28 = vpack.c.bf16 %v1817_v26, %v1816_v24 }
 0xf0f   :  { %9637 = vmatmul.mubr.msk.bf16.vlgmr.msra.gmra.mrb[20].mxu0 %vm213_vm0, %v1818_v28 }
 0xf10   :  { %9656 = vmatprep.mubr.msk.bf16.mxu0 %vm10730_vm1, %v10729_v15  ;;  %9653 = vmatpush3.bf16.msra.mxu0 %v10227_v1 }
 0xf11   :  { %9654 = vmatprep.subr.bf16.mxu0 %v10729_v15 }
 0xf14   :  { %9655 = vmatpush3.bf16.msra.mxu0 %v10228_v6 }
 0xf15   :  { %9660 = vmatprep.subr.mxu0 %v10729_v15 }
 0xfe2   :  { %v1879_v32 = vpop.f32.mrb[20].mxu0 }
 0xfe3   :  { %v1880_v33 = vadd.f32 %v9056_v31, %v1879_v32  ;;  %v9638_v34 = vpop.f32.mrb[21].mxu0 }
 0xfe4   :  { %v1882_v35 = vpop.f32.mrb[22].mxu0 }
 0xfe5   :  { %v1883_v37 = vadd.f32 %v9056_v31, %v1882_v35  ;;  %v9639_v38 = vpop.f32.mrb[23].mxu0  ;;  %v1886_v40 = vmax.f32 %v1880_v33, 0.0 }
 0xfe7   :  { %v1887_v41 = vmax.f32 %v1883_v37, 0.0 }
 0xfe9   :  { %v1888_v42 = vpack.c.bf16 %v1887_v41, %v1886_v40 }
 0xfeb   :  { %9649 = vmatmul.mubr.msk.bf16.vlgmr.msra.gmra.mrb[20].mxu1 %vm1928_vm5, %v1888_v42 }
 0xfec   :  { %9672 = vmatprep.mubr.msk.f32.mxu1 %vm10730_vm1, %v10729_v15 }
0x10be   :  { %v1966_v44 = vpop.f32.mrb[20].mxu1 }
0x10bf   :  { %v1967_v45 = vadd.f32 %v9060_v43, %v1966_v44  ;;  %v9650_v46 = vpop.f32.mrb[21].mxu1 }
0x10c0   :  { %v1969_v48 = vpop.f32.mrb[22].mxu1 }
0x10c1   :  { %v1973_v27 = vadd.f32 %v1967_v45, %v11218_v54  ;;  %v1970_v49 = vadd.f32 %v9060_v43, %v1969_v48  ;;  %v9651_v51 = vpop.f32.mrb[23].mxu1 }
0x10c3   :  { %v11262_v25 = vmax.f32 %v1973_v27, 0.0  ;;  %v1974_v53 = vadd.f32 %v1970_v49, %v11221_v58 }
0x10c5   :  { %v11265_v55 = vmax.f32 %v1974_v53, 0.0  ;;  %v1981_v57 = vsel %vm213_vm0, %v11262_v25, 0.0 }
0x10c6   :  { %1982 = vadd.xlane.f32.xlu1 %v1981_v57 }
0x10c7   :  { %v1984_v59 = vsel %vm213_vm0, %v11265_v55, 0.0 }
0x10c8   :  { %1985 = vadd.xlane.f32.xlu0 %v1984_v59 }
0x1153   :  { %v1983_v60 = vpop.xlane.xlu1 %1982 }
0x1154   :  { %v1987_v61 = vmul.f32 0.03125, %v1983_v60 }
0x1155   :  { %v1986_v62 = vpop.xlane.xlu0 %1985 }
0x1156   :  { %v1989_v54 = vsub.f32 %v11262_v25, %v1987_v61  ;;  %v1988_v63 = vmul.f32 0.03125, %v1986_v62 }
0x1158   :  { %v1990_v2 = vsub.f32 %v11265_v55, %v1988_v63  ;;  %v1991_v0 = vmul.f32 %v1989_v54, %v1989_v54 }
0x115a   :  { %v1993_v58 = vsel %vm213_vm0, %v1991_v0, 0.0  ;;  %v1992_v3 = vmul.f32 %v1990_v2, %v1990_v2 }
0x115b   :  { %1994 = vadd.xlane.f32.xlu1 %v1993_v58 }
0x115c   :  { %v1996_v4 = vsel %vm213_vm0, %v1992_v3, 0.0 }
0x115d   :  { %1997 = vadd.xlane.f32.xlu0 %v1996_v4 }
0x11e8   :  { %v1995_v8 = vpop.xlane.xlu1 %1994 }
0x11e9   :  { %v1999_v10 = vmul.f32 0.03125, %v1995_v8 }
0x11ea   :  { %v1998_v11 = vpop.xlane.xlu0 %1997 }
0x11eb   :  { %v2001_v12 = vadd.f32 1e-06, %v1999_v10  ;;  %v2000_v13 = vmul.f32 0.03125, %v1998_v11 }
0x11ed   :  { %10301 = vrsqrt.f32 %v2001_v12  ;;  %v2002_v39 = vadd.f32 1e-06, %v2000_v13 }
0x11ef   :  { %10303 = vrsqrt.f32 %v2002_v39 }
0x11f7   :  { %v10302_v14 = vpop.eup %10301 }
0x11f8   :  { %v2005_v7 = vmul.f32 %v10302_v14, %v1989_v54 }
0x11f9   :  { %v10304_v9 = vpop.eup %10303 }
0x11fa   :  { %v2013_v16 = vmul.f32 %v9066_v5, %v2005_v7  ;;  %v2006_v17 = vmul.f32 %v10304_v9, %v1990_v2 }
0x11fc   :  { %v2014_v19 = vmul.f32 %v9066_v5, %v2006_v17  ;;  %v2021_v20 = vadd.f32 %v9067_v18, %v2013_v16 }
0x11fe   :  { %v2022_v21 = vadd.f32 %v9067_v18, %v2014_v19 }
0x1200   :  { %v2030_v36 = vpack.c.bf16 %v2022_v21, %v2021_v20 }
0x1202   :  { %9657 = vmatmul.mubr.msk.bf16.vlgmr.msra.gmra.mrb[24].mxu0 %vm213_vm0, %v2030_v36 }
0x1203   :  { %9662 = vmatprep.mubr.msk.f32.mxu0 %vm10730_vm1, %v10729_v15 }
0x12d5   :  { %v2086_v23 = vpop.f32.mrb[24].mxu0 }
0x12d6   :  { %v11286_v24 = vadd.f32 %v9072_v22, %v2086_v23  ;;  %v9658_v26 = vpop.f32.mrb[25].mxu0 }
0x12d7   :  { %v2089_v28 = vpop.f32.mrb[26].mxu0 }
0x12d8   :  { %v11288_v29 = vadd.f32 %v9072_v22, %v2089_v28  ;;  %2094 = vrot.lane.b32.xlu1 %v11286_v24, %s10731_s12  ;;  %v9659_v30 = vpop.f32.mrb[27].mxu0 }
0x12da   :  { %2171 = vrot.lane.b32.xlu0 %v11288_v29, %s10731_s12 }
0x134a   :  { %v2095_v31 = vpop.permute.xlu1 %2094 }
0x134b   :  { %9661 = vmatpush3.xpose.msk.msra.mxu0 %vm328_vm2, %v2095_v31 }
0x134c   :  { %9665 = vmatprep.subr.mxu0 %v10729_v15  ;;  %v2172_v32 = vpop.permute.xlu0 %2171 }
0x134e   :  { %9663 = vmatmul.mubr.msk.f32.vlgmr.msra.gmra.mrb[28].mxu0 %vm328_vm2, %v11286_v24 }
0x134f   :  { %9666 = vmatpush3.xpose.msk.msra.mxu0 %vm328_vm2, %v2172_v32  ;;  %9667 = vmatprep.mubr.msk.f32.mxu0 %vm10730_vm1, %v10729_v15 }
0x1350   :  { %9675 = vmatprep.subr.mxu0 %v10729_v15 }
0x1352   :  { %9668 = vmatmul.mubr.msk.f32.vlgmr.msra.gmra.mrb[30].mxu0 %vm328_vm2, %v11288_v29 }
0x1353   :  { %9677 = vmatprep.mubr.msk.f32.mxu0 %vm10730_vm1, %v10729_v15 }
0x1421   :  { %v2166_v33 = vpop.f32.mrb[28].mxu0 }
0x1422   :  { %v2247_v34 = vmul.f32 0.35355338, %v2166_v33  ;;  %v9664_v35 = vpop.f32.mrb[29].mxu0 }
0x1424   :  { %v2249_v37 = vadd.f32 %v2247_v34, %v11051_v52 }
0x1425   :  { %v2243_v38 = vpop.f32.mrb[30].mxu0 }
0x1426   :  { %v2248_v40 = vmul.f32 0.35355338, %v2243_v38  ;;  %v9669_v41 = vpop.f32.mrb[31].mxu0  ;;  %v2251_v42 = vsel %vm328_vm2, %v2249_v37, -inf }
0x1427   :  { %2252 = vmax.xlane.f32.xlu1 %v2251_v42 }
0x1428   :  { %v2250_v43 = vadd.f32 %v2248_v40, %v11054_v56 }
0x142a   :  { %v2254_v44 = vsel %vm328_vm2, %v2250_v43, -inf }
0x142b   :  { %2255 = vmax.xlane.f32.xlu0 %v2254_v44 }
0x1438   :  { %2273 = vrot.lane.b32.xlu1 %v11286_v24, %s10732_s0 }
0x143c   :  { %2427 = vrot.lane.b32.xlu1 %v11286_v24, %s10733_s1 }
0x1440   :  { %2505 = vrot.lane.b32.xlu1 %v11288_v29, %s10733_s1 }
0x1441   :  { %2349 = vrot.lane.b32.xlu0 %v11288_v29, %s10732_s0 }
0x14b4   :  { %v2253_v45 = vpop.xlane.xlu1 %2252 }
0x14b5   :  { %v2257_v46 = vsub.f32 %v2249_v37, %v2253_v45 }
0x14b7   :  { %v2259_v48 = vmul.f32 1.442695, %v2257_v46 }
0x14b8   :  { %v2274_v27 = vpop.permute.xlu1 %2273  ;;  %v2256_v49 = vpop.xlane.xlu0 %2255 }
0x14b9   :  { %10305 = vpow2.f32 %v2259_v48  ;;  %v2258_v51 = vsub.f32 %v2250_v43, %v2256_v49  ;;  %9671 = vmatpush3.msra.mxu1 %v2274_v27 }
0x14ba   :  { %9680 = vmatprep.subr.mxu1 %v10729_v15 }
0x14bb   :  { %v2261_v53 = vmul.f32 1.442695, %v2258_v51 }
0x14bc   :  { %v2350_v57 = vpop.permute.xlu0 %2349  ;;  %v2428_v54 = vpop.permute.xlu1 %2427 }
0x14bd   :  { %10307 = vpow2.f32 %v2261_v53  ;;  %9676 = vmatpush3.msra.mxu0 %v2350_v57 }
0x14be   :  { %9685 = vmatprep.subr.mxu0 %v10729_v15 }
0x14c0   :  { %v2506_v63 = vpop.permute.xlu1 %2505 }
0x14c3   :  { %v10306_v59 = vpop.eup %10305 }
0x14c4   :  { %v2263_v60 = vsel %vm328_vm2, %v10306_v59, 0.0 }
0x14c5   :  { %2264 = vadd.xlane.f32.xlu1 %v2263_v60 }
0x14c7   :  { %v10308_v61 = vpop.eup %10307 }
0x14c8   :  { %v2266_v62 = vsel %vm328_vm2, %v10308_v61, 0.0 }
0x14c9   :  { %2267 = vadd.xlane.f32.xlu0 %v2266_v62 }
0x14d6   :  { %2425 = vrot.lane.b32.xlu1 %v11286_v24, %s10734_s13 }
0x14df   :  { %2503 = vrot.lane.b32.xlu0 %v11288_v29, %s10734_s13 }
0x1552   :  { %v2265_v2 = vpop.xlane.xlu1 %2264 }
0x1553   :  { %10309 = vrcp.f32 %v2265_v2 }
0x1556   :  { %v2268_v0 = vpop.xlane.xlu0 %2267  ;;  %v2426_v6 = vpop.permute.xlu1 %2425 }
0x1557   :  { %10311 = vrcp.f32 %v2268_v0 }
0x155a   :  { %v2504_v8 = vpop.permute.xlu0 %2503 }
0x155d   :  { %v10310_v58 = vpop.eup %10309 }
0x155e   :  { %v2270_v3 = vmul.f32 %v10310_v58, %v10306_v59 }
0x1560   :  { %9673 = vmatmul.mubr.msk.f32.vlgmr.msra.gmra.mrb[24].mxu1 %vm328_vm2, %v2270_v3 }
0x1561   :  { %v10312_v4 = vpop.eup %10311  ;;  %9681 = vmatpush3.xpose.msk.msra.mxu1 %vm328_vm2, %v2428_v54  ;;  %9682 = vmatprep.mubr.msk.f32.mxu1 %vm10730_vm1, %v10729_v15 }
0x1562   :  { %v2272_v1 = vmul.f32 %v10312_v4, %v10308_v61  ;;  %9690 = vmatprep.subr.mxu1 %v10729_v15 }
0x1564   :  { %9678 = vmatmul.mubr.msk.f32.vlgmr.msra.gmra.mrb[32].mxu0 %vm328_vm2, %v2272_v1  ;;  %9683 = vmatmul.mubr.msk.f32.vlgmr.msra.gmra.mrb[26].mxu1 %vm328_vm2, %v2426_v6 }
0x1565   :  { %9686 = vmatpush3.xpose.msk.msra.mxu0 %vm328_vm2, %v2506_v63  ;;  %9687 = vmatprep.mubr.msk.f32.mxu0 %vm10730_vm1, %v10729_v15 }
0x1566   :  { %9695 = vmatprep.subr.mxu0 %v10729_v15  ;;  %9692 = vmatprep.mubr.msk.f32.mxu1 %vm10730_vm1, %v10729_v15 }
0x1568   :  { %9688 = vmatmul.mubr.msk.f32.vlgmr.msra.gmra.mrb[34].mxu0 %vm328_vm2, %v2504_v8 }
0x1569   :  { %9697 = vmatprep.mubr.msk.f32.mxu0 %vm10730_vm1, %v10729_v15 }
0x1633   :  { %v11342_v10 = vpop.f32.mrb[24].mxu1 }
0x1634   :  { %v9674_v11 = vpop.f32.mrb[25].mxu1 }
0x1637   :  { %v11344_v12 = vpop.f32.mrb[32].mxu0  ;;  %v2499_v13 = vpop.f32.mrb[26].mxu1 }
0x1638   :  { %v2581_v39 = vmul.f32 0.35355338, %v2499_v13  ;;  %v9679_v14 = vpop.f32.mrb[33].mxu0  ;;  %v9684_v5 = vpop.f32.mrb[27].mxu1 }
0x163a   :  { %v2583_v7 = vadd.f32 %v2581_v39, %v11051_v52 }
0x163b   :  { %v2577_v9 = vpop.f32.mrb[34].mxu0 }
0x163c   :  { %v2582_v16 = vmul.f32 0.35355338, %v2577_v9  ;;  %v9689_v17 = vpop.f32.mrb[35].mxu0  ;;  %v2585_v18 = vsel %vm328_vm2, %v2583_v7, -inf }
0x163d   :  { %2586 = vmax.xlane.f32.xlu1 %v2585_v18 }
0x163e   :  { %v2584_v19 = vadd.f32 %v2582_v16, %v11054_v56 }
0x1640   :  { %v2588_v20 = vsel %vm328_vm2, %v2584_v19, -inf }
0x1641   :  { %2589 = vmax.xlane.f32.xlu0 %v2588_v20 }
0x164e   :  { %2607 = vrot.lane.b32.xlu1 %v11286_v24, %s10735_s23 }
0x1652   :  { %2761 = vrot.lane.b32.xlu1 %v11286_v24, %s10736_s20 }
0x1656   :  { %2839 = vrot.lane.b32.xlu1 %v11288_v29, %s10736_s20 }
0x1657   :  { %2683 = vrot.lane.b32.xlu0 %v11288_v29, %s10735_s23 }
0x165a   :  { %2759 = vrot.lane.b32.xlu1 %v11286_v24, %s10737_s11 }
0x16ca   :  { %v2587_v21 = vpop.xlane.xlu1 %2586 }
0x16cb   :  { %v2591_v36 = vsub.f32 %v2583_v7, %v2587_v21 }
0x16cd   :  { %v2593_v22 = vmul.f32 1.442695, %v2591_v36 }
0x16ce   :  { %v2608_v23 = vpop.permute.xlu1 %2607  ;;  %v2590_v26 = vpop.xlane.xlu0 %2589 }
0x16cf   :  { %10313 = vpow2.f32 %v2593_v22  ;;  %v2592_v28 = vsub.f32 %v2584_v19, %v2590_v26  ;;  %9691 = vmatpush3.msra.mxu1 %v2608_v23 }
0x16d0   :  { %9700 = vmatprep.subr.mxu1 %v10729_v15 }
0x16d1   :  { %v2595_v30 = vmul.f32 1.442695, %v2592_v28 }
0x16d2   :  { %v2684_v31 = vpop.permute.xlu0 %2683  ;;  %v2762_v40 = vpop.permute.xlu1 %2761 }
0x16d3   :  { %10315 = vpow2.f32 %v2595_v30  ;;  %9696 = vmatpush3.msra.mxu0 %v2684_v31 }
0x16d4   :  { %9705 = vmatprep.subr.mxu0 %v10729_v15 }
0x16d6   :  { %v2840_v42 = vpop.permute.xlu1 %2839 }
0x16d9   :  { %v10314_v32 = vpop.eup %10313 }
0x16da   :  { %v2597_v33 = vsel %vm328_vm2, %v10314_v32, 0.0  ;;  %v2760_v46 = vpop.permute.xlu1 %2759 }
0x16db   :  { %2598 = vadd.xlane.f32.xlu0 %v2597_v33 }
0x16dd   :  { %v10316_v34 = vpop.eup %10315 }
0x16de   :  { %v2600_v35 = vsel %vm328_vm2, %v10316_v34, 0.0 }
0x16df   :  { %2601 = vadd.xlane.f32.xlu0 %v2600_v35 }
0x16f5   :  { %2837 = vrot.lane.b32.xlu0 %v11288_v29, %s10737_s11 }
0x1768   :  { %v2599_v37 = vpop.xlane.xlu0 %2598 }
0x1769   :  { %10317 = vrcp.f32 %v2599_v37 }
0x176c   :  { %v2602_v38 = vpop.xlane.xlu0 %2601 }
0x176d   :  { %10319 = vrcp.f32 %v2602_v38 }
0x1770   :  { %v2838_v48 = vpop.permute.xlu0 %2837 }
0x1773   :  { %v10318_v41 = vpop.eup %10317 }
0x1774   :  { %v2604_v43 = vmul.f32 %v10318_v41, %v10314_v32 }
0x1776   :  { %9693 = vmatmul.mubr.msk.f32.vlgmr.msra.gmra.mrb[28].mxu1 %vm328_vm2, %v2604_v43 }
0x1777   :  { %v10320_v44 = vpop.eup %10319  ;;  %9701 = vmatpush3.xpose.msk.msra.mxu1 %vm328_vm2, %v2762_v40  ;;  %9702 = vmatprep.mubr.msk.f32.mxu1 %vm10730_vm1, %v10729_v15 }
0x1778   :  { %v2606_v45 = vmul.f32 %v10320_v44, %v10316_v34  ;;  %9710 = vmatprep.subr.mxu1 %v10729_v15 }
0x177a   :  { %9698 = vmatmul.mubr.msk.f32.vlgmr.msra.gmra.mrb[36].mxu0 %vm328_vm2, %v2606_v45  ;;  %9703 = vmatmul.mubr.msk.f32.vlgmr.msra.gmra.mrb[30].mxu1 %vm328_vm2, %v2760_v46 }
0x177b   :  { %9706 = vmatpush3.xpose.msk.msra.mxu0 %vm328_vm2, %v2840_v42  ;;  %9707 = vmatprep.mubr.msk.f32.mxu0 %vm10730_vm1, %v10729_v15 }
0x177c   :  { %9715 = vmatprep.subr.mxu0 %v10729_v15  ;;  %9712 = vmatprep.mubr.msk.f32.mxu1 %vm10730_vm1, %v10729_v15 }
0x177e   :  { %9708 = vmatmul.mubr.msk.f32.vlgmr.msra.gmra.mrb[38].mxu0 %vm328_vm2, %v2838_v48 }
0x177f   :  { %9717 = vmatprep.mubr.msk.f32.mxu0 %vm10730_vm1, %v10729_v15 }
0x1849   :  { %v11382_v27 = vpop.f32.mrb[28].mxu1 }
0x184a   :  { %v9694_v49 = vpop.f32.mrb[29].mxu1 }
0x184d   :  { %v11384_v51 = vpop.f32.mrb[36].mxu0  ;;  %v2833_v53 = vpop.f32.mrb[30].mxu1 }
0x184e   :  { %v10150_v57 = vpack.i.bf16 %v11384_v51, %v11382_v27  ;;  %v2915_v59 = vmul.f32 0.35355338, %v2833_v53  ;;  %v9699_v60 = vpop.f32.mrb[37].mxu0  ;;  %v9704_v61 = vpop.f32.mrb[31].mxu1 }
0x1850   :  { %v2917_v62 = vadd.f32 %v2915_v59, %v11051_v52 }
0x1851   :  { %v2911_v54 = vpop.f32.mrb[38].mxu0 }
0x1852   :  { %v2916_v63 = vmul.f32 0.35355338, %v2911_v54  ;;  %v9709_v2 = vpop.f32.mrb[39].mxu0  ;;  %v2919_v0 = vsel %vm328_vm2, %v2917_v62, -inf }
0x1853   :  { %2920 = vmax.xlane.f32.xlu1 %v2919_v0 }
0x1854   :  { %v2918_v58 = vadd.f32 %v2916_v63, %v11054_v56 }
0x1856   :  { %v2922_v3 = vsel %vm328_vm2, %v2918_v58, -inf }
0x1857   :  { %2923 = vmax.xlane.f32.xlu0 %v2922_v3 }
0x1864   :  { %2941 = vrot.lane.b32.xlu1 %v11286_v24, %s10738_s5 }
0x1868   :  { %3095 = vrot.lane.b32.xlu1 %v11286_v24, %s10739_s9 }
0x186c   :  { %3173 = vrot.lane.b32.xlu1 %v11288_v29, %s10739_s9 }
0x186d   :  { %3017 = vrot.lane.b32.xlu0 %v11288_v29, %s10738_s5 }
0x1870   :  { %3093 = vrot.lane.b32.xlu1 %v11286_v24, %s10740_s27 }
0x18e0   :  { %v2921_v4 = vpop.xlane.xlu1 %2920 }
0x18e1   :  { %v2925_v1 = vsub.f32 %v2917_v62, %v2921_v4 }
0x18e3   :  { %v2927_v6 = vmul.f32 1.442695, %v2925_v1  ;;  %v10230_v1 = vld [vmem:[%s12284_s10 + $0x18] sm:$0xff]  }
0x18e4   :  { %v2942_v8 = vpop.permute.xlu1 %2941  ;;  %v2924_v11 = vpop.xlane.xlu0 %2923 }
0x18e5   :  { %10321 = vpow2.f32 %v2927_v6  ;;  %v2926_v13 = vsub.f32 %v2918_v58, %v2924_v11  ;;  %9711 = vmatpush3.msra.mxu1 %v2942_v8 }
0x18e6   :  { %9720 = vmatprep.subr.mxu1 %v10729_v15 }
0x18e7   :  { %v2929_v39 = vmul.f32 1.442695, %v2926_v13 }
0x18e8   :  { %v3018_v14 = vpop.permute.xlu0 %3017  ;;  %v3096_v19 = vpop.permute.xlu1 %3095 }
0x18e9   :  { %10323 = vpow2.f32 %v2929_v39  ;;  %9716 = vmatpush3.msra.mxu0 %v3018_v14 }
0x18ea   :  { %9725 = vmatprep.subr.mxu0 %v10729_v15 }
0x18ec   :  { %v3174_v21 = vpop.permute.xlu1 %3173 }
0x18ef   :  { %v10322_v5 = vpop.eup %10321 }
0x18f0   :  { %v2931_v7 = vsel %vm328_vm2, %v10322_v5, 0.0  ;;  %v3094_v26 = vpop.permute.xlu1 %3093 }
0x18f1   :  { %2932 = vadd.xlane.f32.xlu0 %v2931_v7 }
0x18f3   :  { %v10324_v9 = vpop.eup %10323 }
0x18f4   :  { %v2934_v16 = vsel %vm328_vm2, %v10324_v9, 0.0 }
0x18f5   :  { %2935 = vadd.xlane.f32.xlu0 %v2934_v16 }
0x190b   :  { %3171 = vrot.lane.b32.xlu0 %v11288_v29, %s10740_s27 }
0x197e   :  { %v2933_v17 = vpop.xlane.xlu0 %2932 }
0x197f   :  { %10325 = vrcp.f32 %v2933_v17 }
0x1982   :  { %v2936_v18 = vpop.xlane.xlu0 %2935 }
0x1983   :  { %10327 = vrcp.f32 %v2936_v18 }
0x1986   :  { %v3172_v28 = vpop.permute.xlu0 %3171 }
0x1989   :  { %v10326_v20 = vpop.eup %10325 }
0x198a   :  { %v2938_v36 = vmul.f32 %v10326_v20, %v10322_v5 }
0x198c   :  { %9713 = vmatmul.mubr.msk.f32.vlgmr.msra.gmra.mrb[32].mxu1 %vm328_vm2, %v2938_v36 }
0x198d   :  { %v10328_v22 = vpop.eup %10327  ;;  %9721 = vmatpush3.xpose.msk.msra.mxu1 %vm328_vm2, %v3096_v19  ;;  %9722 = vmatprep.mubr.msk.f32.mxu1 %vm10730_vm1, %v10729_v15 }
0x198e   :  { %v2940_v23 = vmul.f32 %v10328_v22, %v10324_v9  ;;  %9730 = vmatprep.subr.mxu1 %v10729_v15 }
0x1990   :  { %9718 = vmatmul.mubr.msk.f32.vlgmr.msra.gmra.mrb[40].mxu0 %vm328_vm2, %v2940_v23  ;;  %9723 = vmatmul.mubr.msk.f32.vlgmr.msra.gmra.mrb[34].mxu1 %vm328_vm2, %v3094_v26 }
0x1991   :  { %9726 = vmatpush3.xpose.msk.msra.mxu0 %vm328_vm2, %v3174_v21  ;;  %9727 = vmatprep.mubr.msk.f32.mxu0 %vm10730_vm1, %v10729_v15 }
0x1992   :  { %9735 = vmatprep.subr.mxu0 %v10729_v15  ;;  %9732 = vmatprep.mubr.msk.f32.mxu1 %vm10730_vm1, %v10729_v15 }
0x1994   :  { %9728 = vmatmul.mubr.msk.f32.vlgmr.msra.gmra.mrb[42].mxu0 %vm328_vm2, %v3172_v28 }
0x1995   :  { %9737 = vmatprep.mubr.msk.f32.mxu0 %vm10730_vm1, %v10729_v15 }
0x1a5f   :  { %v3013_v30 = vpop.f32.mrb[32].mxu1 }
0x1a60   :  { %v9714_v31 = vpop.f32.mrb[33].mxu1 }
0x1a63   :  { %v3089_v32 = vpop.f32.mrb[40].mxu0  ;;  %v3167_v33 = vpop.f32.mrb[34].mxu1 }
0x1a64   :  { %v10155_v34 = vpack.i.bf16 %v3089_v32, %v3013_v30  ;;  %v3249_v35 = vmul.f32 0.35355338, %v3167_v33  ;;  %v9719_v37 = vpop.f32.mrb[41].mxu0  ;;  %v9724_v38 = vpop.f32.mrb[35].mxu1 }
0x1a66   :  { %v3251_v40 = vadd.f32 %v3249_v35, %v11051_v52 }
0x1a67   :  { %v3245_v41 = vpop.f32.mrb[42].mxu0 }
0x1a68   :  { %v3250_v42 = vmul.f32 0.35355338, %v3245_v41  ;;  %v9729_v43 = vpop.f32.mrb[43].mxu0  ;;  %v3253_v44 = vsel %vm328_vm2, %v3251_v40, -inf }
0x1a69   :  { %3254 = vmax.xlane.f32.xlu1 %v3253_v44 }
0x1a6a   :  { %v3252_v45 = vadd.f32 %v3250_v42, %v11054_v56  ;;  %v10231_v42 = vld [vmem:[%s12282_s8 + $0x40] sm:$0xff]  }
0x1a6c   :  { %v3256_v46 = vsel %vm328_vm2, %v3252_v45, -inf }
0x1a6d   :  { %3257 = vmax.xlane.f32.xlu0 %v3256_v46 }
0x1a7a   :  { %3275 = vrot.lane.b32.xlu1 %v11286_v24, %s10741_s7 }
0x1a7e   :  { %10151 = vrot.lane.b32.xlu1 %v10150_v57, %s10742_s25 }
0x1a82   :  { %10156 = vrot.lane.b32.xlu1 %v10155_v34, %s10720_s22 }
0x1af6   :  { %v3255_v48 = vpop.xlane.xlu1 %3254 }
0x1af7   :  { %v3259_v49 = vsub.f32 %v3251_v40, %v3255_v48 }
0x1af9   :  { %v3261_v53 = vmul.f32 1.442695, %v3259_v49 }
0x1afa   :  { %v3276_v59 = vpop.permute.xlu1 %3275  ;;  %v3258_v60 = vpop.xlane.xlu0 %3257 }
0x1afb   :  { %10329 = vpow2.f32 %v3261_v53  ;;  %v3260_v61 = vsub.f32 %v3252_v45, %v3258_v60  ;;  %9731 = vmatpush3.msra.mxu1 %v3276_v59 }
0x1afc   :  { %9740 = vmatprep.subr.bf16.mxu1 %v10729_v15 }
0x1afd   :  { %v3263_v62 = vmul.f32 1.442695, %v3260_v61  ;;  %v9114_v61 = vld [vmem:[#allocation10 + $0x4] ss:$0 sm:$0xff] }
0x1afe   :  { %v10152_v14 = vpop.permute.xlu1 %10151 }
0x1aff   :  { %10331 = vpow2.f32 %v3263_v62  ;;  %v10154_v7 = vunpack.i.h.bf16 %v10152_v14  ;;  %v10153_v9 = vunpack.i.l.bf16 %v10152_v14 }
0x1b01   :  { %v3452_v19 = vsel %vm328_vm2, %v11344_v12, %v10154_v7  ;;  %v3451_v20 = vsel %vm328_vm2, %v11342_v10, %v10153_v9  ;;  %v9104_v12 = vld [vmem:[#allocation11 + $0x1] ss:$0 sm:$0xff] }
0x1b02   :  { %v10157_v5 = vpop.permute.xlu1 %10156 }
0x1b03   :  { %v10159_v16 = vunpack.i.h.bf16 %v10157_v5  ;;  %v10158_v17 = vunpack.i.l.bf16 %v10157_v5 }
0x1b05   :  { %v10330_v24 = vpop.eup %10329  ;;  %v3454_v22 = vsel %vm1698_vm3, %v3452_v19, %v10159_v16  ;;  %v3453_v23 = vsel %vm1698_vm3, %v3451_v20, %v10158_v17 }
0x1b06   :  { %v3265_v54 = vsel %vm328_vm2, %v10330_v24, 0.0 }
0x1b07   :  { %3266 = vadd.xlane.f32.xlu0 %v3265_v54 }
0x1b09   :  { %v10332_v27 = vpop.eup %10331 }
0x1b0a   :  { %v3268_v51 = vsel %vm328_vm2, %v10332_v27, 0.0 }
0x1b0b   :  { %3269 = vadd.xlane.f32.xlu0 %v3268_v51 }
0x1b21   :  { %3351 = vrot.lane.b32.xlu0 %v11288_v29, %s10741_s7  ;;  %v10229_v29 = vld [vmem:[%s12284_s10 + $0x10] sm:$0xff]  }
0x1b94   :  { %v3267_v57 = vpop.xlane.xlu0 %3266 }
0x1b95   :  { %10333 = vrcp.f32 %v3267_v57 }
0x1b98   :  { %v3270_v63 = vpop.xlane.xlu0 %3269 }
0x1b99   :  { %10335 = vrcp.f32 %v3270_v63 }
0x1b9c   :  { %v3352_v2 = vpop.permute.xlu0 %3351 }
0x1b9d   :  { %9736 = vmatpush3.msra.mxu0 %v3352_v2  ;;  %v197_v2 = vld [vmem:[%s12301_s15] sm:$0xff] }
0x1b9e   :  { %9748 = vmatprep.subr.bf16.mxu0 %v10729_v15 }
0x1b9f   :  { %v10334_v0 = vpop.eup %10333 }
0x1ba0   :  { %v3272_v58 = vmul.f32 %v10334_v0, %v10330_v24  ;;  %v198_v0 = vld [vmem:[%s12301_s15 + $0x8] sm:$0xff] }
0x1ba2   :  { %9733 = vmatmul.mubr.msk.f32.vlgmr.msra.gmra.mrb[36].mxu1 %vm328_vm2, %v3272_v58 }
0x1ba3   :  { %v10336_v3 = vpop.eup %10335  ;;  %9744 = vmatprep.mubr.msk.bf16.mxu1 %vm10730_vm1, %v10729_v15  ;;  %9741 = vmatpush3.bf16.msra.mxu1 %v10229_v29 }
0x1ba4   :  { %v3274_v4 = vmul.f32 %v10336_v3, %v10332_v27  ;;  %9742 = vmatprep.subr.bf16.mxu1 %v10729_v15  ;;  %v3645_v3 = vpack.c.bf16 %v198_v0, %v197_v2 }
0x1ba6   :  { %9738 = vmatmul.mubr.msk.f32.vlgmr.msra.gmra.mrb[44].mxu0 %vm328_vm2, %v3274_v4 }
0x1ba7   :  { %9752 = vmatprep.mubr.msk.bf16.mxu0 %vm10730_vm1, %v10729_v15  ;;  %9743 = vmatpush3.bf16.msra.mxu1 %v10230_v1  ;;  %v9108_v1 = vld [vmem:[#allocation7 + $0x4] ss:$0 sm:$0xff] }
0x1ba8   :  { %9756 = vmatprep.subr.bf16.mxu1 %v10729_v15  ;;  %9749 = vmatpush3.bf16.msra.mxu0 %v10231_v42 }
0x1ba9   :  { %9750 = vmatprep.subr.bf16.mxu0 %v10729_v15 }
0x1c75   :  { %v3347_v6 = vpop.f32.mrb[36].mxu1 }
0x1c76   :  { %v9734_v8 = vpop.f32.mrb[37].mxu1 }
0x1c79   :  { %v3423_v11 = vpop.f32.mrb[44].mxu0 }
0x1c7a   :  { %v10160_v13 = vpack.i.bf16 %v3423_v11, %v3347_v6  ;;  %v9739_v39 = vpop.f32.mrb[45].mxu0 }
0x1c7c   :  { %10161 = vrot.lane.b32.xlu1 %v10160_v13, %s10743_s6  ;;  %v9109_v13 = vld [vmem:[#allocation8 + $0x4] ss:$0 sm:$0xff] }
0x1cee   :  { %v10162_v18 = vpop.permute.xlu1 %10161 }
0x1cef   :  { %v10164_v21 = vunpack.i.h.bf16 %v10162_v18  ;;  %v10163_v36 = vunpack.i.l.bf16 %v10162_v18 }
0x1cf1   :  { %v3456_v26 = vsel %vm1701_vm4, %v3454_v22, %v10164_v21  ;;  %v3455_v28 = vsel %vm1701_vm4, %v3453_v23, %v10163_v36 }
0x1cf2   :  { %v3457_v30 = vpack.c.bf16 %v3456_v26, %v3455_v28 }
0x1cf4   :  { %9745 = vmatmul.mubr.msk.bf16.vlgmr.msra.gmra.mrb[40].mxu1 %vm213_vm0, %v3457_v30 }
0x1cf5   :  { %9760 = vmatprep.mubr.msk.bf16.mxu1 %vm10730_vm1, %v10729_v15 }
0x1dc7   :  { %v3520_v31 = vpop.f32.mrb[40].mxu1 }
0x1dc8   :  { %v3521_v32 = vadd.f32 %v9104_v12, %v3520_v31  ;;  %v9746_v10 = vpop.f32.mrb[41].mxu1 }
0x1dc9   :  { %v3523_v33 = vpop.f32.mrb[42].mxu1 }
0x1dca   :  { %v11468_v34 = vadd.f32 %v3521_v32, %v11262_v25  ;;  %v3524_v35 = vadd.f32 %v9104_v12, %v3523_v33  ;;  %v9747_v37 = vpop.f32.mrb[43].mxu1  ;;  %v10232_v25 = vld [vmem:[%s12282_s8 + $0x48] sm:$0xff]   ;;  %v205_v12 = vld [vmem:[%s12277_s3] sm:$0x1]  ;;  %v206_v32 = vld [vmem:[%s12277_s3 + $0x1] sm:$0x1] }
0x1dcb   :  { %9751 = vmatpush3.bf16.msra.mxu0 %v10232_v25  ;;  %v9018_v31 = vadd.f32 -1.0, %v205_v12  ;;  %v9019_v33 = vadd.f32 -1.0, %v206_v32 }
0x1dcc   :  { %v11471_v38 = vadd.f32 %v3524_v35, %v11265_v55  ;;  %v3533_v40 = vsel %vm213_vm0, %v11468_v34, 0.0  ;;  %9764 = vmatprep.subr.mxu0 %v10729_v15 }
0x1dcd   :  { %3534 = vadd.xlane.f32.xlu0 %v3533_v40  ;;  %v209_v10 = vmul.f32 1e+09, %v9018_v31  ;;  %v210_v37 = vmul.f32 1e+09, %v9019_v33 }
0x1dce   :  { %v3536_v41 = vsel %vm213_vm0, %v11471_v38, 0.0 }
0x1dcf   :  { %3537 = vadd.xlane.f32.xlu1 %v3536_v41  ;;  %v11535_v35 = vrot.slane %v209_v10, %v11048_v50 }
0x1de0   :  { %3648 = vrot.lane.b32.xlu1 %v10232_v25, %s10731_s12 }
0x1de4   :  { %3652 = vrot.lane.b32.xlu1 %v9114_v61, %s10731_s12 }
0x1e5a   :  { %v3535_v55 = vpop.xlane.xlu0 %3534 }
0x1e5b   :  { %v3539_v43 = vmul.f32 0.03125, %v3535_v55  ;;  %v11539_v55 = vrot.slane %v210_v37, %v11048_v50 }
0x1e5c   :  { %v3538_v44 = vpop.xlane.xlu1 %3537 }
0x1e5d   :  { %v3541_v45 = vsub.f32 %v11468_v34, %v3539_v43  ;;  %v3540_v46 = vmul.f32 0.03125, %v3538_v44 }
0x1e5f   :  { %v3542_v48 = vsub.f32 %v11471_v38, %v3540_v46  ;;  %v3543_v49 = vmul.f32 %v3541_v45, %v3541_v45 }
0x1e60   :  { %v3649_v58 = vpop.permute.xlu1 %3648 }
0x1e61   :  { %v3545_v53 = vsel %vm213_vm0, %v3543_v49, 0.0  ;;  %v3544_v59 = vmul.f32 %v3542_v48, %v3542_v48 }
0x1e62   :  { %3546 = vadd.xlane.f32.xlu0 %v3545_v53 }
0x1e63   :  { %v3548_v60 = vsel %vm213_vm0, %v3544_v59, 0.0 }
0x1e64   :  { %v3653_v9 = vpop.permute.xlu1 %3652 }
0x1e66   :  { %3549 = vadd.xlane.f32.xlu0 %v3548_v60 }
0x1e7c   :  { %3646 = vrot.lane.b32.xlu0 %v10231_v42, %s10731_s12 }
0x1eef   :  { %v3547_v62 = vpop.xlane.xlu0 %3546 }
0x1ef0   :  { %v3551_v24 = vmul.f32 0.03125, %v3547_v62 }
0x1ef2   :  { %v3553_v54 = vadd.f32 1e-06, %v3551_v24 }
0x1ef3   :  { %v3550_v27 = vpop.xlane.xlu0 %3549 }
0x1ef4   :  { %10337 = vrsqrt.f32 %v3553_v54  ;;  %v3552_v51 = vmul.f32 0.03125, %v3550_v27 }
0x1ef6   :  { %v3554_v57 = vadd.f32 1e-06, %v3552_v51 }
0x1ef7   :  { %v3647_v63 = vpop.permute.xlu0 %3646 }
0x1ef8   :  { %10339 = vrsqrt.f32 %v3554_v57  ;;  %9757 = vmatpush3.bf16.msra.mxu1 %v3647_v63 }
0x1ef9   :  { %9758 = vmatprep.subr.bf16.mxu1 %v10729_v15 }
0x1efc   :  { %9759 = vmatpush3.bf16.msra.mxu1 %v3649_v58 }
0x1efd   :  { %9774 = vmatprep.subr.mxu1 %v10729_v15 }
0x1efe   :  { %v10338_v4 = vpop.eup %10337 }
0x1eff   :  { %v3557_v29 = vmul.f32 %v10338_v4, %v3541_v45  ;;  %9761 = vmatmul.mubr.msk.bf16.vlgmr.msra.gmra.mrb[44].mxu1 %vm213_vm0, %v3645_v3 }
0x1f00   :  { %9776 = vmatprep.mubr.msk.f32.mxu1 %vm10730_vm1, %v10729_v15 }
0x1f01   :  { %v3565_v8 = vmul.f32 %v9108_v1, %v3557_v29 }
0x1f02   :  { %v10340_v6 = vpop.eup %10339 }
0x1f03   :  { %v3558_v11 = vmul.f32 %v10340_v6, %v3542_v48  ;;  %v3573_v14 = vadd.f32 %v9109_v13, %v3565_v8 }
0x1f05   :  { %v3566_v39 = vmul.f32 %v9108_v1, %v3558_v11 }
0x1f07   :  { %v3574_v5 = vadd.f32 %v9109_v13, %v3566_v39 }
0x1f09   :  { %v3582_v7 = vpack.c.bf16 %v3574_v5, %v3573_v14 }
0x1f0b   :  { %9753 = vmatmul.mubr.msk.bf16.vlgmr.msra.gmra.mrb[48].mxu0 %vm213_vm0, %v3582_v7 }
0x1f0c   :  { %9766 = vmatprep.mubr.msk.f32.mxu0 %vm10730_vm1, %v10729_v15 }
0x1fd2   :  { %v3692_v16 = vpop.f32.mrb[44].mxu1 }
0x1fd3   :  { %v9762_v17 = vpop.f32.mrb[45].mxu1  ;;  %v11506_v18 = vadd.f32 %v3692_v16, %v3653_v9 }
0x1fd4   :  { %v3695_v19 = vpop.f32.mrb[46].mxu1 }
0x1fd5   :  { %v9763_v20 = vpop.f32.mrb[47].mxu1  ;;  %9765 = vmatpush3.xpose.msk.msra.mxu0 %vm328_vm2, %v11506_v18  ;;  %v11513_v23 = vadd.f32 %v3695_v19, %v3653_v9 }
0x1fd6   :  { %9769 = vmatprep.subr.mxu0 %v10729_v15 }
0x1fde   :  { %v3638_v21 = vpop.f32.mrb[48].mxu0 }
0x1fdf   :  { %v11511_v36 = vadd.f32 %v9114_v61, %v3638_v21  ;;  %v9754_v22 = vpop.f32.mrb[49].mxu0 }
0x1fe0   :  { %v3641_v26 = vpop.f32.mrb[50].mxu0 }
0x1fe1   :  { %v9755_v28 = vpop.f32.mrb[51].mxu0  ;;  %9767 = vmatmul.mubr.msk.f32.vlgmr.msra.gmra.mrb[46].mxu0 %vm328_vm2, %v11511_v36  ;;  %v11521_v30 = vadd.f32 %v9114_v61, %v3641_v26 }
0x1fe2   :  { %9770 = vmatpush3.xpose.msk.msra.mxu0 %vm328_vm2, %v11513_v23  ;;  %9771 = vmatprep.mubr.msk.f32.mxu0 %vm10730_vm1, %v10729_v15 }
0x1fe3   :  { %9779 = vmatprep.subr.mxu0 %v10729_v15 }
0x1fe5   :  { %9772 = vmatmul.mubr.msk.f32.vlgmr.msra.gmra.mrb[52].mxu0 %vm328_vm2, %v11521_v30 }
0x1fe6   :  { %9781 = vmatprep.mubr.msk.f32.mxu0 %vm10730_vm1, %v10729_v15 }
0x20b4   :  { %v3771_v40 = vpop.f32.mrb[46].mxu0 }
0x20b5   :  { %v3851_v41 = vmul.f32 0.35355338, %v3771_v40  ;;  %v9768_v42 = vpop.f32.mrb[47].mxu0 }
0x20b7   :  { %v3865_v25 = vadd.f32 %v11535_v35, %v3851_v41 }
0x20b8   :  { %v3847_v43 = vpop.f32.mrb[52].mxu0 }
0x20b9   :  { %v3852_v44 = vmul.f32 0.35355338, %v3847_v43  ;;  %v9773_v45 = vpop.f32.mrb[53].mxu0  ;;  %v3867_v46 = vsel %vm328_vm2, %v3865_v25, -inf }
0x20ba   :  { %3868 = vmax.xlane.f32.xlu1 %v3867_v46 }
0x20bb   :  { %v3866_v48 = vadd.f32 %v11539_v55, %v3852_v44 }
0x20bd   :  { %v3870_v49 = vsel %vm328_vm2, %v3866_v48, -inf }
0x20be   :  { %3871 = vmax.xlane.f32.xlu0 %v3870_v49 }
0x20cb   :  { %3889 = vrot.lane.b32.xlu1 %v11506_v18, %s10731_s12 }
0x20cf   :  { %4043 = vrot.lane.b32.xlu1 %v11506_v18, %s10734_s13 }
0x20d3   :  { %4121 = vrot.lane.b32.xlu1 %v11513_v23, %s10734_s13 }
0x20d4   :  { %3965 = vrot.lane.b32.xlu0 %v11513_v23, %s10731_s12 }
0x20d7   :  { %4041 = vrot.lane.b32.xlu1 %v11511_v36, %s10734_s13 }
0x2147   :  { %v3869_v53 = vpop.xlane.xlu1 %3868 }
0x2148   :  { %v3873_v59 = vsub.f32 %v3865_v25, %v3869_v53 }
0x214a   :  { %v3875_v60 = vmul.f32 1.442695, %v3873_v59 }
0x214b   :  { %v3890_v61 = vpop.permute.xlu1 %3889  ;;  %v3872_v62 = vpop.xlane.xlu0 %3871 }
0x214c   :  { %10341 = vpow2.f32 %v3875_v60  ;;  %v3874_v24 = vsub.f32 %v3866_v48, %v3872_v62  ;;  %9775 = vmatpush3.msra.mxu1 %v3890_v61 }
0x214d   :  { %9784 = vmatprep.subr.mxu1 %v10729_v15 }
0x214e   :  { %v3877_v54 = vmul.f32 1.442695, %v3874_v24 }
0x214f   :  { %v3966_v27 = vpop.permute.xlu0 %3965  ;;  %v4044_v3 = vpop.permute.xlu1 %4043 }
0x2150   :  { %10343 = vpow2.f32 %v3877_v54  ;;  %9780 = vmatpush3.msra.mxu0 %v3966_v27 }
0x2151   :  { %9789 = vmatprep.subr.mxu0 %v10729_v15 }
0x2153   :  { %v4122_v29 = vpop.permute.xlu1 %4121 }
0x2156   :  { %v10342_v51 = vpop.eup %10341 }
0x2157   :  { %v3879_v57 = vsel %vm328_vm2, %v10342_v51, 0.0  ;;  %v4042_v11 = vpop.permute.xlu1 %4041 }
0x2158   :  { %3880 = vadd.xlane.f32.xlu0 %v3879_v57 }
0x215a   :  { %v10344_v63 = vpop.eup %10343 }
0x215b   :  { %v3882_v2 = vsel %vm328_vm2, %v10344_v63, 0.0 }
0x215c   :  { %3883 = vadd.xlane.f32.xlu0 %v3882_v2 }
0x2172   :  { %4119 = vrot.lane.b32.xlu0 %v11521_v30, %s10734_s13 }
0x21e5   :  { %v3881_v0 = vpop.xlane.xlu0 %3880 }
0x21e6   :  { %10345 = vrcp.f32 %v3881_v0 }
0x21e9   :  { %v3884_v58 = vpop.xlane.xlu0 %3883 }
0x21ea   :  { %10347 = vrcp.f32 %v3884_v58 }
0x21ed   :  { %v4120_v13 = vpop.permute.xlu0 %4119 }
0x21f0   :  { %v10346_v4 = vpop.eup %10345 }
0x21f1   :  { %v3886_v1 = vmul.f32 %v10346_v4, %v10342_v51 }
0x21f3   :  { %9777 = vmatmul.mubr.msk.f32.vlgmr.msra.gmra.mrb[38].mxu1 %vm328_vm2, %v3886_v1 }
0x21f4   :  { %v10348_v6 = vpop.eup %10347  ;;  %9785 = vmatpush3.xpose.msk.msra.mxu1 %vm328_vm2, %v4044_v3  ;;  %9786 = vmatprep.mubr.msk.f32.mxu1 %vm10730_vm1, %v10729_v15 }
0x21f5   :  { %v3888_v8 = vmul.f32 %v10348_v6, %v10344_v63  ;;  %9794 = vmatprep.subr.mxu1 %v10729_v15 }
0x21f7   :  { %9782 = vmatmul.mubr.msk.f32.vlgmr.msra.gmra.mrb[54].mxu0 %vm328_vm2, %v3888_v8  ;;  %9787 = vmatmul.mubr.msk.f32.vlgmr.msra.gmra.mrb[48].mxu1 %vm328_vm2, %v4042_v11 }
0x21f8   :  { %9790 = vmatpush3.xpose.msk.msra.mxu0 %vm328_vm2, %v4122_v29  ;;  %9791 = vmatprep.mubr.msk.f32.mxu0 %vm10730_vm1, %v10729_v15 }
0x21f9   :  { %9799 = vmatprep.subr.mxu0 %v10729_v15  ;;  %9796 = vmatprep.mubr.msk.f32.mxu1 %vm10730_vm1, %v10729_v15 }
0x21fb   :  { %9792 = vmatmul.mubr.msk.f32.vlgmr.msra.gmra.mrb[56].mxu0 %vm328_vm2, %v4120_v13 }
0x21fc   :  { %9801 = vmatprep.mubr.msk.f32.mxu0 %vm10730_vm1, %v10729_v15 }
0x22c6   :  { %v11576_v39 = vpop.f32.mrb[38].mxu1 }
0x22c7   :  { %v9778_v14 = vpop.f32.mrb[39].mxu1 }
0x22ca   :  { %v11578_v5 = vpop.f32.mrb[54].mxu0  ;;  %v4115_v7 = vpop.f32.mrb[48].mxu1 }
0x22cb   :  { %v4197_v9 = vmul.f32 0.35355338, %v4115_v7  ;;  %v9783_v16 = vpop.f32.mrb[55].mxu0  ;;  %v9788_v17 = vpop.f32.mrb[49].mxu1 }
0x22cd   :  { %v4199_v19 = vadd.f32 %v4197_v9, %v11535_v35 }
0x22ce   :  { %v4193_v20 = vpop.f32.mrb[56].mxu0 }
0x22cf   :  { %v4198_v21 = vmul.f32 0.35355338, %v4193_v20  ;;  %v9793_v22 = vpop.f32.mrb[57].mxu0  ;;  %v4201_v26 = vsel %vm328_vm2, %v4199_v19, -inf }
0x22d0   :  { %4202 = vmax.xlane.f32.xlu1 %v4201_v26 }
0x22d1   :  { %v4200_v28 = vadd.f32 %v4198_v21, %v11539_v55 }
0x22d3   :  { %v4204_v12 = vsel %vm328_vm2, %v4200_v28, -inf }
0x22d4   :  { %4205 = vmax.xlane.f32.xlu0 %v4204_v12 }
0x22e1   :  { %4223 = vrot.lane.b32.xlu1 %v11506_v18, %s10733_s1 }
0x22e5   :  { %4377 = vrot.lane.b32.xlu1 %v11506_v18, %s10737_s11 }
0x22e9   :  { %4455 = vrot.lane.b32.xlu1 %v11513_v23, %s10737_s11 }
0x22ea   :  { %4299 = vrot.lane.b32.xlu0 %v11513_v23, %s10733_s1 }
0x22ed   :  { %4375 = vrot.lane.b32.xlu1 %v11511_v36, %s10737_s11 }
0x235d   :  { %v4203_v31 = vpop.xlane.xlu1 %4202 }
0x235e   :  { %v4207_v32 = vsub.f32 %v4199_v19, %v4203_v31 }
0x2360   :  { %v4209_v10 = vmul.f32 1.442695, %v4207_v32 }
0x2361   :  { %v4224_v33 = vpop.permute.xlu1 %4223  ;;  %v4206_v37 = vpop.xlane.xlu0 %4205 }
0x2362   :  { %10349 = vpow2.f32 %v4209_v10  ;;  %v4208_v40 = vsub.f32 %v4200_v28, %v4206_v37  ;;  %9795 = vmatpush3.msra.mxu1 %v4224_v33 }
0x2363   :  { %9804 = vmatprep.subr.mxu1 %v10729_v15 }
0x2364   :  { %v4211_v41 = vmul.f32 1.442695, %v4208_v40 }
0x2365   :  { %v4300_v42 = vpop.permute.xlu0 %4299  ;;  %v4378_v49 = vpop.permute.xlu1 %4377 }
0x2366   :  { %10351 = vpow2.f32 %v4211_v41  ;;  %9800 = vmatpush3.msra.mxu0 %v4300_v42 }
0x2367   :  { %9809 = vmatprep.subr.mxu0 %v10729_v15 }
0x2369   :  { %v4456_v59 = vpop.permute.xlu1 %4455 }
0x236c   :  { %v10350_v25 = vpop.eup %10349 }
0x236d   :  { %v4213_v43 = vsel %vm328_vm2, %v10350_v25, 0.0  ;;  %v4376_v24 = vpop.permute.xlu1 %4375 }
0x236e   :  { %4214 = vadd.xlane.f32.xlu0 %v4213_v43 }
0x2370   :  { %v10352_v44 = vpop.eup %10351 }
0x2371   :  { %v4216_v45 = vsel %vm328_vm2, %v10352_v44, 0.0 }
0x2372   :  { %4217 = vadd.xlane.f32.xlu0 %v4216_v45 }
0x2388   :  { %4453 = vrot.lane.b32.xlu0 %v11521_v30, %s10737_s11 }
0x23fb   :  { %v4215_v46 = vpop.xlane.xlu0 %4214 }
0x23fc   :  { %10353 = vrcp.f32 %v4215_v46 }
0x23ff   :  { %v4218_v48 = vpop.xlane.xlu0 %4217 }
0x2400   :  { %10355 = vrcp.f32 %v4218_v48 }
0x2403   :  { %v4454_v54 = vpop.permute.xlu0 %4453 }
0x2406   :  { %v10354_v53 = vpop.eup %10353 }
0x2407   :  { %v4220_v60 = vmul.f32 %v10354_v53, %v10350_v25 }
0x2409   :  { %9797 = vmatmul.mubr.msk.f32.vlgmr.msra.gmra.mrb[50].mxu1 %vm328_vm2, %v4220_v60 }
0x240a   :  { %v10356_v61 = vpop.eup %10355  ;;  %9805 = vmatpush3.xpose.msk.msra.mxu1 %vm328_vm2, %v4378_v49  ;;  %9806 = vmatprep.mubr.msk.f32.mxu1 %vm10730_vm1, %v10729_v15 }
0x240b   :  { %v4222_v62 = vmul.f32 %v10356_v61, %v10352_v44  ;;  %9814 = vmatprep.subr.mxu1 %v10729_v15 }
0x240d   :  { %9802 = vmatmul.mubr.msk.f32.vlgmr.msra.gmra.mrb[58].mxu0 %vm328_vm2, %v4222_v62  ;;  %9807 = vmatmul.mubr.msk.f32.vlgmr.msra.gmra.mrb[52].mxu1 %vm328_vm2, %v4376_v24 }
0x240e   :  { %9810 = vmatpush3.xpose.msk.msra.mxu0 %vm328_vm2, %v4456_v59  ;;  %9811 = vmatprep.mubr.msk.f32.mxu0 %vm10730_vm1, %v10729_v15 }
0x240f   :  { %9819 = vmatprep.subr.mxu0 %v10729_v15  ;;  %9816 = vmatprep.mubr.msk.f32.mxu1 %vm10730_vm1, %v10729_v15 }
0x2411   :  { %9812 = vmatmul.mubr.msk.f32.vlgmr.msra.gmra.mrb[60].mxu0 %vm328_vm2, %v4454_v54 }
0x2412   :  { %9821 = vmatprep.mubr.msk.f32.mxu0 %vm10730_vm1, %v10729_v15 }
0x24dc   :  { %v11616_v27 = vpop.f32.mrb[50].mxu1 }
0x24dd   :  { %v9798_v51 = vpop.f32.mrb[51].mxu1 }
0x24e0   :  { %v11618_v57 = vpop.f32.mrb[58].mxu0  ;;  %v4449_v63 = vpop.f32.mrb[52].mxu1 }
0x24e1   :  { %v10165_v2 = vpack.i.bf16 %v11618_v57, %v11616_v27  ;;  %v4531_v0 = vmul.f32 0.35355338, %v4449_v63  ;;  %v9803_v58 = vpop.f32.mrb[59].mxu0  ;;  %v9808_v3 = vpop.f32.mrb[53].mxu1 }
0x24e3   :  { %v4533_v4 = vadd.f32 %v4531_v0, %v11535_v35 }
0x24e4   :  { %v4527_v29 = vpop.f32.mrb[60].mxu0 }
0x24e5   :  { %v4532_v1 = vmul.f32 0.35355338, %v4527_v29  ;;  %v9813_v6 = vpop.f32.mrb[61].mxu0  ;;  %v4535_v8 = vsel %vm328_vm2, %v4533_v4, -inf }
0x24e6   :  { %4536 = vmax.xlane.f32.xlu1 %v4535_v8 }
0x24e7   :  { %v4534_v11 = vadd.f32 %v4532_v1, %v11539_v55 }
0x24e9   :  { %v4538_v13 = vsel %vm328_vm2, %v4534_v11, -inf }
0x24ea   :  { %4539 = vmax.xlane.f32.xlu0 %v4538_v13 }
0x24f7   :  { %4557 = vrot.lane.b32.xlu1 %v11506_v18, %s10736_s20 }
0x24fb   :  { %4711 = vrot.lane.b32.xlu1 %v11506_v18, %s10740_s27 }
0x24ff   :  { %4789 = vrot.lane.b32.xlu1 %v11513_v23, %s10740_s27 }
0x2500   :  { %4633 = vrot.lane.b32.xlu0 %v11513_v23, %s10736_s20 }
0x2503   :  { %4709 = vrot.lane.b32.xlu1 %v11511_v36, %s10740_s27 }
0x2573   :  { %v4537_v14 = vpop.xlane.xlu1 %4536 }
0x2574   :  { %v4541_v7 = vsub.f32 %v4533_v4, %v4537_v14 }
0x2576   :  { %v4543_v9 = vmul.f32 1.442695, %v4541_v7  ;;  %v10234_v7 = vld [vmem:[%s12284_s10 + $0x48] sm:$0xff]  }
0x2577   :  { %v4558_v16 = vpop.permute.xlu1 %4557  ;;  %v4540_v17 = vpop.xlane.xlu0 %4539 }
0x2578   :  { %10357 = vpow2.f32 %v4543_v9  ;;  %v4542_v19 = vsub.f32 %v4534_v11, %v4540_v17  ;;  %9815 = vmatpush3.msra.mxu1 %v4558_v16 }
0x2579   :  { %9824 = vmatprep.subr.mxu1 %v10729_v15 }
0x257a   :  { %v4545_v20 = vmul.f32 1.442695, %v4542_v19 }
0x257b   :  { %v4634_v21 = vpop.permute.xlu0 %4633  ;;  %v4712_v32 = vpop.permute.xlu1 %4711 }
0x257c   :  { %10359 = vpow2.f32 %v4545_v20  ;;  %9820 = vmatpush3.msra.mxu0 %v4634_v21 }
0x257d   :  { %9829 = vmatprep.subr.mxu0 %v10729_v15 }
0x257f   :  { %v4790_v33 = vpop.permute.xlu1 %4789 }
0x2582   :  { %v10358_v22 = vpop.eup %10357 }
0x2583   :  { %v4547_v26 = vsel %vm328_vm2, %v10358_v22, 0.0 }
0x2584   :  { %4548 = vadd.xlane.f32.xlu0 %v4547_v26 }
0x2586   :  { %v10360_v36 = vpop.eup %10359 }
0x2587   :  { %v4550_v28 = vsel %vm328_vm2, %v10360_v36, 0.0 }
0x2588   :  { %4551 = vadd.xlane.f32.xlu0 %v4550_v28 }
0x259e   :  { %4787 = vrot.lane.b32.xlu0 %v11521_v30, %s10740_s27  ;;  %v4710_v30 = vpop.permute.xlu1 %4709 }
0x2611   :  { %v4549_v12 = vpop.xlane.xlu0 %4548 }
0x2612   :  { %10361 = vrcp.f32 %v4549_v12 }
0x2615   :  { %v4552_v31 = vpop.xlane.xlu0 %4551 }
0x2616   :  { %10363 = vrcp.f32 %v4552_v31 }
0x2619   :  { %v4788_v42 = vpop.permute.xlu0 %4787 }
0x261c   :  { %v10362_v10 = vpop.eup %10361 }
0x261d   :  { %v4554_v37 = vmul.f32 %v10362_v10, %v10358_v22 }
0x261f   :  { %9817 = vmatmul.mubr.msk.f32.vlgmr.msra.gmra.mrb[54].mxu1 %vm328_vm2, %v4554_v37 }
0x2620   :  { %v10364_v40 = vpop.eup %10363  ;;  %9825 = vmatpush3.xpose.msk.msra.mxu1 %vm328_vm2, %v4712_v32  ;;  %9826 = vmatprep.mubr.msk.f32.mxu1 %vm10730_vm1, %v10729_v15 }
0x2621   :  { %v4556_v41 = vmul.f32 %v10364_v40, %v10360_v36  ;;  %9834 = vmatprep.subr.mxu1 %v10729_v15 }
0x2623   :  { %9822 = vmatmul.mubr.msk.f32.vlgmr.msra.gmra.mrb[62].mxu0 %vm328_vm2, %v4556_v41  ;;  %9827 = vmatmul.mubr.msk.f32.vlgmr.msra.gmra.mrb[56].mxu1 %vm328_vm2, %v4710_v30 }
0x2624   :  { %9830 = vmatpush3.xpose.msk.msra.mxu0 %vm328_vm2, %v4790_v33  ;;  %9831 = vmatprep.mubr.msk.f32.mxu0 %vm10730_vm1, %v10729_v15 }
0x2625   :  { %9839 = vmatprep.subr.mxu0 %v10729_v15  ;;  %9836 = vmatprep.mubr.msk.f32.mxu1 %vm10730_vm1, %v10729_v15 }
0x2627   :  { %9832 = vmatmul.mubr.msk.f32.vlgmr.msra.gmra.mrb[64].mxu0 %vm328_vm2, %v4788_v42 }
0x2628   :  { %9841 = vmatprep.mubr.msk.f32.mxu0 %vm10730_vm1, %v10729_v15 }
0x26f2   :  { %v4629_v25 = vpop.f32.mrb[54].mxu1 }
0x26f3   :  { %v9818_v43 = vpop.f32.mrb[55].mxu1 }
0x26f6   :  { %v4705_v44 = vpop.f32.mrb[62].mxu0  ;;  %v4783_v45 = vpop.f32.mrb[56].mxu1 }
0x26f7   :  { %v10170_v46 = vpack.i.bf16 %v4705_v44, %v4629_v25  ;;  %v4865_v48 = vmul.f32 0.35355338, %v4783_v45  ;;  %v9823_v49 = vpop.f32.mrb[63].mxu0  ;;  %v9828_v53 = vpop.f32.mrb[57].mxu1 }
0x26f9   :  { %v4867_v59 = vadd.f32 %v4865_v48, %v11535_v35 }
0x26fa   :  { %v4861_v60 = vpop.f32.mrb[64].mxu0 }
0x26fb   :  { %v4866_v61 = vmul.f32 0.35355338, %v4861_v60  ;;  %v9833_v62 = vpop.f32.mrb[65].mxu0  ;;  %v4869_v24 = vsel %vm328_vm2, %v4867_v59, -inf }
0x26fc   :  { %4870 = vmax.xlane.f32.xlu1 %v4869_v24 }
0x26fd   :  { %v4868_v54 = vadd.f32 %v4866_v61, %v11539_v55 }
0x26ff   :  { %v4872_v51 = vsel %vm328_vm2, %v4868_v54, -inf }
0x2700   :  { %4873 = vmax.xlane.f32.xlu0 %v4872_v51 }
0x270d   :  { %4891 = vrot.lane.b32.xlu1 %v11506_v18, %s10739_s9 }
0x2711   :  { %10166 = vrot.lane.b32.xlu1 %v10165_v2, %s10742_s25 }
0x2715   :  { %10171 = vrot.lane.b32.xlu1 %v10170_v46, %s10720_s22 }
0x2789   :  { %v4871_v35 = vpop.xlane.xlu1 %4870 }
0x278a   :  { %v4875_v63 = vsub.f32 %v4867_v59, %v4871_v35 }
0x278c   :  { %v4877_v0 = vmul.f32 1.442695, %v4875_v63 }
0x278d   :  { %v4892_v58 = vpop.permute.xlu1 %4891  ;;  %v4874_v3 = vpop.xlane.xlu0 %4873 }
0x278e   :  { %10365 = vpow2.f32 %v4877_v0  ;;  %v4876_v55 = vsub.f32 %v4868_v54, %v4874_v3  ;;  %9835 = vmatpush3.msra.mxu1 %v4892_v58  ;;  %v10235_v58 = vld [vmem:[%s12288_s14 + $0x10] sm:$0xff]   ;;  %v10236_v3 = vld [vmem:[%s12288_s14 + $0x18] sm:$0xff]  }
0x278f   :  { %9844 = vmatprep.subr.bf16.mxu1 %v10729_v15 }
0x2790   :  { %v4879_v4 = vmul.f32 1.442695, %v4876_v55  ;;  %v10237_v55 = vld [vmem:[%s12290_s16 + $0x20] sm:$0xff]  }
0x2791   :  { %v10167_v21 = vpop.permute.xlu1 %10166 }
0x2792   :  { %10367 = vpow2.f32 %v4879_v4  ;;  %v10169_v26 = vunpack.i.h.bf16 %v10167_v21  ;;  %v10168_v36 = vunpack.i.l.bf16 %v10167_v21  ;;  %v10238_v4 = vld [vmem:[%s12290_s16 + $0x28] sm:$0xff]   ;;  %v10240_v21 = vld [vmem:[%s12290_s16 + $0x38] sm:$0xff]  }
0x2794   :  { %v5068_v32 = vsel %vm328_vm2, %v11578_v5, %v10169_v26  ;;  %v5067_v10 = vsel %vm328_vm2, %v11576_v39, %v10168_v36  ;;  %v9147_v5 = vld [vmem:[#allocation11 + $0x4] ss:$0 sm:$0xff] }
0x2795   :  { %v10172_v22 = vpop.permute.xlu1 %10171 }
0x2796   :  { %v10174_v28 = vunpack.i.h.bf16 %v10172_v22  ;;  %v10173_v12 = vunpack.i.l.bf16 %v10172_v22  ;;  %v9157_v22 = vld [vmem:[#allocation16 + $0x1] ss:$0 sm:$0xff] }
0x2798   :  { %v10366_v18 = vpop.eup %10365  ;;  %v5070_v40 = vsel %vm1698_vm3, %v5068_v32, %v10174_v28  ;;  %v5069_v41 = vsel %vm1698_vm3, %v5067_v10, %v10173_v12 }
0x2799   :  { %v4881_v29 = vsel %vm328_vm2, %v10366_v18, 0.0 }
0x279a   :  { %4882 = vadd.xlane.f32.xlu0 %v4881_v29 }
0x279c   :  { %v10368_v27 = vpop.eup %10367 }
0x279d   :  { %v4884_v57 = vsel %vm328_vm2, %v10368_v27, 0.0 }
0x279e   :  { %4885 = vadd.xlane.f32.xlu0 %v4884_v57 }
0x27b4   :  { %4967 = vrot.lane.b32.xlu0 %v11513_v23, %s10739_s9  ;;  %v10233_v23 = vld [vmem:[%s12284_s10 + $0x40] sm:$0xff]  }
0x2827   :  { %v4883_v2 = vpop.xlane.xlu0 %4882 }
0x2828   :  { %10369 = vrcp.f32 %v4883_v2 }
0x282b   :  { %v4886_v1 = vpop.xlane.xlu0 %4885 }
0x282c   :  { %10371 = vrcp.f32 %v4886_v1 }
0x282f   :  { %v4968_v6 = vpop.permute.xlu0 %4967 }
0x2830   :  { %9840 = vmatpush3.msra.mxu0 %v4968_v6 }
0x2831   :  { %9852 = vmatprep.subr.bf16.mxu0 %v10729_v15 }
0x2832   :  { %v10370_v8 = vpop.eup %10369 }
0x2833   :  { %v4888_v11 = vmul.f32 %v10370_v8, %v10366_v18 }
0x2835   :  { %9837 = vmatmul.mubr.msk.f32.vlgmr.msra.gmra.mrb[58].mxu1 %vm328_vm2, %v4888_v11  ;;  %v9151_v11 = vld [vmem:[#allocation13 + $0x1] ss:$0 sm:$0xff] }
0x2836   :  { %v10372_v13 = vpop.eup %10371  ;;  %9848 = vmatprep.mubr.msk.bf16.mxu1 %vm10730_vm1, %v10729_v15  ;;  %9845 = vmatpush3.bf16.msra.mxu1 %v10233_v23 }
0x2837   :  { %v4890_v14 = vmul.f32 %v10372_v13, %v10368_v27  ;;  %9846 = vmatprep.subr.bf16.mxu1 %v10729_v15 }
0x2839   :  { %9842 = vmatmul.mubr.msk.f32.vlgmr.msra.gmra.mrb[66].mxu0 %vm328_vm2, %v4890_v14 }
0x283a   :  { %9856 = vmatprep.mubr.msk.bf16.mxu0 %vm10730_vm1, %v10729_v15  ;;  %9847 = vmatpush3.bf16.msra.mxu1 %v10234_v7  ;;  %v9152_v7 = vld [vmem:[#allocation14 + $0x1] ss:$0 sm:$0xff] }
0x283b   :  { %9860 = vmatprep.subr.bf16.mxu1 %v10729_v15  ;;  %9853 = vmatpush3.bf16.msra.mxu0 %v10235_v58 }
0x283c   :  { %9854 = vmatprep.subr.bf16.mxu0 %v10729_v15 }
0x283f   :  { %9855 = vmatpush3.bf16.msra.mxu0 %v10236_v3 }
0x2840   :  { %9872 = vmatprep.subr.bf16.mxu0 %v10729_v15 }
0x2908   :  { %v4963_v9 = vpop.f32.mrb[58].mxu1 }
0x2909   :  { %v9838_v16 = vpop.f32.mrb[59].mxu1 }
0x290c   :  { %v5039_v17 = vpop.f32.mrb[66].mxu0 }
0x290d   :  { %v10175_v19 = vpack.i.bf16 %v5039_v17, %v4963_v9  ;;  %v9843_v20 = vpop.f32.mrb[67].mxu0 }
0x290e   :  { %v10239_v20 = vld [vmem:[%s12290_s16 + $0x30] sm:$0xff]  }
0x290f   :  { %10176 = vrot.lane.b32.xlu1 %v10175_v19, %s10743_s6 }
0x2981   :  { %v10177_v31 = vpop.permute.xlu1 %10176 }
0x2982   :  { %v10179_v33 = vunpack.i.h.bf16 %v10177_v31  ;;  %v10178_v37 = vunpack.i.l.bf16 %v10177_v31 }
0x2984   :  { %v5072_v30 = vsel %vm1701_vm4, %v5070_v40, %v10179_v33  ;;  %v5071_v42 = vsel %vm1701_vm4, %v5069_v41, %v10178_v37  ;;  %v9169_v40 = vld [vmem:[#allocation17 + $0x1] ss:$0 sm:$0xff] }
0x2985   :  { %v5073_v25 = vpack.c.bf16 %v5072_v30, %v5071_v42 }
0x2987   :  { %9849 = vmatmul.mubr.msk.bf16.vlgmr.msra.gmra.mrb[60].mxu1 %vm213_vm0, %v5073_v25 }
0x2988   :  { %9868 = vmatprep.mubr.msk.bf16.mxu1 %vm10730_vm1, %v10729_v15  ;;  %9861 = vmatpush3.bf16.msra.mxu1 %v10237_v55 }
0x2989   :  { %9862 = vmatprep.subr.bf16.mxu1 %v10729_v15 }
0x298c   :  { %9863 = vmatpush3.bf16.msra.mxu1 %v10238_v4 }
0x298d   :  { %9864 = vmatprep.subr.bf16.mxu1 %v10729_v15 }
0x2990   :  { %9865 = vmatpush3.bf16.msra.mxu1 %v10239_v20 }
0x2991   :  { %9866 = vmatprep.subr.bf16.mxu1 %v10729_v15 }
0x2994   :  { %9867 = vmatpush3.bf16.msra.mxu1 %v10240_v21 }
0x2995   :  { %9890 = vmatprep.subr.mxu1 %v10729_v15 }
0x2a5a   :  { %v5136_v43 = vpop.f32.mrb[60].mxu1 }
0x2a5b   :  { %v5137_v44 = vadd.f32 %v9147_v5, %v5136_v43  ;;  %v9850_v39 = vpop.f32.mrb[61].mxu1 }
0x2a5c   :  { %v5139_v45 = vpop.f32.mrb[62].mxu1 }
0x2a5d   :  { %v11702_v46 = vadd.f32 %v5137_v44, %v11468_v34  ;;  %v5140_v48 = vadd.f32 %v9147_v5, %v5139_v45  ;;  %v9851_v49 = vpop.f32.mrb[63].mxu1 }
0x2a5f   :  { %v11705_v53 = vadd.f32 %v5140_v48, %v11471_v38  ;;  %v5149_v59 = vsel %vm213_vm0, %v11702_v46, 0.0 }
0x2a60   :  { %5150 = vadd.xlane.f32.xlu0 %v5149_v59 }
0x2a61   :  { %v5152_v60 = vsel %vm213_vm0, %v11705_v53, 0.0 }
0x2a62   :  { %5153 = vadd.xlane.f32.xlu1 %v5152_v60 }
0x2aed   :  { %v5151_v61 = vpop.xlane.xlu0 %5150 }
0x2aee   :  { %v5155_v62 = vmul.f32 0.03125, %v5151_v61 }
0x2aef   :  { %v5154_v24 = vpop.xlane.xlu1 %5153 }
0x2af0   :  { %v5157_v54 = vsub.f32 %v11702_v46, %v5155_v62  ;;  %v5156_v34 = vmul.f32 0.03125, %v5154_v24 }
0x2af2   :  { %v5158_v51 = vsub.f32 %v11705_v53, %v5156_v34  ;;  %v5159_v35 = vmul.f32 %v5157_v54, %v5157_v54 }
0x2af4   :  { %v5161_v38 = vsel %vm213_vm0, %v5159_v35, 0.0  ;;  %v5160_v63 = vmul.f32 %v5158_v51, %v5158_v51 }
0x2af5   :  { %5162 = vadd.xlane.f32.xlu0 %v5161_v38  ;;  %v10241_v38 = vld [vmem:[%s12282_s8 + $0x20] sm:$0xff]  }
0x2af6   :  { %v5164_v0 = vsel %vm213_vm0, %v5160_v63, 0.0  ;;  %v10242_v63 = vld [vmem:[%s12282_s8 + $0x28] sm:$0xff]  }
0x2af9   :  { %5165 = vadd.xlane.f32.xlu0 %v5164_v0 }
0x2b82   :  { %v5163_v18 = vpop.xlane.xlu0 %5162 }
0x2b83   :  { %v5167_v29 = vmul.f32 0.03125, %v5163_v18 }
0x2b85   :  { %v5169_v27 = vadd.f32 1e-06, %v5167_v29 }
0x2b86   :  { %v5166_v57 = vpop.xlane.xlu0 %5165 }
0x2b87   :  { %10373 = vrsqrt.f32 %v5169_v27  ;;  %v5168_v2 = vmul.f32 0.03125, %v5166_v57  ;;  %v9175_v27 = vld [vmem:[#allocation7 + $0x2] ss:$0 sm:$0xff] }
0x2b89   :  { %v5170_v1 = vadd.f32 1e-06, %v5168_v2 }
0x2b8b   :  { %10375 = vrsqrt.f32 %v5170_v1 }
0x2b91   :  { %v10374_v6 = vpop.eup %10373 }
0x2b92   :  { %v5173_v8 = vmul.f32 %v10374_v6, %v5157_v54 }
0x2b94   :  { %v5181_v14 = vmul.f32 %v9151_v11, %v5173_v8  ;;  %v9176_v8 = vld [vmem:[#allocation8 + $0x2] ss:$0 sm:$0xff] }
0x2b95   :  { %v10376_v13 = vpop.eup %10375 }
0x2b96   :  { %v5174_v23 = vmul.f32 %v10376_v13, %v5158_v51  ;;  %v5189_v16 = vadd.f32 %v9152_v7, %v5181_v14 }
0x2b98   :  { %v5182_v9 = vmul.f32 %v9151_v11, %v5174_v23 }
0x2b9a   :  { %v5190_v17 = vadd.f32 %v9152_v7, %v5182_v9  ;;  %v9181_v7 = vld [vmem:[#allocation10 + $0x2] ss:$0 sm:$0xff] }
0x2b9c   :  { %v5191_v19 = vpack.c.bf16 %v5190_v17, %v5189_v16 }
0x2b9e   :  { %9857 = vmatmul.mubr.msk.bf16.vlgmr.msra.gmra.mrb[68].mxu0 %vm213_vm0, %v5191_v19 }
0x2b9f   :  { %9876 = vmatprep.mubr.msk.bf16.mxu0 %vm10730_vm1, %v10729_v15  ;;  %9873 = vmatpush3.bf16.msra.mxu0 %v10241_v38 }
0x2ba0   :  { %9874 = vmatprep.subr.bf16.mxu0 %v10729_v15 }
0x2ba3   :  { %9875 = vmatpush3.bf16.msra.mxu0 %v10242_v63 }
0x2ba4   :  { %9880 = vmatprep.subr.mxu0 %v10729_v15 }
0x2c71   :  { %v5254_v26 = vpop.f32.mrb[68].mxu0 }
0x2c72   :  { %v5255_v36 = vadd.f32 %v9157_v22, %v5254_v26  ;;  %v9858_v28 = vpop.f32.mrb[69].mxu0 }
0x2c73   :  { %v5257_v12 = vpop.f32.mrb[70].mxu0 }
0x2c74   :  { %v5258_v31 = vadd.f32 %v9157_v22, %v5257_v12  ;;  %v9859_v32 = vpop.f32.mrb[71].mxu0  ;;  %v5261_v10 = vmax.f32 %v5255_v36, 0.0 }
0x2c76   :  { %v5262_v33 = vmax.f32 %v5258_v31, 0.0 }
0x2c78   :  { %v5263_v37 = vpack.c.bf16 %v5262_v33, %v5261_v10 }
0x2c7a   :  { %9869 = vmatmul.mubr.msk.bf16.vlgmr.msra.gmra.mrb[64].mxu1 %vm1928_vm5, %v5263_v37 }
0x2c7b   :  { %9892 = vmatprep.mubr.msk.f32.mxu1 %vm10730_vm1, %v10729_v15 }
0x2d4d   :  { %v5342_v41 = vpop.f32.mrb[64].mxu1 }
0x2d4e   :  { %v5343_v30 = vadd.f32 %v9169_v40, %v5342_v41  ;;  %v9870_v42 = vpop.f32.mrb[65].mxu1 }
0x2d4f   :  { %v5345_v25 = vpop.f32.mrb[66].mxu1 }
0x2d50   :  { %v5349_v5 = vadd.f32 %v5343_v30, %v11702_v46  ;;  %v5346_v43 = vadd.f32 %v9169_v40, %v5345_v25  ;;  %v9871_v44 = vpop.f32.mrb[67].mxu1 }
0x2d52   :  { %v11746_v39 = vmax.f32 %v5349_v5, 0.0  ;;  %v5350_v45 = vadd.f32 %v5346_v43, %v11705_v53 }
0x2d54   :  { %v11749_v48 = vmax.f32 %v5350_v45, 0.0  ;;  %v5357_v49 = vsel %vm213_vm0, %v11746_v39, 0.0 }
0x2d55   :  { %5358 = vadd.xlane.f32.xlu0 %v5357_v49 }
0x2d56   :  { %v5360_v59 = vsel %vm213_vm0, %v11749_v48, 0.0 }
0x2d57   :  { %5361 = vadd.xlane.f32.xlu1 %v5360_v59 }
0x2de2   :  { %v5359_v60 = vpop.xlane.xlu0 %5358 }
0x2de3   :  { %v5363_v61 = vmul.f32 0.03125, %v5359_v60 }
0x2de4   :  { %v5362_v62 = vpop.xlane.xlu1 %5361 }
0x2de5   :  { %v5365_v46 = vsub.f32 %v11746_v39, %v5363_v61  ;;  %v5364_v24 = vmul.f32 0.03125, %v5362_v62 }
0x2de7   :  { %v5366_v54 = vsub.f32 %v11749_v48, %v5364_v24  ;;  %v5367_v34 = vmul.f32 %v5365_v46, %v5365_v46 }
0x2de9   :  { %v5369_v53 = vsel %vm213_vm0, %v5367_v34, 0.0  ;;  %v5368_v51 = vmul.f32 %v5366_v54, %v5366_v54 }
0x2dea   :  { %5370 = vadd.xlane.f32.xlu0 %v5369_v53 }
0x2deb   :  { %v5372_v35 = vsel %vm213_vm0, %v5368_v51, 0.0 }
0x2dec   :  { %5373 = vadd.xlane.f32.xlu1 %v5372_v35 }
0x2e77   :  { %v5371_v0 = vpop.xlane.xlu0 %5370 }
0x2e78   :  { %v5375_v58 = vmul.f32 0.03125, %v5371_v0 }
0x2e79   :  { %v5374_v3 = vpop.xlane.xlu1 %5373 }
0x2e7a   :  { %v5377_v55 = vadd.f32 1e-06, %v5375_v58  ;;  %v5376_v4 = vmul.f32 0.03125, %v5374_v3 }
0x2e7c   :  { %10377 = vrsqrt.f32 %v5377_v55  ;;  %v5378_v18 = vadd.f32 1e-06, %v5376_v4 }
0x2e7e   :  { %10379 = vrsqrt.f32 %v5378_v18 }
0x2e86   :  { %v10378_v29 = vpop.eup %10377 }
0x2e87   :  { %v5381_v57 = vmul.f32 %v10378_v29, %v5365_v46 }
0x2e88   :  { %v10380_v2 = vpop.eup %10379 }
0x2e89   :  { %v5389_v1 = vmul.f32 %v9175_v27, %v5381_v57  ;;  %v5382_v6 = vmul.f32 %v10380_v2, %v5366_v54 }
0x2e8b   :  { %v5390_v11 = vmul.f32 %v9175_v27, %v5382_v6  ;;  %v5397_v13 = vadd.f32 %v9176_v8, %v5389_v1 }
0x2e8d   :  { %v5398_v14 = vadd.f32 %v9176_v8, %v5390_v11 }
0x2e8f   :  { %v5406_v23 = vpack.c.bf16 %v5398_v14, %v5397_v13 }
0x2e91   :  { %9877 = vmatmul.mubr.msk.bf16.vlgmr.msra.gmra.mrb[72].mxu0 %vm213_vm0, %v5406_v23 }
0x2e92   :  { %9882 = vmatprep.mubr.msk.f32.mxu0 %vm10730_vm1, %v10729_v15 }
0x2f64   :  { %v5462_v9 = vpop.f32.mrb[72].mxu0 }
0x2f65   :  { %v11770_v16 = vadd.f32 %v9181_v7, %v5462_v9  ;;  %v9878_v17 = vpop.f32.mrb[73].mxu0 }
0x2f66   :  { %v5465_v19 = vpop.f32.mrb[74].mxu0 }
0x2f67   :  { %v11772_v20 = vadd.f32 %v9181_v7, %v5465_v19  ;;  %5470 = vrot.lane.b32.xlu0 %v11770_v16, %s10731_s12  ;;  %v9879_v21 = vpop.f32.mrb[75].mxu0 }
0x2f69   :  { %5547 = vrot.lane.b32.xlu1 %v11772_v20, %s10731_s12 }
0x2fd9   :  { %v5471_v22 = vpop.permute.xlu0 %5470 }
0x2fda   :  { %9881 = vmatpush3.xpose.msk.msra.mxu0 %vm328_vm2, %v5471_v22 }
0x2fdb   :  { %9885 = vmatprep.subr.mxu0 %v10729_v15  ;;  %v5548_v26 = vpop.permute.xlu1 %5547 }
0x2fdd   :  { %9883 = vmatmul.mubr.msk.f32.vlgmr.msra.gmra.mrb[76].mxu0 %vm328_vm2, %v11770_v16 }
0x2fde   :  { %9886 = vmatpush3.xpose.msk.msra.mxu0 %vm328_vm2, %v5548_v26  ;;  %9887 = vmatprep.mubr.msk.f32.mxu0 %vm10730_vm1, %v10729_v15 }
0x2fdf   :  { %9895 = vmatprep.subr.mxu0 %v10729_v15 }
0x2fe1   :  { %9888 = vmatmul.mubr.msk.f32.vlgmr.msra.gmra.mrb[78].mxu0 %vm328_vm2, %v11772_v20 }
0x2fe2   :  { %9897 = vmatprep.mubr.msk.f32.mxu0 %vm10730_vm1, %v10729_v15 }
0x30b0   :  { %v5542_v36 = vpop.f32.mrb[76].mxu0 }
0x30b1   :  { %v5623_v28 = vmul.f32 0.35355338, %v5542_v36  ;;  %v9884_v12 = vpop.f32.mrb[77].mxu0 }
0x30b3   :  { %v5625_v31 = vadd.f32 %v5623_v28, %v11051_v52 }
0x30b4   :  { %v5619_v32 = vpop.f32.mrb[78].mxu0 }
0x30b5   :  { %v5624_v10 = vmul.f32 0.35355338, %v5619_v32  ;;  %v9889_v33 = vpop.f32.mrb[79].mxu0  ;;  %v5627_v37 = vsel %vm328_vm2, %v5625_v31, -inf }
0x30b6   :  { %5628 = vmax.xlane.f32.xlu1 %v5627_v37 }
0x30b7   :  { %v5626_v40 = vadd.f32 %v5624_v10, %v11054_v56 }
0x30b9   :  { %v5630_v41 = vsel %vm328_vm2, %v5626_v40, -inf }
0x30ba   :  { %5631 = vmax.xlane.f32.xlu0 %v5630_v41 }
0x30c7   :  { %5725 = vrot.lane.b32.xlu1 %v11772_v20, %s10732_s0 }
0x30cb   :  { %5803 = vrot.lane.b32.xlu1 %v11770_v16, %s10733_s1 }
0x30cf   :  { %5881 = vrot.lane.b32.xlu1 %v11772_v20, %s10733_s1 }
0x30d0   :  { %5649 = vrot.lane.b32.xlu0 %v11770_v16, %s10732_s0 }
0x3143   :  { %v5629_v30 = vpop.xlane.xlu1 %5628 }
0x3144   :  { %v5633_v42 = vsub.f32 %v5625_v31, %v5629_v30 }
0x3146   :  { %v5635_v25 = vmul.f32 1.442695, %v5633_v42 }
0x3147   :  { %v5726_v5 = vpop.permute.xlu1 %5725  ;;  %v5632_v43 = vpop.xlane.xlu0 %5631 }
0x3148   :  { %10381 = vpow2.f32 %v5635_v25  ;;  %v5634_v44 = vsub.f32 %v5626_v40, %v5632_v43  ;;  %9896 = vmatpush3.msra.mxu0 %v5726_v5 }
0x3149   :  { %9905 = vmatprep.subr.mxu0 %v10729_v15 }
0x314a   :  { %v5637_v45 = vmul.f32 1.442695, %v5634_v44 }
0x314b   :  { %v5650_v49 = vpop.permute.xlu0 %5649  ;;  %v5804_v46 = vpop.permute.xlu1 %5803 }
0x314c   :  { %10383 = vpow2.f32 %v5637_v45  ;;  %9891 = vmatpush3.msra.mxu1 %v5650_v49 }
0x314d   :  { %9900 = vmatprep.subr.mxu1 %v10729_v15 }
0x314f   :  { %v5882_v24 = vpop.permute.xlu1 %5881 }
0x3152   :  { %v10382_v59 = vpop.eup %10381 }
0x3153   :  { %v5639_v60 = vsel %vm328_vm2, %v10382_v59, 0.0 }
0x3154   :  { %5640 = vadd.xlane.f32.xlu0 %v5639_v60 }
0x3156   :  { %v10384_v61 = vpop.eup %10383 }
0x3157   :  { %v5642_v62 = vsel %vm328_vm2, %v10384_v61, 0.0 }
0x3158   :  { %5643 = vadd.xlane.f32.xlu1 %v5642_v62 }
0x3169   :  { %5879 = vrot.lane.b32.xlu1 %v11772_v20, %s10734_s13 }
0x316a   :  { %5801 = vrot.lane.b32.xlu0 %v11770_v16, %s10734_s13 }
0x31e1   :  { %v5641_v54 = vpop.xlane.xlu0 %5640 }
0x31e2   :  { %10385 = vrcp.f32 %v5641_v54 }
0x31e5   :  { %v5644_v34 = vpop.xlane.xlu1 %5643  ;;  %v5802_v63 = vpop.permute.xlu0 %5801 }
0x31e6   :  { %10387 = vrcp.f32 %v5644_v34 }
0x31e9   :  { %v5880_v0 = vpop.permute.xlu1 %5879 }
0x31ec   :  { %v10386_v53 = vpop.eup %10385 }
0x31ed   :  { %v5646_v51 = vmul.f32 %v10386_v53, %v10382_v59 }
0x31ef   :  { %9893 = vmatmul.mubr.msk.f32.vlgmr.msra.gmra.mrb[68].mxu1 %vm328_vm2, %v5646_v51 }
0x31f0   :  { %v10388_v35 = vpop.eup %10387  ;;  %9901 = vmatpush3.xpose.msk.msra.mxu1 %vm328_vm2, %v5804_v46  ;;  %9902 = vmatprep.mubr.msk.f32.mxu1 %vm10730_vm1, %v10729_v15 }
0x31f1   :  { %v5648_v38 = vmul.f32 %v10388_v35, %v10384_v61  ;;  %9910 = vmatprep.subr.mxu1 %v10729_v15 }
0x31f3   :  { %9898 = vmatmul.mubr.msk.f32.vlgmr.msra.gmra.mrb[80].mxu0 %vm328_vm2, %v5648_v38  ;;  %9903 = vmatmul.mubr.msk.f32.vlgmr.msra.gmra.mrb[70].mxu1 %vm328_vm2, %v5802_v63 }
0x31f4   :  { %9906 = vmatpush3.xpose.msk.msra.mxu0 %vm328_vm2, %v5882_v24  ;;  %9907 = vmatprep.mubr.msk.f32.mxu0 %vm10730_vm1, %v10729_v15 }
0x31f5   :  { %9915 = vmatprep.subr.mxu0 %v10729_v15  ;;  %9912 = vmatprep.mubr.msk.f32.mxu1 %vm10730_vm1, %v10729_v15 }
0x31f7   :  { %9908 = vmatmul.mubr.msk.f32.vlgmr.msra.gmra.mrb[82].mxu0 %vm328_vm2, %v5880_v0 }
0x31f8   :  { %9917 = vmatprep.mubr.msk.f32.mxu0 %vm10730_vm1, %v10729_v15 }
0x32c2   :  { %v11826_v58 = vpop.f32.mrb[68].mxu1 }
0x32c3   :  { %v9894_v3 = vpop.f32.mrb[69].mxu1 }
0x32c6   :  { %v11828_v55 = vpop.f32.mrb[80].mxu0  ;;  %v5875_v4 = vpop.f32.mrb[70].mxu1 }
0x32c7   :  { %v5957_v18 = vmul.f32 0.35355338, %v5875_v4  ;;  %v9899_v29 = vpop.f32.mrb[81].mxu0  ;;  %v9904_v27 = vpop.f32.mrb[71].mxu1 }
0x32c9   :  { %v5959_v57 = vadd.f32 %v5957_v18, %v11051_v52 }
0x32ca   :  { %v5953_v2 = vpop.f32.mrb[82].mxu0 }
0x32cb   :  { %v5958_v1 = vmul.f32 0.35355338, %v5953_v2  ;;  %v9909_v6 = vpop.f32.mrb[83].mxu0  ;;  %v5961_v8 = vsel %vm328_vm2, %v5959_v57, -inf }
0x32cc   :  { %5962 = vmax.xlane.f32.xlu0 %v5961_v8 }
0x32cd   :  { %v5960_v11 = vadd.f32 %v5958_v1, %v11054_v56 }
0x32cf   :  { %v5964_v13 = vsel %vm328_vm2, %v5960_v11, -inf }
0x32d0   :  { %5965 = vmax.xlane.f32.xlu1 %v5964_v13 }
0x32e1   :  { %6059 = vrot.lane.b32.xlu1 %v11772_v20, %s10735_s23 }
0x32e2   :  { %5983 = vrot.lane.b32.xlu0 %v11770_v16, %s10735_s23 }
0x32e5   :  { %6137 = vrot.lane.b32.xlu1 %v11770_v16, %s10736_s20 }
0x32e9   :  { %6215 = vrot.lane.b32.xlu1 %v11772_v20, %s10736_s20 }
0x32ed   :  { %6213 = vrot.lane.b32.xlu1 %v11772_v20, %s10737_s11 }
0x3359   :  { %v5963_v14 = vpop.xlane.xlu0 %5962 }
0x335a   :  { %v5967_v23 = vsub.f32 %v5959_v57, %v5963_v14 }
0x335c   :  { %v5969_v7 = vmul.f32 1.442695, %v5967_v23 }
0x335d   :  { %v5984_v9 = vpop.permute.xlu0 %5983  ;;  %v5966_v17 = vpop.xlane.xlu1 %5965 }
0x335e   :  { %10389 = vpow2.f32 %v5969_v7  ;;  %v5968_v19 = vsub.f32 %v5960_v11, %v5966_v17  ;;  %9911 = vmatpush3.msra.mxu1 %v5984_v9 }
0x335f   :  { %9920 = vmatprep.subr.mxu1 %v10729_v15 }
0x3360   :  { %v5971_v21 = vmul.f32 1.442695, %v5968_v19 }
0x3361   :  { %v6060_v22 = vpop.permute.xlu1 %6059 }
0x3362   :  { %10391 = vpow2.f32 %v5971_v21  ;;  %9916 = vmatpush3.msra.mxu0 %v6060_v22 }
0x3363   :  { %9925 = vmatprep.subr.mxu0 %v10729_v15 }
0x3365   :  { %v6138_v10 = vpop.permute.xlu1 %6137 }
0x3368   :  { %v10390_v26 = vpop.eup %10389 }
0x3369   :  { %v5973_v36 = vsel %vm328_vm2, %v10390_v26, 0.0  ;;  %v6216_v41 = vpop.permute.xlu1 %6215 }
0x336a   :  { %5974 = vadd.xlane.f32.xlu0 %v5973_v36 }
0x336c   :  { %v10392_v28 = vpop.eup %10391 }
0x336d   :  { %v5976_v12 = vsel %vm328_vm2, %v10392_v28, 0.0  ;;  %v6214_v25 = vpop.permute.xlu1 %6213 }
0x336e   :  { %5977 = vadd.xlane.f32.xlu0 %v5976_v12 }
0x3384   :  { %6135 = vrot.lane.b32.xlu0 %v11770_v16, %s10737_s11 }
0x33f7   :  { %v5975_v31 = vpop.xlane.xlu0 %5974 }
0x33f8   :  { %10393 = vrcp.f32 %v5975_v31 }
0x33fb   :  { %v5978_v32 = vpop.xlane.xlu0 %5977 }
0x33fc   :  { %10395 = vrcp.f32 %v5978_v32 }
0x33ff   :  { %v6136_v42 = vpop.permute.xlu0 %6135 }
0x3402   :  { %v10394_v33 = vpop.eup %10393 }
0x3403   :  { %v5980_v37 = vmul.f32 %v10394_v33, %v10390_v26 }
0x3405   :  { %9913 = vmatmul.mubr.msk.f32.vlgmr.msra.gmra.mrb[72].mxu1 %vm328_vm2, %v5980_v37 }
0x3406   :  { %v10396_v40 = vpop.eup %10395  ;;  %9921 = vmatpush3.xpose.msk.msra.mxu1 %vm328_vm2, %v6138_v10  ;;  %9922 = vmatprep.mubr.msk.f32.mxu1 %vm10730_vm1, %v10729_v15 }
0x3407   :  { %v5982_v30 = vmul.f32 %v10396_v40, %v10392_v28  ;;  %9930 = vmatprep.subr.mxu1 %v10729_v15 }
0x3409   :  { %9918 = vmatmul.mubr.msk.f32.vlgmr.msra.gmra.mrb[84].mxu0 %vm328_vm2, %v5982_v30  ;;  %9923 = vmatmul.mubr.msk.f32.vlgmr.msra.gmra.mrb[74].mxu1 %vm328_vm2, %v6136_v42 }
0x340a   :  { %9926 = vmatpush3.xpose.msk.msra.mxu0 %vm328_vm2, %v6216_v41  ;;  %9927 = vmatprep.mubr.msk.f32.mxu0 %vm10730_vm1, %v10729_v15 }
0x340b   :  { %9935 = vmatprep.subr.mxu0 %v10729_v15  ;;  %9932 = vmatprep.mubr.msk.f32.mxu1 %vm10730_vm1, %v10729_v15 }
0x340d   :  { %9928 = vmatmul.mubr.msk.f32.vlgmr.msra.gmra.mrb[86].mxu0 %vm328_vm2, %v6214_v25 }
0x340e   :  { %9937 = vmatprep.mubr.msk.f32.mxu0 %vm10730_vm1, %v10729_v15 }
0x34d8   :  { %v11866_v5 = vpop.f32.mrb[72].mxu1 }
0x34d9   :  { %v9914_v43 = vpop.f32.mrb[73].mxu1 }
0x34dc   :  { %v11868_v44 = vpop.f32.mrb[84].mxu0  ;;  %v6209_v45 = vpop.f32.mrb[74].mxu1 }
0x34dd   :  { %v10180_v49 = vpack.i.bf16 %v11868_v44, %v11866_v5  ;;  %v6291_v59 = vmul.f32 0.35355338, %v6209_v45  ;;  %v9919_v60 = vpop.f32.mrb[85].mxu0  ;;  %v9924_v61 = vpop.f32.mrb[75].mxu1 }
0x34df   :  { %v6293_v62 = vadd.f32 %v6291_v59, %v11051_v52 }
0x34e0   :  { %v6287_v46 = vpop.f32.mrb[86].mxu0 }
0x34e1   :  { %v6292_v24 = vmul.f32 0.35355338, %v6287_v46  ;;  %v9929_v54 = vpop.f32.mrb[87].mxu0  ;;  %v6295_v34 = vsel %vm328_vm2, %v6293_v62, -inf }
0x34e2   :  { %6296 = vmax.xlane.f32.xlu0 %v6295_v34 }
0x34e3   :  { %v6294_v53 = vadd.f32 %v6292_v24, %v11054_v56 }
0x34e5   :  { %v6298_v51 = vsel %vm328_vm2, %v6294_v53, -inf }
0x34e6   :  { %6299 = vmax.xlane.f32.xlu1 %v6298_v51 }
0x34f7   :  { %6393 = vrot.lane.b32.xlu1 %v11772_v20, %s10738_s5 }
0x34f8   :  { %6317 = vrot.lane.b32.xlu0 %v11770_v16, %s10738_s5 }
0x34fb   :  { %6471 = vrot.lane.b32.xlu1 %v11770_v16, %s10739_s9 }
0x34ff   :  { %6549 = vrot.lane.b32.xlu1 %v11772_v20, %s10739_s9 }
0x3503   :  { %6547 = vrot.lane.b32.xlu1 %v11772_v20, %s10740_s27 }
0x356f   :  { %v6297_v35 = vpop.xlane.xlu0 %6296 }
0x3570   :  { %v6301_v38 = vsub.f32 %v6293_v62, %v6297_v35 }
0x3572   :  { %v6303_v63 = vmul.f32 1.442695, %v6301_v38  ;;  %v10244_v38 = vld [vmem:[%s12284_s10 + $0x28] sm:$0xff]  }
0x3573   :  { %v6318_v0 = vpop.permute.xlu0 %6317  ;;  %v6300_v3 = vpop.xlane.xlu1 %6299 }
0x3574   :  { %10397 = vpow2.f32 %v6303_v63  ;;  %v6302_v4 = vsub.f32 %v6294_v53, %v6300_v3  ;;  %9931 = vmatpush3.msra.mxu1 %v6318_v0 }
0x3575   :  { %9940 = vmatprep.subr.mxu1 %v10729_v15 }
0x3576   :  { %v6305_v18 = vmul.f32 1.442695, %v6302_v4 }
0x3577   :  { %v6394_v29 = vpop.permute.xlu1 %6393 }
0x3578   :  { %10399 = vpow2.f32 %v6305_v18  ;;  %9936 = vmatpush3.msra.mxu0 %v6394_v29 }
0x3579   :  { %9945 = vmatprep.subr.mxu0 %v10729_v15 }
0x357b   :  { %v6472_v11 = vpop.permute.xlu1 %6471 }
0x357e   :  { %v10398_v27 = vpop.eup %10397 }
0x357f   :  { %v6307_v57 = vsel %vm328_vm2, %v10398_v27, 0.0  ;;  %v6550_v7 = vpop.permute.xlu1 %6549 }
0x3580   :  { %6308 = vadd.xlane.f32.xlu0 %v6307_v57 }
0x3582   :  { %v10400_v2 = vpop.eup %10399 }
0x3583   :  { %v6310_v1 = vsel %vm328_vm2, %v10400_v2, 0.0  ;;  %v6548_v19 = vpop.permute.xlu1 %6547 }
0x3584   :  { %6311 = vadd.xlane.f32.xlu0 %v6310_v1 }
0x359a   :  { %6469 = vrot.lane.b32.xlu0 %v11770_v16, %s10740_s27 }
0x360d   :  { %v6309_v6 = vpop.xlane.xlu0 %6308 }
0x360e   :  { %10401 = vrcp.f32 %v6309_v6 }
0x3611   :  { %v6312_v8 = vpop.xlane.xlu0 %6311 }
0x3612   :  { %10403 = vrcp.f32 %v6312_v8 }
0x3615   :  { %v6470_v17 = vpop.permute.xlu0 %6469 }
0x3618   :  { %v10402_v13 = vpop.eup %10401 }
0x3619   :  { %v6314_v14 = vmul.f32 %v10402_v13, %v10398_v27 }
0x361b   :  { %9933 = vmatmul.mubr.msk.f32.vlgmr.msra.gmra.mrb[76].mxu1 %vm328_vm2, %v6314_v14 }
0x361c   :  { %v10404_v23 = vpop.eup %10403  ;;  %9941 = vmatpush3.xpose.msk.msra.mxu1 %vm328_vm2, %v6472_v11  ;;  %9942 = vmatprep.mubr.msk.f32.mxu1 %vm10730_vm1, %v10729_v15 }
0x361d   :  { %v6316_v9 = vmul.f32 %v10404_v23, %v10400_v2  ;;  %9950 = vmatprep.subr.mxu1 %v10729_v15 }
0x361f   :  { %9938 = vmatmul.mubr.msk.f32.vlgmr.msra.gmra.mrb[88].mxu0 %vm328_vm2, %v6316_v9  ;;  %9943 = vmatmul.mubr.msk.f32.vlgmr.msra.gmra.mrb[78].mxu1 %vm328_vm2, %v6470_v17 }
0x3620   :  { %9946 = vmatpush3.xpose.msk.msra.mxu0 %vm328_vm2, %v6550_v7  ;;  %9947 = vmatprep.mubr.msk.f32.mxu0 %vm10730_vm1, %v10729_v15 }
0x3621   :  { %9955 = vmatprep.subr.mxu0 %v10729_v15  ;;  %9952 = vmatprep.mubr.msk.f32.mxu1 %vm10730_vm1, %v10729_v15 }
0x3623   :  { %9948 = vmatmul.mubr.msk.f32.vlgmr.msra.gmra.mrb[90].mxu0 %vm328_vm2, %v6548_v19 }
0x3624   :  { %9957 = vmatprep.mubr.msk.f32.mxu0 %vm10730_vm1, %v10729_v15 }
0x36ee   :  { %v6389_v21 = vpop.f32.mrb[76].mxu1 }
0x36ef   :  { %v9934_v22 = vpop.f32.mrb[77].mxu1 }
0x36f2   :  { %v6465_v26 = vpop.f32.mrb[88].mxu0  ;;  %v6543_v36 = vpop.f32.mrb[78].mxu1 }
0x36f3   :  { %v10185_v28 = vpack.i.bf16 %v6465_v26, %v6389_v21  ;;  %v6625_v12 = vmul.f32 0.35355338, %v6543_v36  ;;  %v9939_v31 = vpop.f32.mrb[89].mxu0  ;;  %v9944_v32 = vpop.f32.mrb[79].mxu1 }
0x36f5   :  { %v6627_v10 = vadd.f32 %v6625_v12, %v11051_v52 }
0x36f6   :  { %v6621_v33 = vpop.f32.mrb[90].mxu0 }
0x36f7   :  { %v6626_v37 = vmul.f32 0.35355338, %v6621_v33  ;;  %v9949_v40 = vpop.f32.mrb[91].mxu0  ;;  %v6629_v41 = vsel %vm328_vm2, %v6627_v10, -inf }
0x36f8   :  { %6630 = vmax.xlane.f32.xlu0 %v6629_v41 }
0x36f9   :  { %v6628_v30 = vadd.f32 %v6626_v37, %v11054_v56 }
0x36fb   :  { %v6632_v42 = vsel %vm328_vm2, %v6628_v30, -inf }
0x36fc   :  { %6633 = vmax.xlane.f32.xlu1 %v6632_v42 }
0x370d   :  { %6727 = vrot.lane.b32.xlu1 %v11772_v20, %s10741_s7 }
0x3711   :  { %10181 = vrot.lane.b32.xlu1 %v10180_v49, %s10742_s25 }
0x3715   :  { %10186 = vrot.lane.b32.xlu1 %v10185_v28, %s10720_s22 }
0x3785   :  { %v6631_v25 = vpop.xlane.xlu0 %6630 }
0x3786   :  { %v6635_v43 = vsub.f32 %v6627_v10, %v6631_v25 }
0x3788   :  { %v6637_v45 = vmul.f32 1.442695, %v6635_v43 }
0x3789   :  { %v6634_v59 = vpop.xlane.xlu1 %6633 }
0x378a   :  { %10405 = vpow2.f32 %v6637_v45  ;;  %v6636_v60 = vsub.f32 %v6628_v30, %v6634_v59  ;;  %v10245_v59 = vld [vmem:[%s12288_s14 + $0x20] sm:$0xff]  }
0x378c   :  { %v6639_v61 = vmul.f32 1.442695, %v6636_v60  ;;  %v10246_v60 = vld [vmem:[%s12288_s14 + $0x28] sm:$0xff]  }
0x378d   :  { %v6728_v62 = vpop.permute.xlu1 %6727 }
0x378e   :  { %10407 = vpow2.f32 %v6639_v61  ;;  %9956 = vmatpush3.msra.mxu0 %v6728_v62  ;;  %v10247_v61 = vld [vmem:[%s12290_s16 + $0x40] sm:$0xff]   ;;  %v10248_v62 = vld [vmem:[%s12290_s16 + $0x48] sm:$0xff]  }
0x378f   :  { %9968 = vmatprep.subr.bf16.mxu0 %v10729_v15 }
0x3791   :  { %v10182_v29 = vpop.permute.xlu1 %10181 }
0x3792   :  { %v10184_v57 = vunpack.i.h.bf16 %v10182_v29  ;;  %v10183_v2 = vunpack.i.l.bf16 %v10182_v29  ;;  %v10250_v29 = vld [vmem:[%s12290_s16 + $0x58] sm:$0xff]  }
0x3794   :  { %v10406_v20 = vpop.eup %10405  ;;  %v6828_v11 = vsel %vm328_vm2, %v11828_v55, %v10184_v57  ;;  %v6827_v13 = vsel %vm328_vm2, %v11826_v58, %v10183_v2  ;;  %v9213_v55 = vld [vmem:[#allocation11 + $0x2] ss:$0 sm:$0xff]  ;;  %v10744_v57 = vmov 0  }
0x3795   :  { %v6641_v46 = vsel %vm328_vm2, %v10406_v20, 0.0  ;;  %v10187_v27 = vpop.permute.xlu1 %10186  ;;  %10195 = vset.pattern.permute.xlu1 %v10744_v57  ;;  %10201 = vset.pattern.permute.xlu0 %v10744_v57 }
0x3796   :  { %6642 = vadd.xlane.f32.xlu0 %v6641_v46  ;;  %v10189_v1 = vunpack.i.h.bf16 %v10187_v27  ;;  %v10188_v6 = vunpack.i.l.bf16 %v10187_v27  ;;  %v7113_v27 = vld [vmem:[%s12278_s4] sm:$0x3] }
0x3797   :  { %vm7115_vm6 = vcmp.eq.s32.totalorder %v7113_v27, 0  ;;  %vm7129_vm7 = vcmp.eq.s32.totalorder %v7113_v27, 1  ;;  %vm7143_vm8 = vcmp.eq.s32.totalorder %v7113_v27, 2  ;;  %vm7157_vm9 = vcmp.eq.s32.totalorder %v7113_v27, 3 }
0x3798   :  { %v10408_v5 = vpop.eup %10407  ;;  %v6829_v7 = vsel %vm1698_vm3, %v6827_v13, %v10188_v6  ;;  %v6830_v9 = vsel %vm1698_vm3, %v6828_v11, %v10189_v1  ;;  %v9241_v2 = vsel %vm7115_vm6, 1.0, %v10729_v15  ;;  %v9242_v1 = vsel %vm7129_vm7, 1.0, %v10729_v15  ;;  %v9223_v13 = vld [vmem:[#allocation16 + $0x2] ss:$0 sm:$0xff] }
0x3799   :  { %v6644_v44 = vsel %vm328_vm2, %v10408_v5, 0.0  ;;  %v9243_v6 = vsel %vm7143_vm8, 1.0, %v10729_v15  ;;  %v9244_v11 = vsel %vm7157_vm9, 1.0, %v10729_v15 }
0x379a   :  { %6645 = vadd.xlane.f32.xlu0 %v6644_v44 }
0x37b0   :  { %6651 = vrot.lane.b32.xlu0 %v11770_v16, %s10741_s7  ;;  %v10243_v16 = vld [vmem:[%s12284_s10 + $0x20] sm:$0xff]  }
0x3823   :  { %v6643_v49 = vpop.xlane.xlu0 %6642 }
0x3824   :  { %10409 = vrcp.f32 %v6643_v49 }
0x3827   :  { %v6646_v24 = vpop.xlane.xlu0 %6645 }
0x3828   :  { %10411 = vrcp.f32 %v6646_v24 }
0x382b   :  { %v6652_v54 = vpop.permute.xlu0 %6651 }
0x382c   :  { %9951 = vmatpush3.msra.mxu1 %v6652_v54 }
0x382d   :  { %9960 = vmatprep.subr.bf16.mxu1 %v10729_v15 }
0x382e   :  { %v10410_v34 = vpop.eup %10409 }
0x382f   :  { %v6648_v53 = vmul.f32 %v10410_v34, %v10406_v20 }
0x3831   :  { %9953 = vmatmul.mubr.msk.f32.vlgmr.msra.gmra.mrb[80].mxu1 %vm328_vm2, %v6648_v53  ;;  %v9217_v53 = vld [vmem:[#allocation13 + $0x2] ss:$0 sm:$0xff] }
0x3832   :  { %v10412_v51 = vpop.eup %10411  ;;  %9964 = vmatprep.mubr.msk.bf16.mxu1 %vm10730_vm1, %v10729_v15  ;;  %9961 = vmatpush3.bf16.msra.mxu1 %v10243_v16 }
0x3833   :  { %v6650_v35 = vmul.f32 %v10412_v51, %v10408_v5  ;;  %9962 = vmatprep.subr.bf16.mxu1 %v10729_v15 }
0x3835   :  { %9958 = vmatmul.mubr.msk.f32.vlgmr.msra.gmra.mrb[92].mxu0 %vm328_vm2, %v6650_v35 }
0x3836   :  { %9972 = vmatprep.mubr.msk.bf16.mxu0 %vm10730_vm1, %v10729_v15  ;;  %9963 = vmatpush3.bf16.msra.mxu1 %v10244_v38  ;;  %v9218_v38 = vld [vmem:[#allocation14 + $0x2] ss:$0 sm:$0xff] }
0x3837   :  { %9976 = vmatprep.subr.bf16.mxu1 %v10729_v15  ;;  %9969 = vmatpush3.bf16.msra.mxu0 %v10245_v59 }
0x3838   :  { %9970 = vmatprep.subr.bf16.mxu0 %v10729_v15 }
0x383b   :  { %9971 = vmatpush3.bf16.msra.mxu0 %v10246_v60 }
0x383c   :  { %9988 = vmatprep.subr.bf16.mxu0 %v10729_v15 }
0x3904   :  { %v6723_v63 = vpop.f32.mrb[80].mxu1 }
0x3905   :  { %v9954_v0 = vpop.f32.mrb[81].mxu1 }
0x3908   :  { %v6799_v3 = vpop.f32.mrb[92].mxu0 }
0x3909   :  { %v10190_v4 = vpack.i.bf16 %v6799_v3, %v6723_v63  ;;  %v9959_v18 = vpop.f32.mrb[93].mxu0 }
0x390a   :  { %v10249_v18 = vld [vmem:[%s12290_s16 + $0x50] sm:$0xff]  }
0x390b   :  { %10191 = vrot.lane.b32.xlu0 %v10190_v4, %s10743_s6 }
0x397d   :  { %v10192_v8 = vpop.permute.xlu0 %10191 }
0x397e   :  { %v10194_v14 = vunpack.i.h.bf16 %v10192_v8  ;;  %v10193_v23 = vunpack.i.l.bf16 %v10192_v8  ;;  %v10196_v8 = vpack.i.bf16 %v9242_v1, %v9241_v2 }
0x3980   :  { %v6832_v17 = vsel %vm1701_vm4, %v6830_v9, %v10194_v14  ;;  %v6831_v19 = vsel %vm1701_vm4, %v6829_v7, %v10193_v23 }
0x3981   :  { %v6833_v21 = vpack.c.bf16 %v6832_v17, %v6831_v19 }
0x3983   :  { %9965 = vmatmul.mubr.msk.bf16.vlgmr.msra.gmra.mrb[84].mxu1 %vm213_vm0, %v6833_v21 }
0x3984   :  { %9984 = vmatprep.mubr.msk.bf16.mxu1 %vm10730_vm1, %v10729_v15  ;;  %9977 = vmatpush3.bf16.msra.mxu1 %v10247_v61 }
0x3985   :  { %9978 = vmatprep.subr.bf16.mxu1 %v10729_v15 }
0x3988   :  { %9979 = vmatpush3.bf16.msra.mxu1 %v10248_v62 }
0x3989   :  { %9980 = vmatprep.subr.bf16.mxu1 %v10729_v15 }
0x398c   :  { %9981 = vmatpush3.bf16.msra.mxu1 %v10249_v18 }
0x398d   :  { %9982 = vmatprep.subr.bf16.mxu1 %v10729_v15 }
0x3990   :  { %9983 = vmatpush3.bf16.msra.mxu1 %v10250_v29 }
0x3991   :  { %10006 = vmatprep.subr.mxu1 %v10729_v15 }
0x3a56   :  { %v6896_v22 = vpop.f32.mrb[84].mxu1 }
0x3a57   :  { %v6897_v26 = vadd.f32 %v9213_v55, %v6896_v22  ;;  %v9966_v58 = vpop.f32.mrb[85].mxu1 }
0x3a58   :  { %v6899_v36 = vpop.f32.mrb[86].mxu1  ;;  %v7139_v58 = vsub.s32 1, %v11045_v47 }
0x3a59   :  { %v11952_v28 = vadd.f32 %v6897_v26, %v11746_v39  ;;  %v6900_v12 = vadd.f32 %v9213_v55, %v6899_v36  ;;  %v9967_v31 = vpop.f32.mrb[87].mxu1  ;;  %v7114_v26 = vld [vmem:[#allocation5] sm:$0xf] }
0x3a5a   :  { %v7140_v31 = vrot.slane %v7114_v26, %v7139_v58 }
0x3a5b   :  { %v11955_v32 = vadd.f32 %v6900_v12, %v11749_v48  ;;  %v6909_v10 = vsel %vm213_vm0, %v11952_v28, 0.0  ;;  %v7126_v12 = vrot.slane %v7114_v26, %v11048_v50 }
0x3a5c   :  { %6910 = vadd.xlane.f32.xlu1 %v6909_v10 }
0x3a5d   :  { %v6912_v33 = vsel %vm213_vm0, %v11955_v32, 0.0 }
0x3a5e   :  { %6913 = vadd.xlane.f32.xlu0 %v6912_v33 }
0x3a6d   :  { %10197 = vperm.xlu1 %10195, %v10196_v8  }
0x3a71   :  { %7162 = vperm.xlu1 %10195, %v9244_v11  }
0x3ae9   :  { %v6911_v37 = vpop.xlane.xlu1 %6910 }
0x3aea   :  { %v6915_v40 = vmul.f32 0.03125, %v6911_v37  ;;  %v7153_v37 = vsub.s32 2, %v11045_v47 }
0x3aeb   :  { %v6914_v41 = vpop.xlane.xlu0 %6913 }
0x3aec   :  { %v6917_v30 = vsub.f32 %v11952_v28, %v6915_v40  ;;  %v6916_v39 = vmul.f32 0.03125, %v6914_v41 }
0x3aed   :  { %v10198_v36 = vpop.permute.xlu1 %10197 }
0x3aee   :  { %v6918_v42 = vsub.f32 %v11955_v32, %v6916_v39  ;;  %v6919_v25 = vmul.f32 %v6917_v30, %v6917_v30  ;;  %v10200_v10 = vunpack.i.h.bf16 %v10198_v36  ;;  %v10199_v33 = vunpack.i.l.bf16 %v10198_v36 }
0x3aef   :  { %v7167_v39 = vsub.s32 3, %v11045_v47 }
0x3af0   :  { %v6921_v48 = vsel %vm213_vm0, %v6919_v25, 0.0  ;;  %v6920_v43 = vmul.f32 %v6918_v42, %v6918_v42  ;;  %v7141_v40 = vmul.f32 %v10200_v10, %v7140_v31  ;;  %v7127_v41 = vmul.f32 %v10199_v33, %v7126_v12  ;;  %v9245_v31 = vld [vmem:[#allocation7 + $0x3] ss:$0 sm:$0xff] }
0x3af1   :  { %6922 = vadd.xlane.f32.xlu0 %v6921_v48  ;;  %v7163_v60 = vpop.permute.xlu1 %7162 }
0x3af2   :  { %v6924_v45 = vsel %vm213_vm0, %v6920_v43, 0.0  ;;  %v7142_v25 = vadd.f32 %v7141_v40, %v7127_v41  ;;  %v7168_v43 = vrot.slane %v7114_v26, %v7167_v39  ;;  %v9246_v40 = vld [vmem:[#allocation8 + $0x3] ss:$0 sm:$0xff] }
0x3af5   :  { %6925 = vadd.xlane.f32.xlu0 %v6924_v45  ;;  %v10745_v45 = vmov 1966171168  }
0x3af6   :  { %v7173_v59 = vunpack.c.l.s4 %v10745_v45 }
0x3af8   :  { %v7174_v62 = vunpack.c.0.s8 %v7173_v59 }
0x3b0b   :  { %7148 = vperm.xlu0 %10201, %v9243_v6  }
0x3b7e   :  { %v6923_v20 = vpop.xlane.xlu0 %6922 }
0x3b7f   :  { %v6927_v46 = vmul.f32 0.03125, %v6923_v20  ;;  %v7169_v20 = vmul.f32 %v7168_v43, %v7163_v60 }
0x3b81   :  { %v6929_v5 = vadd.f32 1e-06, %v6927_v46  ;;  %v7177_v46 = vsub.s32 %v7174_v62, %v11045_v47 }
0x3b82   :  { %v6926_v44 = vpop.xlane.xlu0 %6925 }
0x3b83   :  { %10413 = vrsqrt.f32 %v6929_v5  ;;  %v6928_v49 = vmul.f32 0.03125, %v6926_v44 }
0x3b85   :  { %v6930_v24 = vadd.f32 1e-06, %v6928_v49  ;;  %v9235_v49 = vld [vmem:[#allocation17 + $0x2] ss:$0 sm:$0xff] }
0x3b87   :  { %10415 = vrsqrt.f32 %v6930_v24 }
0x3b8d   :  { %v10414_v54 = vpop.eup %10413 }
0x3b8e   :  { %v6933_v34 = vmul.f32 %v10414_v54, %v6917_v30  ;;  %v7154_v30 = vrot.slane %v7114_v26, %v7153_v37 }
0x3b90   :  { %v6941_v35 = vmul.f32 %v9217_v53, %v6933_v34 }
0x3b91   :  { %v10416_v51 = vpop.eup %10415 }
0x3b92   :  { %v6934_v16 = vmul.f32 %v10416_v51, %v6918_v42  ;;  %v6949_v0 = vadd.f32 %v9218_v38, %v6941_v35  ;;  %v7149_v42 = vpop.permute.xlu0 %7148 }
0x3b93   :  { %v7155_v48 = vmul.f32 %v7154_v30, %v7149_v42 }
0x3b94   :  { %v6942_v63 = vmul.f32 %v9217_v53, %v6934_v16 }
0x3b95   :  { %v7156_v61 = vadd.f32 %v7155_v48, %v7142_v25  ;;  %v9251_v25 = vld [vmem:[#allocation10 + $0x3] ss:$0 sm:$0xff] }
0x3b96   :  { %v6950_v3 = vadd.f32 %v9218_v38, %v6942_v63 }
0x3b97   :  { %v7170_v5 = vadd.f32 %v7169_v20, %v7156_v61 }
0x3b98   :  { %v6951_v4 = vpack.c.bf16 %v6950_v3, %v6949_v0 }
0x3b99   :  { %v7178_v44 = vrot.slane %v7170_v5, %v7177_v46 }
0x3b9a   :  { %9973 = vmatmul.mubr.msk.bf16.vlgmr.msra.gmra.mrb[96].mxu0 %vm213_vm0, %v6951_v4 }
0x3b9b   :  { %9992 = vmatprep.mubr.msk.bf16.mxu0 %vm10730_vm1, %v10729_v15  ;;  %v7179_v24 = vcombine.high %v7178_v44, %v7178_v44  ;;  %v7186_v34 = vrot.slane %v7178_v44, %v7177_v46 }
0x3b9d   :  { %v7193_v16 = vrot.slane %v7179_v24, %v7177_v46  ;;  %v7197_v4 = vrot.slane %v7186_v34, %v11048_v50 }
0x3b9f   :  { %v7201_v27 = vrot.slane %v7193_v16, %v11048_v50 }
0x3c6d   :  { %v7014_v14 = vpop.f32.mrb[96].mxu0 }
0x3c6e   :  { %v7015_v23 = vadd.f32 %v9223_v13, %v7014_v14  ;;  %v9974_v7 = vpop.f32.mrb[97].mxu0 }
0x3c6f   :  { %v7017_v9 = vpop.f32.mrb[98].mxu0 }
0x3c70   :  { %v7018_v17 = vadd.f32 %v9223_v13, %v7017_v9  ;;  %v9975_v19 = vpop.f32.mrb[99].mxu0  ;;  %v7021_v21 = vmax.f32 %v7015_v23, 0.0  ;;  %v10251_v9 = vld [vmem:[%s12282_s8 + $0x30] sm:$0xff]  }
0x3c71   :  { %9989 = vmatpush3.bf16.msra.mxu0 %v10251_v9 }
0x3c72   :  { %v7022_v55 = vmax.f32 %v7018_v17, 0.0  ;;  %v10252_v17 = vld [vmem:[%s12282_s8 + $0x38] sm:$0xff]   ;;  %9990 = vmatprep.subr.bf16.mxu0 %v10729_v15 }
0x3c74   :  { %v7023_v22 = vpack.c.bf16 %v7022_v55, %v7021_v21 }
0x3c75   :  { %9991 = vmatpush3.bf16.msra.mxu0 %v10252_v17 }
0x3c76   :  { %9985 = vmatmul.mubr.msk.bf16.vlgmr.msra.gmra.mrb[88].mxu1 %vm1928_vm5, %v7023_v22  ;;  %9996 = vmatprep.subr.mxu0 %v10729_v15 }
0x3c77   :  { %10008 = vmatprep.mubr.msk.f32.mxu1 %vm10730_vm1, %v10729_v15 }
0x3d49   :  { %v7102_v54 = vpop.f32.mrb[88].mxu1 }
0x3d4a   :  { %v7103_v53 = vadd.f32 %v9235_v49, %v7102_v54  ;;  %v9986_v51 = vpop.f32.mrb[89].mxu1 }
0x3d4b   :  { %v7105_v35 = vpop.f32.mrb[90].mxu1 }
0x3d4c   :  { %v7109_v38 = vadd.f32 %v7103_v53, %v11952_v28  ;;  %v7106_v63 = vadd.f32 %v9235_v49, %v7105_v35  ;;  %v9987_v0 = vpop.f32.mrb[91].mxu1 }
0x3d4e   :  { %v7111_v3 = vmax.f32 %v7109_v38, 0.0  ;;  %v7110_v18 = vadd.f32 %v7106_v63, %v11955_v32 }
0x3d50   :  { %v12010_v47 = vadd.f32 %v7197_v4, %v7111_v3  ;;  %v7112_v29 = vmax.f32 %v7110_v18, 0.0 }
0x3d52   :  { %v12013_v57 = vadd.f32 %v7201_v27, %v7112_v29  ;;  %v7210_v2 = vsel %vm213_vm0, %v12010_v47, 0.0 }
0x3d53   :  { %7211 = vadd.xlane.f32.xlu1 %v7210_v2 }
0x3d54   :  { %v7213_v28 = vsel %vm213_vm0, %v12013_v57, 0.0 }
0x3d55   :  { %7214 = vadd.xlane.f32.xlu0 %v7213_v28 }
0x3de0   :  { %v7212_v1 = vpop.xlane.xlu1 %7211 }
0x3de1   :  { %v7216_v6 = vmul.f32 0.03125, %v7212_v1 }
0x3de2   :  { %v7215_v8 = vpop.xlane.xlu0 %7214 }
0x3de3   :  { %v7218_v32 = vsub.f32 %v12010_v47, %v7216_v6  ;;  %v7217_v11 = vmul.f32 0.03125, %v7215_v8 }
0x3de5   :  { %v7219_v13 = vsub.f32 %v12013_v57, %v7217_v11  ;;  %v7220_v14 = vmul.f32 %v7218_v32, %v7218_v32 }
0x3de7   :  { %v7222_v50 = vsel %vm213_vm0, %v7220_v14, 0.0  ;;  %v7221_v23 = vmul.f32 %v7219_v13, %v7219_v13 }
0x3de8   :  { %7223 = vadd.xlane.f32.xlu1 %v7222_v50 }
0x3de9   :  { %v7225_v7 = vsel %vm213_vm0, %v7221_v23, 0.0 }
0x3dec   :  { %7226 = vadd.xlane.f32.xlu1 %v7225_v7 }
0x3e75   :  { %v7224_v19 = vpop.xlane.xlu1 %7223 }
0x3e76   :  { %v7228_v21 = vmul.f32 0.03125, %v7224_v19 }
0x3e78   :  { %v7230_v55 = vadd.f32 1e-06, %v7228_v21 }
0x3e79   :  { %v7227_v22 = vpop.xlane.xlu1 %7226 }
0x3e7a   :  { %10417 = vrsqrt.f32 %v7230_v55  ;;  %v7229_v26 = vmul.f32 0.03125, %v7227_v22 }
0x3e7c   :  { %v7231_v58 = vadd.f32 1e-06, %v7229_v26 }
0x3e7e   :  { %10419 = vrsqrt.f32 %v7231_v58 }
0x3e84   :  { %v10418_v36 = vpop.eup %10417 }
0x3e85   :  { %v7234_v12 = vmul.f32 %v10418_v36, %v7218_v32 }
0x3e87   :  { %v7242_v33 = vmul.f32 %v9245_v31, %v7234_v12 }
0x3e88   :  { %v10420_v10 = vpop.eup %10419 }
0x3e89   :  { %v7235_v37 = vmul.f32 %v10420_v10, %v7219_v13  ;;  %v7250_v30 = vadd.f32 %v9246_v40, %v7242_v33 }
0x3e8b   :  { %v7243_v41 = vmul.f32 %v9245_v31, %v7235_v37 }
0x3e8d   :  { %v7251_v39 = vadd.f32 %v9246_v40, %v7243_v41 }
0x3e8f   :  { %v7259_v42 = vpack.c.bf16 %v7251_v39, %v7250_v30 }
0x3e91   :  { %9993 = vmatmul.mubr.msk.bf16.vlgmr.msra.gmra.mrb[100].mxu0 %vm213_vm0, %v7259_v42 }
0x3e92   :  { %9998 = vmatprep.mubr.msk.f32.mxu0 %vm10730_vm1, %v10729_v15 }
0x3f64   :  { %v7315_v48 = vpop.f32.mrb[100].mxu0 }
0x3f65   :  { %v12034_v43 = vadd.f32 %v9251_v25, %v7315_v48  ;;  %v9994_v45 = vpop.f32.mrb[101].mxu0 }
0x3f66   :  { %v7318_v59 = vpop.f32.mrb[102].mxu0 }
0x3f67   :  { %v12036_v60 = vadd.f32 %v9251_v25, %v7318_v59  ;;  %7323 = vrot.lane.b32.xlu1 %v12034_v43, %s10731_s12  ;;  %v9995_v61 = vpop.f32.mrb[103].mxu0 }
0x3f69   :  { %7400 = vrot.lane.b32.xlu0 %v12036_v60, %s10731_s12 }
0x3fd9   :  { %v7324_v62 = vpop.permute.xlu1 %7323 }
0x3fda   :  { %9997 = vmatpush3.xpose.msk.msra.mxu0 %vm328_vm2, %v7324_v62 }
0x3fdb   :  { %10001 = vmatprep.subr.mxu0 %v10729_v15  ;;  %v7401_v20 = vpop.permute.xlu0 %7400 }
0x3fdd   :  { %9999 = vmatmul.mubr.msk.f32.vlgmr.msra.gmra.mrb[94].mxu0 %vm328_vm2, %v12034_v43 }
0x3fde   :  { %10002 = vmatpush3.xpose.msk.msra.mxu0 %vm328_vm2, %v7401_v20  ;;  %10003 = vmatprep.mubr.msk.f32.mxu0 %vm10730_vm1, %v10729_v15 }
0x3fdf   :  { %10011 = vmatprep.subr.mxu0 %v10729_v15 }
0x3fe1   :  { %10004 = vmatmul.mubr.msk.f32.vlgmr.msra.gmra.mrb[104].mxu0 %vm328_vm2, %v12036_v60 }
0x3fe2   :  { %10013 = vmatprep.mubr.msk.f32.mxu0 %vm10730_vm1, %v10729_v15 }
0x40b0   :  { %v7395_v46 = vpop.f32.mrb[94].mxu0 }
0x40b1   :  { %v7476_v5 = vmul.f32 0.35355338, %v7395_v46  ;;  %v10000_v44 = vpop.f32.mrb[95].mxu0 }
0x40b3   :  { %v7478_v49 = vadd.f32 %v7476_v5, %v11051_v52 }
0x40b4   :  { %v7472_v24 = vpop.f32.mrb[104].mxu0 }
0x40b5   :  { %v7477_v54 = vmul.f32 0.35355338, %v7472_v24  ;;  %v10005_v34 = vpop.f32.mrb[105].mxu0  ;;  %v7480_v53 = vsel %vm328_vm2, %v7478_v49, -inf }
0x40b6   :  { %7481 = vmax.xlane.f32.xlu1 %v7480_v53 }
0x40b7   :  { %v7479_v51 = vadd.f32 %v7477_v54, %v11054_v56 }
0x40b9   :  { %v7483_v35 = vsel %vm328_vm2, %v7479_v51, -inf }
0x40ba   :  { %7484 = vmax.xlane.f32.xlu0 %v7483_v35 }
0x40c7   :  { %7502 = vrot.lane.b32.xlu1 %v12034_v43, %s10732_s0 }
0x40cb   :  { %7656 = vrot.lane.b32.xlu1 %v12034_v43, %s10733_s1 }
0x40cf   :  { %7734 = vrot.lane.b32.xlu1 %v12036_v60, %s10733_s1 }
0x40d0   :  { %7578 = vrot.lane.b32.xlu0 %v12036_v60, %s10732_s0 }
0x40d4   :  { %7732 = vrot.lane.b32.xlu0 %v12036_v60, %s10734_s13 }
0x4143   :  { %v7482_v16 = vpop.xlane.xlu1 %7481 }
0x4144   :  { %v7486_v38 = vsub.f32 %v7478_v49, %v7482_v16 }
0x4146   :  { %v7488_v63 = vmul.f32 1.442695, %v7486_v38 }
0x4147   :  { %v7503_v0 = vpop.permute.xlu1 %7502  ;;  %v7485_v3 = vpop.xlane.xlu0 %7484 }
0x4148   :  { %10421 = vpow2.f32 %v7488_v63  ;;  %v7487_v4 = vsub.f32 %v7479_v51, %v7485_v3  ;;  %10007 = vmatpush3.msra.mxu1 %v7503_v0 }
0x4149   :  { %10016 = vmatprep.subr.mxu1 %v10729_v15 }
0x414a   :  { %v7490_v18 = vmul.f32 1.442695, %v7487_v4 }
0x414b   :  { %v7579_v29 = vpop.permute.xlu0 %7578  ;;  %v7657_v6 = vpop.permute.xlu1 %7656 }
0x414c   :  { %10423 = vpow2.f32 %v7490_v18  ;;  %10012 = vmatpush3.msra.mxu0 %v7579_v29 }
0x414d   :  { %10021 = vmatprep.subr.mxu0 %v10729_v15 }
0x414f   :  { %v7735_v8 = vpop.permute.xlu1 %7734  ;;  %v7733_v9 = vpop.permute.xlu0 %7732 }
0x4152   :  { %v10422_v27 = vpop.eup %10421 }
0x4153   :  { %v7492_v2 = vsel %vm328_vm2, %v10422_v27, 0.0 }
0x4154   :  { %7493 = vadd.xlane.f32.xlu1 %v7492_v2 }
0x4156   :  { %v10424_v28 = vpop.eup %10423 }
0x4157   :  { %v7495_v1 = vsel %vm328_vm2, %v10424_v28, 0.0 }
0x4158   :  { %7496 = vadd.xlane.f32.xlu1 %v7495_v1 }
0x4169   :  { %7654 = vrot.lane.b32.xlu1 %v12034_v43, %s10734_s13 }
0x41e1   :  { %v7494_v32 = vpop.xlane.xlu1 %7493 }
0x41e2   :  { %10425 = vrcp.f32 %v7494_v32 }
0x41e5   :  { %v7497_v11 = vpop.xlane.xlu1 %7496 }
0x41e6   :  { %10427 = vrcp.f32 %v7497_v11 }
0x41e9   :  { %v7655_v7 = vpop.permute.xlu1 %7654 }
0x41ec   :  { %v10426_v13 = vpop.eup %10425 }
0x41ed   :  { %v7499_v14 = vmul.f32 %v10426_v13, %v10422_v27 }
0x41ef   :  { %10009 = vmatmul.mubr.msk.f32.vlgmr.msra.gmra.mrb[82].mxu1 %vm328_vm2, %v7499_v14 }
0x41f0   :  { %v10428_v50 = vpop.eup %10427  ;;  %10017 = vmatpush3.xpose.msk.msra.mxu1 %vm328_vm2, %v7657_v6  ;;  %10018 = vmatprep.mubr.msk.f32.mxu1 %vm10730_vm1, %v10729_v15 }
0x41f1   :  { %v7501_v23 = vmul.f32 %v10428_v50, %v10424_v28  ;;  %10026 = vmatprep.subr.mxu1 %v10729_v15 }
0x41f3   :  { %10014 = vmatmul.mubr.msk.f32.vlgmr.msra.gmra.mrb[106].mxu0 %vm328_vm2, %v7501_v23  ;;  %10019 = vmatmul.mubr.msk.f32.vlgmr.msra.gmra.mrb[92].mxu1 %vm328_vm2, %v7655_v7 }
0x41f4   :  { %10022 = vmatpush3.xpose.msk.msra.mxu0 %vm328_vm2, %v7735_v8  ;;  %10023 = vmatprep.mubr.msk.f32.mxu0 %vm10730_vm1, %v10729_v15 }
0x41f5   :  { %10031 = vmatprep.subr.mxu0 %v10729_v15  ;;  %10028 = vmatprep.mubr.msk.f32.mxu1 %vm10730_vm1, %v10729_v15 }
0x41f7   :  { %10024 = vmatmul.mubr.msk.f32.vlgmr.msra.gmra.mrb[108].mxu0 %vm328_vm2, %v7733_v9 }
0x41f8   :  { %10033 = vmatprep.mubr.msk.f32.mxu0 %vm10730_vm1, %v10729_v15 }
0x42c2   :  { %v12090_v17 = vpop.f32.mrb[82].mxu1 }
0x42c3   :  { %v10010_v19 = vpop.f32.mrb[83].mxu1 }
0x42c6   :  { %v12092_v21 = vpop.f32.mrb[106].mxu0  ;;  %v7728_v55 = vpop.f32.mrb[92].mxu1 }
0x42c7   :  { %v7810_v22 = vmul.f32 0.35355338, %v7728_v55  ;;  %v10015_v26 = vpop.f32.mrb[107].mxu0  ;;  %v10020_v58 = vpop.f32.mrb[93].mxu1 }
0x42c9   :  { %v7812_v36 = vadd.f32 %v7810_v22, %v11051_v52 }
0x42ca   :  { %v7806_v12 = vpop.f32.mrb[108].mxu0 }
0x42cb   :  { %v7811_v31 = vmul.f32 0.35355338, %v7806_v12  ;;  %v10025_v10 = vpop.f32.mrb[109].mxu0  ;;  %v7814_v33 = vsel %vm328_vm2, %v7812_v36, -inf }
0x42cc   :  { %7815 = vmax.xlane.f32.xlu1 %v7814_v33 }
0x42cd   :  { %v7813_v37 = vadd.f32 %v7811_v31, %v11054_v56 }
0x42cf   :  { %v7817_v40 = vsel %vm328_vm2, %v7813_v37, -inf }
0x42d0   :  { %7818 = vmax.xlane.f32.xlu0 %v7817_v40 }
0x42dd   :  { %7912 = vrot.lane.b32.xlu1 %v12036_v60, %s10735_s23 }
0x42e1   :  { %7990 = vrot.lane.b32.xlu1 %v12034_v43, %s10736_s20 }
0x42e6   :  { %7836 = vrot.lane.b32.xlu0 %v12034_v43, %s10735_s23 }
0x42ea   :  { %8068 = vrot.lane.b32.xlu0 %v12036_v60, %s10736_s20 }
0x4359   :  { %v7816_v41 = vpop.xlane.xlu1 %7815 }
0x435a   :  { %v7820_v30 = vsub.f32 %v7812_v36, %v7816_v41 }
0x435c   :  { %v7822_v39 = vmul.f32 1.442695, %v7820_v30 }
0x435d   :  { %v7913_v42 = vpop.permute.xlu1 %7912  ;;  %v7819_v25 = vpop.xlane.xlu0 %7818 }
0x435e   :  { %10429 = vpow2.f32 %v7822_v39  ;;  %v7821_v48 = vsub.f32 %v7813_v37, %v7819_v25  ;;  %10032 = vmatpush3.msra.mxu0 %v7913_v42 }
0x435f   :  { %10041 = vmatprep.subr.mxu0 %v10729_v15 }
0x4360   :  { %v7824_v45 = vmul.f32 1.442695, %v7821_v48 }
0x4361   :  { %v7837_v59 = vpop.permute.xlu0 %7836  ;;  %v7991_v44 = vpop.permute.xlu1 %7990 }
0x4362   :  { %10431 = vpow2.f32 %v7824_v45  ;;  %10027 = vmatpush3.msra.mxu1 %v7837_v59 }
0x4363   :  { %10036 = vmatprep.subr.mxu1 %v10729_v15 }
0x4365   :  { %v8069_v5 = vpop.permute.xlu0 %8068 }
0x4368   :  { %v10430_v61 = vpop.eup %10429 }
0x4369   :  { %v7826_v62 = vsel %vm328_vm2, %v10430_v61, 0.0 }
0x436a   :  { %7827 = vadd.xlane.f32.xlu0 %v7826_v62 }
0x436c   :  { %v10432_v20 = vpop.eup %10431 }
0x436d   :  { %v7829_v46 = vsel %vm328_vm2, %v10432_v20, 0.0 }
0x436e   :  { %7830 = vadd.xlane.f32.xlu1 %v7829_v46 }
0x437f   :  { %7988 = vrot.lane.b32.xlu1 %v12034_v43, %s10737_s11 }
0x4380   :  { %8066 = vrot.lane.b32.xlu0 %v12036_v60, %s10737_s11 }
0x43f7   :  { %v7828_v49 = vpop.xlane.xlu0 %7827 }
0x43f8   :  { %10433 = vrcp.f32 %v7828_v49 }
0x43fb   :  { %v7831_v24 = vpop.xlane.xlu1 %7830  ;;  %v8067_v16 = vpop.permute.xlu0 %8066 }
0x43fc   :  { %10435 = vrcp.f32 %v7831_v24 }
0x43ff   :  { %v7989_v35 = vpop.permute.xlu1 %7988 }
0x4402   :  { %v10434_v54 = vpop.eup %10433 }
0x4403   :  { %v7833_v34 = vmul.f32 %v10434_v54, %v10430_v61 }
0x4405   :  { %10029 = vmatmul.mubr.msk.f32.vlgmr.msra.gmra.mrb[94].mxu1 %vm328_vm2, %v7833_v34 }
0x4406   :  { %v10436_v53 = vpop.eup %10435  ;;  %10037 = vmatpush3.xpose.msk.msra.mxu1 %vm328_vm2, %v7991_v44  ;;  %10038 = vmatprep.mubr.msk.f32.mxu1 %vm10730_vm1, %v10729_v15 }
0x4407   :  { %v7835_v51 = vmul.f32 %v10436_v53, %v10432_v20  ;;  %10046 = vmatprep.subr.mxu1 %v10729_v15 }
0x4409   :  { %10034 = vmatmul.mubr.msk.f32.vlgmr.msra.gmra.mrb[110].mxu0 %vm328_vm2, %v7835_v51  ;;  %10039 = vmatmul.mubr.msk.f32.vlgmr.msra.gmra.mrb[96].mxu1 %vm328_vm2, %v7989_v35 }
0x440a   :  { %10042 = vmatpush3.xpose.msk.msra.mxu0 %vm328_vm2, %v8069_v5  ;;  %10043 = vmatprep.mubr.msk.f32.mxu0 %vm10730_vm1, %v10729_v15 }
0x440b   :  { %10051 = vmatprep.subr.mxu0 %v10729_v15  ;;  %10048 = vmatprep.mubr.msk.f32.mxu1 %vm10730_vm1, %v10729_v15 }
0x440d   :  { %10044 = vmatmul.mubr.msk.f32.vlgmr.msra.gmra.mrb[112].mxu0 %vm328_vm2, %v8067_v16 }
0x440e   :  { %10053 = vmatprep.mubr.msk.f32.mxu0 %vm10730_vm1, %v10729_v15 }
0x44d8   :  { %v12130_v38 = vpop.f32.mrb[94].mxu1 }
0x44d9   :  { %v10030_v63 = vpop.f32.mrb[95].mxu1 }
0x44dc   :  { %v12132_v0 = vpop.f32.mrb[110].mxu0  ;;  %v8062_v3 = vpop.f32.mrb[96].mxu1 }
0x44dd   :  { %v10202_v4 = vpack.i.bf16 %v12132_v0, %v12130_v38  ;;  %v8144_v18 = vmul.f32 0.35355338, %v8062_v3  ;;  %v10035_v29 = vpop.f32.mrb[111].mxu0  ;;  %v10040_v27 = vpop.f32.mrb[97].mxu1 }
0x44df   :  { %v8146_v2 = vadd.f32 %v8144_v18, %v11051_v52 }
0x44e0   :  { %v8140_v28 = vpop.f32.mrb[112].mxu0 }
0x44e1   :  { %v8145_v1 = vmul.f32 0.35355338, %v8140_v28  ;;  %v10045_v6 = vpop.f32.mrb[113].mxu0  ;;  %v8148_v8 = vsel %vm328_vm2, %v8146_v2, -inf }
0x44e2   :  { %8149 = vmax.xlane.f32.xlu1 %v8148_v8  ;;  %v10254_v8 = vld [vmem:[%s12284_s10 + $0x38] sm:$0xff]  }
0x44e3   :  { %v8147_v32 = vadd.f32 %v8145_v1, %v11054_v56 }
0x44e5   :  { %v8151_v11 = vsel %vm328_vm2, %v8147_v32, -inf }
0x44e6   :  { %8152 = vmax.xlane.f32.xlu0 %v8151_v11 }
0x44f3   :  { %8246 = vrot.lane.b32.xlu1 %v12036_v60, %s10738_s5 }
0x44f7   :  { %8324 = vrot.lane.b32.xlu1 %v12034_v43, %s10739_s9 }
0x44fc   :  { %8170 = vrot.lane.b32.xlu0 %v12034_v43, %s10738_s5 }
0x4500   :  { %8402 = vrot.lane.b32.xlu0 %v12036_v60, %s10739_s9 }
0x456f   :  { %v8150_v13 = vpop.xlane.xlu1 %8149 }
0x4570   :  { %v8154_v14 = vsub.f32 %v8146_v2, %v8150_v13 }
0x4572   :  { %v8156_v50 = vmul.f32 1.442695, %v8154_v14 }
0x4573   :  { %v8247_v23 = vpop.permute.xlu1 %8246  ;;  %v8153_v7 = vpop.xlane.xlu0 %8152 }
0x4574   :  { %10437 = vpow2.f32 %v8156_v50  ;;  %v8155_v9 = vsub.f32 %v8147_v32, %v8153_v7  ;;  %10052 = vmatpush3.msra.mxu0 %v8247_v23 }
0x4575   :  { %10061 = vmatprep.subr.mxu0 %v10729_v15 }
0x4576   :  { %v8158_v19 = vmul.f32 1.442695, %v8155_v9 }
0x4577   :  { %v8171_v55 = vpop.permute.xlu0 %8170  ;;  %v8325_v31 = vpop.permute.xlu1 %8324 }
0x4578   :  { %10439 = vpow2.f32 %v8158_v19  ;;  %10047 = vmatpush3.msra.mxu1 %v8171_v55 }
0x4579   :  { %10056 = vmatprep.subr.mxu1 %v10729_v15 }
0x457b   :  { %v8403_v12 = vpop.permute.xlu0 %8402 }
0x457e   :  { %v10438_v22 = vpop.eup %10437 }
0x457f   :  { %v8160_v26 = vsel %vm328_vm2, %v10438_v22, 0.0 }
0x4580   :  { %8161 = vadd.xlane.f32.xlu0 %v8160_v26 }
0x4582   :  { %v10440_v58 = vpop.eup %10439 }
0x4583   :  { %v8163_v36 = vsel %vm328_vm2, %v10440_v58, 0.0 }
0x4584   :  { %8164 = vadd.xlane.f32.xlu1 %v8163_v36 }
0x4595   :  { %8322 = vrot.lane.b32.xlu1 %v12034_v43, %s10740_s27 }
0x4596   :  { %8400 = vrot.lane.b32.xlu0 %v12036_v60, %s10740_s27 }
0x460d   :  { %v8162_v10 = vpop.xlane.xlu0 %8161 }
0x460e   :  { %10441 = vrcp.f32 %v8162_v10 }
0x4611   :  { %v8165_v33 = vpop.xlane.xlu1 %8164  ;;  %v8401_v42 = vpop.permute.xlu0 %8400 }
0x4612   :  { %10443 = vrcp.f32 %v8165_v33 }
0x4615   :  { %v8323_v39 = vpop.permute.xlu1 %8322 }
0x4618   :  { %v10442_v37 = vpop.eup %10441 }
0x4619   :  { %v8167_v40 = vmul.f32 %v10442_v37, %v10438_v22 }
0x461b   :  { %10049 = vmatmul.mubr.msk.f32.vlgmr.msra.gmra.mrb[98].mxu1 %vm328_vm2, %v8167_v40 }
0x461c   :  { %v10444_v41 = vpop.eup %10443  ;;  %10057 = vmatpush3.xpose.msk.msra.mxu1 %vm328_vm2, %v8325_v31  ;;  %10058 = vmatprep.mubr.msk.f32.mxu1 %vm10730_vm1, %v10729_v15 }
0x461d   :  { %v8169_v30 = vmul.f32 %v10444_v41, %v10440_v58  ;;  %10066 = vmatprep.subr.mxu1 %v10729_v15 }
0x461f   :  { %10054 = vmatmul.mubr.msk.f32.vlgmr.msra.gmra.mrb[114].mxu0 %vm328_vm2, %v8169_v30  ;;  %10059 = vmatmul.mubr.msk.f32.vlgmr.msra.gmra.mrb[100].mxu1 %vm328_vm2, %v8323_v39 }
0x4620   :  { %10062 = vmatpush3.xpose.msk.msra.mxu0 %vm328_vm2, %v8403_v12  ;;  %10063 = vmatprep.mubr.msk.f32.mxu0 %vm10730_vm1, %v10729_v15 }
0x4621   :  { %10071 = vmatprep.subr.mxu0 %v10729_v15  ;;  %10068 = vmatprep.mubr.msk.f32.mxu1 %vm10730_vm1, %v10729_v15 }
0x4623   :  { %10064 = vmatmul.mubr.msk.f32.vlgmr.msra.gmra.mrb[116].mxu0 %vm328_vm2, %v8401_v42 }
0x4624   :  { %10073 = vmatprep.mubr.msk.f32.mxu0 %vm10730_vm1, %v10729_v15 }
0x46ee   :  { %v8242_v25 = vpop.f32.mrb[98].mxu1 }
0x46ef   :  { %v10050_v48 = vpop.f32.mrb[99].mxu1 }
0x46f2   :  { %v8318_v45 = vpop.f32.mrb[114].mxu0  ;;  %v8396_v59 = vpop.f32.mrb[100].mxu1 }
0x46f3   :  { %v10207_v61 = vpack.i.bf16 %v8318_v45, %v8242_v25  ;;  %v8478_v62 = vmul.f32 0.35355338, %v8396_v59  ;;  %v10055_v20 = vpop.f32.mrb[115].mxu0  ;;  %v10060_v46 = vpop.f32.mrb[101].mxu1 }
0x46f5   :  { %v8480_v5 = vadd.f32 %v8478_v62, %v11051_v52 }
0x46f6   :  { %v8474_v44 = vpop.f32.mrb[116].mxu0 }
0x46f7   :  { %v8479_v49 = vmul.f32 0.35355338, %v8474_v44  ;;  %v10065_v24 = vpop.f32.mrb[117].mxu0  ;;  %v8482_v54 = vsel %vm328_vm2, %v8480_v5, -inf }
0x46f8   :  { %8483 = vmax.xlane.f32.xlu1 %v8482_v54 }
0x46f9   :  { %v8481_v34 = vadd.f32 %v8479_v49, %v11054_v56 }
0x46fb   :  { %v8485_v53 = vsel %vm328_vm2, %v8481_v34, -inf }
0x46fc   :  { %8486 = vmax.xlane.f32.xlu0 %v8485_v53  ;;  %v10255_v53 = vld [vmem:[%s12288_s14 + $0x30] sm:$0xff]  }
0x4785   :  { %v8484_v51 = vpop.xlane.xlu1 %8483 }
0x4786   :  { %v8488_v35 = vsub.f32 %v8480_v5, %v8484_v51  ;;  %v10256_v51 = vld [vmem:[%s12288_s14 + $0x38] sm:$0xff]  }
0x4788   :  { %v8490_v16 = vmul.f32 1.442695, %v8488_v35  ;;  %v10257_v35 = vld [vmem:[%s12290_s16 + $0x60] sm:$0xff]  }
0x4789   :  { %v8487_v63 = vpop.xlane.xlu0 %8486 }
0x478a   :  { %10445 = vpow2.f32 %v8490_v16  ;;  %v8489_v3 = vsub.f32 %v8481_v34, %v8487_v63  ;;  %v10258_v16 = vld [vmem:[%s12290_s16 + $0x68] sm:$0xff]  }
0x478c   :  { %v8492_v18 = vmul.f32 1.442695, %v8489_v3 }
0x478e   :  { %10447 = vpow2.f32 %v8492_v18 }
0x4794   :  { %v10446_v52 = vpop.eup %10445 }
0x4795   :  { %v8494_v29 = vsel %vm328_vm2, %v10446_v52, 0.0 }
0x4796   :  { %8495 = vadd.xlane.f32.xlu0 %v8494_v29 }
0x4798   :  { %v10448_v27 = vpop.eup %10447 }
0x4799   :  { %v8497_v2 = vsel %vm328_vm2, %v10448_v27, 0.0 }
0x479a   :  { %8498 = vadd.xlane.f32.xlu1 %v8497_v2 }
0x47ab   :  { %8580 = vrot.lane.b32.xlu1 %v12036_v60, %s10741_s7 }
0x47ac   :  { %8504 = vrot.lane.b32.xlu0 %v12034_v43, %s10741_s7 }
0x47af   :  { %10203 = vrot.lane.b32.xlu1 %v10202_v4, %s10742_s25  ;;  %v10253_v4 = vld [vmem:[%s12284_s10 + $0x30] sm:$0xff]  }
0x47b0   :  { %10208 = vrot.lane.b32.xlu0 %v10207_v61, %s10720_s22 }
0x4823   :  { %v8496_v56 = vpop.xlane.xlu0 %8495 }
0x4824   :  { %10449 = vrcp.f32 %v8496_v56 }
0x4827   :  { %v8499_v28 = vpop.xlane.xlu1 %8498  ;;  %v8505_v1 = vpop.permute.xlu0 %8504 }
0x4828   :  { %10451 = vrcp.f32 %v8499_v28  ;;  %10067 = vmatpush3.msra.mxu1 %v8505_v1  ;;  %v9287_v28 = vld [vmem:[#allocation13 + $0x3] ss:$0 sm:$0xff] }
0x4829   :  { %10076 = vmatprep.subr.bf16.mxu1 %v10729_v15 }
0x482b   :  { %v8581_v6 = vpop.permute.xlu1 %8580  ;;  %v10209_v19 = vpop.permute.xlu0 %10208 }
0x482c   :  { %10072 = vmatpush3.msra.mxu0 %v8581_v6  ;;  %v10211_v26 = vunpack.i.h.bf16 %v10209_v19  ;;  %v10210_v58 = vunpack.i.l.bf16 %v10209_v19 }
0x482d   :  { %10084 = vmatprep.subr.bf16.mxu0 %v10729_v15 }
0x482e   :  { %v10450_v43 = vpop.eup %10449 }
0x482f   :  { %v8501_v60 = vmul.f32 %v10450_v43, %v10446_v52  ;;  %v10204_v23 = vpop.permute.xlu1 %10203 }
0x4830   :  { %v10206_v7 = vunpack.i.h.bf16 %v10204_v23  ;;  %v10205_v9 = vunpack.i.l.bf16 %v10204_v23 }
0x4831   :  { %10069 = vmatmul.mubr.msk.f32.vlgmr.msra.gmra.mrb[102].mxu1 %vm328_vm2, %v8501_v60  ;;  %v9288_v60 = vld [vmem:[#allocation14 + $0x3] ss:$0 sm:$0xff] }
0x4832   :  { %v10452_v38 = vpop.eup %10451  ;;  %10080 = vmatprep.mubr.msk.bf16.mxu1 %vm10730_vm1, %v10729_v15  ;;  %10077 = vmatpush3.bf16.msra.mxu1 %v10253_v4  ;;  %v8681_v55 = vsel %vm328_vm2, %v12092_v21, %v10206_v7  ;;  %v8680_v22 = vsel %vm328_vm2, %v12090_v17, %v10205_v9  ;;  %v9283_v17 = vld [vmem:[#allocation11 + $0x3] ss:$0 sm:$0xff] }
0x4833   :  { %v8503_v0 = vmul.f32 %v10452_v38, %v10448_v27  ;;  %10078 = vmatprep.subr.bf16.mxu1 %v10729_v15  ;;  %v8682_v10 = vsel %vm1698_vm3, %v8680_v22, %v10210_v58  ;;  %v8683_v33 = vsel %vm1698_vm3, %v8681_v55, %v10211_v26  ;;  %v9305_v58 = vld [vmem:[#allocation17 + $0x3] ss:$0 sm:$0xff] }
0x4835   :  { %10074 = vmatmul.mubr.msk.f32.vlgmr.msra.gmra.mrb[118].mxu0 %vm328_vm2, %v8503_v0 }
0x4836   :  { %10088 = vmatprep.mubr.msk.bf16.mxu0 %vm10730_vm1, %v10729_v15  ;;  %10079 = vmatpush3.bf16.msra.mxu1 %v10254_v8 }
0x4837   :  { %10092 = vmatprep.subr.bf16.mxu1 %v10729_v15  ;;  %10085 = vmatpush3.bf16.msra.mxu0 %v10255_v53 }
0x4838   :  { %10086 = vmatprep.subr.bf16.mxu0 %v10729_v15 }
0x483b   :  { %10087 = vmatpush3.bf16.msra.mxu0 %v10256_v51 }
0x4904   :  { %v8576_v32 = vpop.f32.mrb[102].mxu1 }
0x4905   :  { %v10070_v11 = vpop.f32.mrb[103].mxu1 }
0x4906   :  { %v10260_v11 = vld [vmem:[%s12290_s16 + $0x78] sm:$0xff]  }
0x4908   :  { %v8652_v13 = vpop.f32.mrb[118].mxu0 }
0x4909   :  { %v10212_v14 = vpack.i.bf16 %v8652_v13, %v8576_v32  ;;  %v10075_v50 = vpop.f32.mrb[119].mxu0  ;;  %v10259_v32 = vld [vmem:[%s12290_s16 + $0x70] sm:$0xff]   ;;  %v9293_v13 = vld [vmem:[#allocation16 + $0x3] ss:$0 sm:$0xff]  ;;  %s10746_s16 = smov [#allocation19]  }
0x490a   :  { %s8999_s21 = sshll.u32 %s10746_s16, 4  ;;  %s9000_s21 = int_to_ptr.vmem [resolvable:$true] %s8999_s21 }
0x490b   :  { %10213 = vrot.lane.b32.xlu1 %v10212_v14, %s10743_s6  ;;  %s10681_s17 = scalar_lea.vmem %s9000_s21, 256  ;;  %p10686_p11 = scmp.lt.s32.totalorder %s9000_s21, %s9000_s21 }
0x490c   :  { %p10682_p10 = scmp.ne.s32.totalorder %s9000_s21, %s10681_s17  ;;  %p10687_p12 = scmp.lt.s32.totalorder %s10681_s17, %s10681_s17 }
0x490e   :  { %p10688_p13 = por %p10687_p12, %p10686_p11 }
0x4910   :  { %p10689_p0 = pnand %p10688_p13, %p10682_p10 }
0x497d   :  { %v10214_v36 = vpop.permute.xlu1 %10213 }
0x497e   :  { %v10216_v12 = vunpack.i.h.bf16 %v10214_v36  ;;  %v10215_v31 = vunpack.i.l.bf16 %v10214_v36 }
0x4980   :  { %v8685_v37 = vsel %vm1701_vm4, %v8683_v33, %v10216_v12  ;;  %v8684_v40 = vsel %vm1701_vm4, %v8682_v10, %v10215_v31 }
0x4981   :  { %v8686_v41 = vpack.c.bf16 %v8685_v37, %v8684_v40 }
0x4983   :  { %10081 = vmatmul.mubr.msk.bf16.vlgmr.msra.gmra.mrb[104].mxu1 %vm213_vm0, %v8686_v41 }
0x4984   :  { %10100 = vmatprep.mubr.msk.bf16.mxu1 %vm10730_vm1, %v10729_v15  ;;  %10093 = vmatpush3.bf16.msra.mxu1 %v10257_v35 }
0x4985   :  { %10094 = vmatprep.subr.bf16.mxu1 %v10729_v15 }
0x4988   :  { %10095 = vmatpush3.bf16.msra.mxu1 %v10258_v16 }
0x4989   :  { %10096 = vmatprep.subr.bf16.mxu1 %v10729_v15 }
0x498c   :  { %10097 = vmatpush3.bf16.msra.mxu1 %v10259_v32 }
0x498d   :  { %10098 = vmatprep.subr.bf16.mxu1 %v10729_v15 }
0x4990   :  { %10099 = vmatpush3.bf16.msra.mxu1 %v10260_v11 }
0x4a56   :  { %v8749_v21 = vpop.f32.mrb[104].mxu1 }
0x4a57   :  { %v8750_v30 = vadd.f32 %v9283_v17, %v8749_v21  ;;  %v10082_v39 = vpop.f32.mrb[105].mxu1 }
0x4a58   :  { %v8752_v42 = vpop.f32.mrb[106].mxu1 }
0x4a59   :  { %v12216_v25 = vadd.f32 %v8750_v30, %v12010_v47  ;;  %v8753_v48 = vadd.f32 %v9283_v17, %v8752_v42  ;;  %v10083_v45 = vpop.f32.mrb[107].mxu1 }
0x4a5b   :  { %v12219_v59 = vadd.f32 %v8753_v48, %v12013_v57  ;;  %v8762_v61 = vsel %vm213_vm0, %v12216_v25, 0.0 }
0x4a5c   :  { %8763 = vadd.xlane.f32.xlu0 %v8762_v61 }
0x4a5d   :  { %v8765_v62 = vsel %vm213_vm0, %v12219_v59, 0.0 }
0x4a5e   :  { %8766 = vadd.xlane.f32.xlu1 %v8765_v62 }
0x4ae9   :  { %v8764_v20 = vpop.xlane.xlu0 %8763 }
0x4aea   :  { %v8768_v46 = vmul.f32 0.03125, %v8764_v20 }
0x4aeb   :  { %v8767_v5 = vpop.xlane.xlu1 %8766 }
0x4aec   :  { %v8770_v44 = vsub.f32 %v12216_v25, %v8768_v46  ;;  %v8769_v47 = vmul.f32 0.03125, %v8767_v5 }
0x4aee   :  { %v8771_v49 = vsub.f32 %v12219_v59, %v8769_v47  ;;  %v8772_v24 = vmul.f32 %v8770_v44, %v8770_v44 }
0x4af0   :  { %v8774_v57 = vsel %vm213_vm0, %v8772_v24, 0.0  ;;  %v8773_v54 = vmul.f32 %v8771_v49, %v8771_v49 }
0x4af1   :  { %8775 = vadd.xlane.f32.xlu0 %v8774_v57 }
0x4af2   :  { %v8777_v34 = vsel %vm213_vm0, %v8773_v54, 0.0 }
0x4af5   :  { %8778 = vadd.xlane.f32.xlu0 %v8777_v34 }
0x4b7e   :  { %v8776_v63 = vpop.xlane.xlu0 %8775 }
0x4b7f   :  { %v8780_v3 = vmul.f32 0.03125, %v8776_v63 }
0x4b81   :  { %v8782_v18 = vadd.f32 1e-06, %v8780_v3 }
0x4b82   :  { %v8779_v52 = vpop.xlane.xlu0 %8778 }
0x4b83   :  { %10453 = vrsqrt.f32 %v8782_v18  ;;  %v8781_v29 = vmul.f32 0.03125, %v8779_v52 }
0x4b85   :  { %v8783_v27 = vadd.f32 1e-06, %v8781_v29 }
0x4b87   :  { %10455 = vrsqrt.f32 %v8783_v27 }
0x4b8d   :  { %v10454_v2 = vpop.eup %10453 }
0x4b8e   :  { %v8786_v56 = vmul.f32 %v10454_v2, %v8770_v44 }
0x4b90   :  { %v8794_v6 = vmul.f32 %v9287_v28, %v8786_v56 }
0x4b91   :  { %v10456_v1 = vpop.eup %10455 }
0x4b92   :  { %v8787_v43 = vmul.f32 %v10456_v1, %v8771_v49  ;;  %v8802_v0 = vadd.f32 %v9288_v60, %v8794_v6 }
0x4b94   :  { %v8795_v38 = vmul.f32 %v9287_v28, %v8787_v43 }
0x4b96   :  { %v8803_v4 = vadd.f32 %v9288_v60, %v8795_v38 }
0x4b98   :  { %v8804_v8 = vpack.c.bf16 %v8803_v4, %v8802_v0 }
0x4b9a   :  { %10089 = vmatmul.mubr.msk.bf16.vlgmr.msra.gmra.mrb[120].mxu0 %vm213_vm0, %v8804_v8 }
0x4c6d   :  { %v8867_v14 = vpop.f32.mrb[120].mxu0 }
0x4c6e   :  { %v8868_v50 = vadd.f32 %v9293_v13, %v8867_v14  ;;  %v10090_v23 = vpop.f32.mrb[121].mxu0 }
0x4c6f   :  { %v8870_v7 = vpop.f32.mrb[122].mxu0 }
0x4c70   :  { %v8871_v9 = vadd.f32 %v9293_v13, %v8870_v7  ;;  %v10091_v19 = vpop.f32.mrb[123].mxu0  ;;  %v8874_v55 = vmax.f32 %v8868_v50, 0.0 }
0x4c72   :  { %v8875_v22 = vmax.f32 %v8871_v9, 0.0 }
0x4c74   :  { %v8876_v26 = vpack.c.bf16 %v8875_v22, %v8874_v55 }
0x4c76   :  { %10101 = vmatmul.mubr.msk.bf16.vlgmr.msra.gmra.mrb[108].mxu1 %vm1928_vm5, %v8876_v26 }
0x4d49   :  { %v8955_v36 = vpop.f32.mrb[108].mxu1 }
0x4d4a   :  { %v8956_v15 = vadd.f32 %v9305_v58, %v8955_v36  ;;  %v10102_v12 = vpop.f32.mrb[109].mxu1 }
0x4d4b   :  { %v8958_v31 = vpop.f32.mrb[110].mxu1 }
0x4d4c   :  { %v8962_v10 = vadd.f32 %v8956_v15, %v12216_v25  ;;  %v8959_v33 = vadd.f32 %v9305_v58, %v8958_v31  ;;  %v10103_v37 = vpop.f32.mrb[111].mxu1 }
0x4d4e   :  { %v8964_v40 = vmax.f32 %v8962_v10, 0.0  ;;  %v8963_v41 = vadd.f32 %v8959_v33, %v12219_v59 }
0x4d50   :  { %v8965_v17 = vmax.f32 %v8963_v41, 0.0  ;;  %v8966_v21 = vsel %vm213_vm0, %v8964_v40, 0.0 }
0x4d51   :  { %8967 = vadd.xlane.f32.xlu1 %v8966_v21 }
0x4d52   :  { %v8969_v30 = vsel %vm213_vm0, %v8965_v17, 0.0 }
0x4d53   :  { %8970 = vadd.xlane.f32.xlu0 %v8969_v30 }
0x4dde   :  { %v8968_v39 = vpop.xlane.xlu1 %8967 }
0x4ddf   :  { %v8972_v42 = vmul.f32 0.03125, %v8968_v39 }
0x4de0   :  { %v8971_v48 = vpop.xlane.xlu0 %8970 }
0x4de1   :  { %v8974_v45 = vsub.f32 %v8964_v40, %v8972_v42  ;;  %v8973_v61 = vmul.f32 0.03125, %v8971_v48 }
0x4de3   :  { %v8975_v62 = vsub.f32 %v8965_v17, %v8973_v61  ;;  %v8976_v20 = vmul.f32 %v8974_v45, %v8974_v45 }
0x4de5   :  { %v8978_v25 = vsel %vm213_vm0, %v8976_v20, 0.0  ;;  %v8977_v46 = vmul.f32 %v8975_v62, %v8975_v62 }
0x4de6   :  { %8979 = vadd.xlane.f32.xlu1 %v8978_v25 }
0x4de7   :  { %v8981_v59 = vsel %vm213_vm0, %v8977_v46, 0.0 }
0x4de8   :  { %8982 = vadd.xlane.f32.xlu0 %v8981_v59 }
0x4e73   :  { %v8980_v5 = vpop.xlane.xlu1 %8979 }
0x4e74   :  { %v8984_v44 = vmul.f32 0.03125, %v8980_v5 }
0x4e75   :  { %v8983_v47 = vpop.xlane.xlu0 %8982 }
0x4e76   :  { %v8986_v49 = vadd.f32 1e-06, %v8984_v44  ;;  %v8985_v24 = vmul.f32 0.03125, %v8983_v47 }
0x4e78   :  { %10457 = vrsqrt.f32 %v8986_v49  ;;  %v8987_v57 = vadd.f32 1e-06, %v8985_v24 }
0x4e7a   :  { %10459 = vrsqrt.f32 %v8987_v57 }
0x4e82   :  { %v10458_v54 = vpop.eup %10457 }
0x4e83   :  { %v8990_v34 = vmul.f32 %v10458_v54, %v8974_v45 }
0x4e84   :  { %v10460_v53 = vpop.eup %10459 }
0x4e85   :  { %8992 = vst.msk [vmem:[#allocation19] sm:$0xff] %vm213_vm0, %v8990_v34  ;;  %v8991_v51 = vmul.f32 %v10460_v53, %v8975_v62 }
0x4e87   :  { %8993 = vst.msk [vmem:[#allocation19 + $0x8] sm:$0xff] %vm213_vm0, %v8991_v51 }
0x4e88   :  { %10692 = shalt.err (!%p10689_p0)
}
0x4e89   :  { %s10693_s30 = scalar_lea.hbm %s12292_s18, 256 }
0x4e8a   :  { %p10694_p1 = scmp.ne.s32.totalorder %s12292_s18, %s10693_s30  ;;  %p10697_p2 = scmp.lt.u32.totalorder %s10693_s30, %s12292_s18 }
0x4e8c   :  { %p10699_p3 = pnand %p10697_p2, %p10694_p1 }
0x4e8e   :  { %10702 = shalt.err (!%p10699_p3)
}
0x4e8f   :  { %s10747_s28 = smov 128  }
0x4e90   :  { %9005 = dma.vmem_to_hbm [thread:$0]  %s9000_s21, 256, %s12292_s18, [#allocation4], %s10747_s28, %s10747_s28, %s10742_s25  }
0x4e91   :  { %10715 = dma.done.wait [#allocation4], 256  }
0x4e92   :  { %10716 = vsyncadd [#allocation4], 4294967040 }
0x4e93   :  { %9009 = vsyncpa [#allocation3], 1 }
0x4e94   :  { %9010 = vsyncpa [#allocation6], 1 }
0x4e95   :  { %9011 = vsyncpa [#allocation9], 1 }
0x4e96   :  { %9012 = vsyncpa [#allocation12], 1 }
0x4e97   :  { %9013 = vsyncpa [#allocation15], 1 }
0x4e98   :  { %9014 = vsyncpa [#allocation18], 1 }
0x4e99   :  { %9015 = vsyncpa [#allocation4], 1 }

</bundles_post_ra>
